<compile_context>
chip_gen: v7x
topology: tpu7x:2x2x1
jax: 0.10.0
libtpu: 0.0.40
codegen_flags: <defaults>
</compile_context>

<pallas_src>
import jax
import jax.numpy as jnp
from jax.experimental import pallas as pl
from jax.experimental.pallas import tpu as pltpu

# ----------------------------- model config ---------------------------------
DIM_IN = 128     # module default is 128
DIM_OUT = 256    # module default is 512 (kept small)
DEPTH = 4        # module default is 8  (kept small)
LR_MUL = 0.1
BATCH = 512      # batched latents -> fills the MXU M dimension
EPS = 1e-12      # F.normalize default eps


def _num_tensorcores():
    """2 on v7x (two TensorCores share one JAX device); 1 on v5e/v6e."""
    try:
        kind = jax.devices()[0].device_kind.lower()
        if "v7" in kind or "tpu7" in kind or "7x" in kind:
            return 2
    except Exception:
        pass
    return 1


_NUM_TC = _num_tensorcores()


def stylegan_kernel(x_ref, w0_ref, ws_ref, b_ref, o_ref):
    """Fused: L2-normalize -> DEPTH x (EqualLinear + LeakyReLU(0.2)).

    x_ref : (TB, DIM_IN)                  f32
    w0_ref: (DIM_IN, DIM_OUT)             bf16  (layer-0 weight, pre-transposed, *LR_MUL)
    ws_ref: (DEPTH-1, DIM_OUT, DIM_OUT)   bf16  (pre-transposed, *LR_MUL)
    b_ref : (DEPTH, DIM_OUT)              f32   (all biases, *LR_MUL)
    o_ref : (TB, DIM_OUT)                 f32
    """
    x = x_ref[...]

    # F.normalize(x, dim=1): x / max(||x||_2, eps) == x * rsqrt(max(||x||^2, eps^2))
    # (rsqrt runs on the EUP slot; eps clamp kept in f32).
    sumsq = jnp.sum(x * x, axis=1, keepdims=True)
    x = x * jax.lax.rsqrt(jnp.maximum(sumsq, EPS * EPS))

    # Layer 0: LR_MUL is folded into w0/b, so epilogue = bias-add + leaky-relu.
    h_bf = x.astype(jnp.bfloat16)
    acc = jnp.dot(h_bf, w0_ref[...], preferred_element_type=jnp.float32)
    acc = acc + b_ref[0:1, :]
    acc = jnp.maximum(acc, 0.2 * acc)          # leaky_relu(0.2), 0 < slope < 1

    # Remaining layers (static unroll; DEPTH is small). Carry bf16 activations.
    for i in range(DEPTH - 1):
        h_bf = acc.astype(jnp.bfloat16)
        acc = jnp.dot(h_bf, ws_ref[i], preferred_element_type=jnp.float32)
        acc = acc + b_ref[i + 1:i + 2, :]
        acc = jnp.maximum(acc, 0.2 * acc)

    o_ref[...] = acc.astype(o_ref.dtype)


def prepare_params(w0, b0, ws, bs):
    """One-time parameter prep (hoisted out of the forward pass):
    transpose PyTorch (out, in) weights to (in, out), fold LR_MUL into both
    weights and biases, cast weights to bf16, stack biases into one lane-dense
    (DEPTH, DIM_OUT) f32 array."""
    w0_t = (jnp.transpose(w0) * LR_MUL).astype(jnp.bfloat16)            # (DIM_IN, DIM_OUT)
    ws_t = (jnp.transpose(ws, (0, 2, 1)) * LR_MUL).astype(jnp.bfloat16)  # (DEPTH-1, DIM_OUT, DIM_OUT)
    b_all = (jnp.concatenate(
        [b0.reshape(1, DIM_OUT), bs.reshape(DEPTH - 1, DIM_OUT)], axis=0
    ) * LR_MUL).astype(jnp.float32)                                      # (DEPTH, DIM_OUT)
    return w0_t, ws_t, b_all


@jax.jit
def stylegan_forward(x, w0_t, ws_t, b_all):
    """Forward pass. x: (B, DIM_IN) f32; params pre-prepared by prepare_params."""
    B = x.shape[0]

    # Generation-dependent batch tiling:
    #   * v5e/v6e (1 TC): single full-batch tile, grid=(1,) -> no grid-step
    #     overhead, nothing to pipeline (weights are resident anyway).
    #   * v7x (2 TCs): split the batch into two parallel tiles so both cores
    #     work; keep tiles >= 256 rows so the 256x256 MXU M dim stays full.
    if _NUM_TC > 1 and B >= 2 * 256:
        tb = pl.cdiv(B, _NUM_TC)
        tb = ((tb + 7) // 8) * 8          # keep the sublane dim aligned
    else:
        tb = B

    # Pad batch up to a multiple of the tile (zero rows normalize to zero, no NaNs).
    n_tiles = pl.cdiv(B, tb)
    b_padded = n_tiles * tb
    x_in = x if b_padded == B else jnp.pad(x, ((0, b_padded - B), (0, 0)))

    flops = 2 * b_padded * (DIM_IN * DIM_OUT + (DEPTH - 1) * DIM_OUT * DIM_OUT)
    bytes_accessed = (x_in.size * 4 + w0_t.size * 2 + ws_t.size * 2
                      + b_all.size * 4 + b_padded * DIM_OUT * 4)

    out = pl.pallas_call(
        stylegan_kernel,
        out_shape=jax.ShapeDtypeStruct((b_padded, DIM_OUT), jnp.float32),
        grid=(n_tiles,),
        in_specs=[
            pl.BlockSpec((tb, DIM_IN), lambda i: (i, 0)),                      # x tile
            pl.BlockSpec((DIM_IN, DIM_OUT), lambda i: (0, 0)),                 # w0 (resident)
            pl.BlockSpec((DEPTH - 1, DIM_OUT, DIM_OUT), lambda i: (0, 0, 0)),  # ws (resident)
            pl.BlockSpec((DEPTH, DIM_OUT), lambda i: (0, 0)),                  # biases (resident)
        ],
        out_specs=pl.BlockSpec((tb, DIM_OUT), lambda i: (i, 0)),
        compiler_params=pltpu.CompilerParams(
            dimension_semantics=("parallel",)),
        cost_estimate=pl.CostEstimate(
            flops=flops, transcendentals=b_padded, bytes_accessed=bytes_accessed),
    )(x_in, w0_t, ws_t, b_all)

    return out if b_padded == B else out[:B]


def stylegan_reference(x, w0, b0, ws, bs):
    """Pure-JAX f32 reference mirroring the PyTorch forward."""
    norm = jnp.sqrt(jnp.sum(x * x, axis=1, keepdims=True))
    h = x / jnp.maximum(norm, EPS)
    h = h @ (w0 * LR_MUL).T + b0 * LR_MUL
    h = jnp.where(h > 0, h, 0.2 * h)
    for i in range(DEPTH - 1):
        h = h @ (ws[i] * LR_MUL).T + bs[i] * LR_MUL
        h = jnp.where(h > 0, h, 0.2 * h)
    return h


if __name__ == "__main__":
    key = jax.random.PRNGKey(0)
    kx, kw0, kws = jax.random.split(key, 3)

    # Deterministic parameter init (matches __init__ shapes):
    #   EqualLinear.weight ~ randn(dim_out, dim_in); bias = zeros(dim_out)
    x = jax.random.normal(kx, (BATCH, DIM_IN), dtype=jnp.float32)
    w0 = jax.random.normal(kw0, (DIM_OUT, DIM_IN), dtype=jnp.float32)
    b0 = jnp.zeros((DIM_OUT,), dtype=jnp.float32)
    ws = jax.random.normal(kws, (DEPTH - 1, DIM_OUT, DIM_OUT), dtype=jnp.float32)
    bs = jnp.zeros((DEPTH - 1, DIM_OUT), dtype=jnp.float32)

    # One-time parameter preparation (transpose + LR_MUL fold + bf16 cast).
    w0_t, ws_t, b_all = prepare_params(w0, b0, ws, bs)

    out = stylegan_forward(x, w0_t, ws_t, b_all)
    out = jax.block_until_ready(out)

    ref = stylegan_reference(x, w0, b0, ws, bs)
    assert out.shape == (BATCH, DIM_OUT)
    # bf16 weights/activations + rsqrt approx -> ~1e-2 agreement with f32 ref.
    assert jnp.allclose(out, ref, rtol=2e-2, atol=2e-2), "mismatch vs reference"

    print("KERNEL_OK")
</pallas_src>

<mosaic_0001>
module attributes {stable_mosaic.version = 11 : i64} {
  func.func @stylegan_kernel(%arg0: i32, %arg1: memref<512x128xf32, #tpu.memory_space<vmem>>, %arg2: memref<128x256xbf16, #tpu.memory_space<vmem>>, %arg3: memref<3x256x256xbf16, #tpu.memory_space<vmem>>, %arg4: memref<4x256xf32, #tpu.memory_space<vmem>>, %arg5: memref<512x256xf32, #tpu.memory_space<vmem>>) attributes {dimension_semantics = [#tpu.dimension_semantics<parallel>], iteration_bounds = array<i64: 1>, scalar_prefetch = 0 : i64, scratch_operands = 0 : i64, tpu.core_type = #tpu.core_type<tc>, window_params = [{transform_indices = @transform_0, window_bounds = array<i64: 512, 128>}, {pipeline_mode = #tpu.pipeline_mode<synchronous>, transform_indices = @transform_1, window_bounds = array<i64: 128, 256>}, {pipeline_mode = #tpu.pipeline_mode<synchronous>, transform_indices = @transform_2, window_bounds = array<i64: 3, 256, 256>}, {pipeline_mode = #tpu.pipeline_mode<synchronous>, transform_indices = @transform_3, window_bounds = array<i64: 4, 256>}, {transform_indices = @transform_4, window_bounds = array<i64: 512, 256>}]} {
    %c0 = arith.constant 0 : index
    %c0_0 = arith.constant 0 : index
    %0 = vector.load %arg1[%c0, %c0_0] : memref<512x128xf32, #tpu.memory_space<vmem>>, vector<512x128xf32>
    %1 = arith.mulf %0, %0 : vector<512x128xf32>
    %cst = arith.constant dense<0.000000e+00> : vector<512xf32>
    %2 = vector.multi_reduction <add>, %1, %cst [1] : vector<512x128xf32> to vector<512xf32>
    %3 = vector.shape_cast %2 : vector<512xf32> to vector<512x1xf32>
    %cst_1 = arith.constant 1.000000e-24 : f32
    %4 = vector.broadcast %cst_1 : f32 to vector<512x1xf32>
    %5 = arith.maximumf %3, %4 : vector<512x1xf32>
    %6 = math.rsqrt %5 : vector<512x1xf32>
    %7 = vector.broadcast %6 : vector<512x1xf32> to vector<512x128xf32>
    %8 = arith.mulf %0, %7 : vector<512x128xf32>
    %9 = arith.truncf %8 : vector<512x128xf32> to vector<512x128xbf16>
    %c0_2 = arith.constant 0 : index
    %c0_3 = arith.constant 0 : index
    %10 = vector.load %arg2[%c0_2, %c0_3] : memref<128x256xbf16, #tpu.memory_space<vmem>>, vector<128x256xbf16>
    %cst_4 = arith.constant dense<0.000000e+00> : vector<512x256xf32>
    %11 = tpu.matmul %9, %10, %cst_4 {dimension_numbers = #tpu.dot_dimension_numbers<[1], [0], [0], [1], [0, 0, 1, 1], [], []>} : vector<512x128xbf16>, vector<128x256xbf16>, vector<512x256xf32> -> vector<512x256xf32>
    %c0_5 = arith.constant 0 : index
    %c0_6 = arith.constant 0 : index
    %12 = vector.load %arg4[%c0_5, %c0_6] : memref<4x256xf32, #tpu.memory_space<vmem>>, vector<1x256xf32>
    %13 = vector.broadcast %12 : vector<1x256xf32> to vector<512x256xf32>
    %14 = arith.addf %11, %13 : vector<512x256xf32>
    %cst_7 = arith.constant 2.000000e-01 : f32
    %15 = vector.broadcast %cst_7 : f32 to vector<512x256xf32>
    %16 = arith.mulf %15, %14 : vector<512x256xf32>
    %17 = arith.maximumf %14, %16 : vector<512x256xf32>
    %18 = arith.truncf %17 : vector<512x256xf32> to vector<512x256xbf16>
    %c0_8 = arith.constant 0 : index
    %c0_9 = arith.constant 0 : index
    %c0_10 = arith.constant 0 : index
    %19 = vector.load %arg3[%c0_8, %c0_9, %c0_10] : memref<3x256x256xbf16, #tpu.memory_space<vmem>>, vector<1x256x256xbf16>
    %20 = vector.shape_cast %19 : vector<1x256x256xbf16> to vector<256x256xbf16>
    %cst_11 = arith.constant dense<0.000000e+00> : vector<512x256xf32>
    %21 = tpu.matmul %18, %20, %cst_11 {dimension_numbers = #tpu.dot_dimension_numbers<[1], [0], [0], [1], [0, 0, 1, 1], [], []>} : vector<512x256xbf16>, vector<256x256xbf16>, vector<512x256xf32> -> vector<512x256xf32>
    %c1 = arith.constant 1 : index
    %c0_12 = arith.constant 0 : index
    %22 = vector.load %arg4[%c1, %c0_12] : memref<4x256xf32, #tpu.memory_space<vmem>>, vector<1x256xf32>
    %23 = vector.broadcast %22 : vector<1x256xf32> to vector<512x256xf32>
    %24 = arith.addf %21, %23 : vector<512x256xf32>
    %cst_13 = arith.constant 2.000000e-01 : f32
    %25 = vector.broadcast %cst_13 : f32 to vector<512x256xf32>
    %26 = arith.mulf %25, %24 : vector<512x256xf32>
    %27 = arith.maximumf %24, %26 : vector<512x256xf32>
    %28 = arith.truncf %27 : vector<512x256xf32> to vector<512x256xbf16>
    %c1_14 = arith.constant 1 : index
    %c0_15 = arith.constant 0 : index
    %c0_16 = arith.constant 0 : index
    %29 = vector.load %arg3[%c1_14, %c0_15, %c0_16] : memref<3x256x256xbf16, #tpu.memory_space<vmem>>, vector<1x256x256xbf16>
    %30 = vector.shape_cast %29 : vector<1x256x256xbf16> to vector<256x256xbf16>
    %cst_17 = arith.constant dense<0.000000e+00> : vector<512x256xf32>
    %31 = tpu.matmul %28, %30, %cst_17 {dimension_numbers = #tpu.dot_dimension_numbers<[1], [0], [0], [1], [0, 0, 1, 1], [], []>} : vector<512x256xbf16>, vector<256x256xbf16>, vector<512x256xf32> -> vector<512x256xf32>
    %c2 = arith.constant 2 : index
    %c0_18 = arith.constant 0 : index
    %32 = vector.load %arg4[%c2, %c0_18] : memref<4x256xf32, #tpu.memory_space<vmem>>, vector<1x256xf32>
    %33 = vector.broadcast %32 : vector<1x256xf32> to vector<512x256xf32>
    %34 = arith.addf %31, %33 : vector<512x256xf32>
    %cst_19 = arith.constant 2.000000e-01 : f32
    %35 = vector.broadcast %cst_19 : f32 to vector<512x256xf32>
    %36 = arith.mulf %35, %34 : vector<512x256xf32>
    %37 = arith.maximumf %34, %36 : vector<512x256xf32>
    %38 = arith.truncf %37 : vector<512x256xf32> to vector<512x256xbf16>
    %c2_20 = arith.constant 2 : index
    %c0_21 = arith.constant 0 : index
    %c0_22 = arith.constant 0 : index
    %39 = vector.load %arg3[%c2_20, %c0_21, %c0_22] : memref<3x256x256xbf16, #tpu.memory_space<vmem>>, vector<1x256x256xbf16>
    %40 = vector.shape_cast %39 : vector<1x256x256xbf16> to vector<256x256xbf16>
    %cst_23 = arith.constant dense<0.000000e+00> : vector<512x256xf32>
    %41 = tpu.matmul %38, %40, %cst_23 {dimension_numbers = #tpu.dot_dimension_numbers<[1], [0], [0], [1], [0, 0, 1, 1], [], []>} : vector<512x256xbf16>, vector<256x256xbf16>, vector<512x256xf32> -> vector<512x256xf32>
    %c3 = arith.constant 3 : index
    %c0_24 = arith.constant 0 : index
    %42 = vector.load %arg4[%c3, %c0_24] : memref<4x256xf32, #tpu.memory_space<vmem>>, vector<1x256xf32>
    %43 = vector.broadcast %42 : vector<1x256xf32> to vector<512x256xf32>
    %44 = arith.addf %41, %43 : vector<512x256xf32>
    %cst_25 = arith.constant 2.000000e-01 : f32
    %45 = vector.broadcast %cst_25 : f32 to vector<512x256xf32>
    %46 = arith.mulf %45, %44 : vector<512x256xf32>
    %47 = arith.maximumf %44, %46 : vector<512x256xf32>
    %c0_26 = arith.constant 0 : index
    %c0_27 = arith.constant 0 : index
    %48 = vector.load %arg5[%c0_26, %c0_27] : memref<512x256xf32, #tpu.memory_space<vmem>>, vector<512x256xf32>
    tpu.vector_store %arg5[%c0_26, %c0_27], %47 {strides = array<i32>} : memref<512x256xf32, #tpu.memory_space<vmem>>, vector<512x256xf32>,
    return
  }
  func.func @transform_0(%arg0: i32) -> (i32, i32) {
    %c0_i32 = arith.constant 0 : i32
    %c0_i32_0 = arith.constant 0 : i32
    return %arg0, %c0_i32 : i32, i32
  }
  func.func @transform_1(%arg0: i32) -> (i32, i32) {
    %c0_i32 = arith.constant 0 : i32
    %c0_i32_0 = arith.constant 0 : i32
    %c0_i32_1 = arith.constant 0 : i32
    return %c0_i32, %c0_i32_0 : i32, i32
  }
  func.func @transform_2(%arg0: i32) -> (i32, i32, i32) {
    %c0_i32 = arith.constant 0 : i32
    %c0_i32_0 = arith.constant 0 : i32
    %c0_i32_1 = arith.constant 0 : i32
    %c0_i32_2 = arith.constant 0 : i32
    return %c0_i32, %c0_i32_0, %c0_i32_1 : i32, i32, i32
  }
  func.func @transform_3(%arg0: i32) -> (i32, i32) {
    %c0_i32 = arith.constant 0 : i32
    %c0_i32_0 = arith.constant 0 : i32
    %c0_i32_1 = arith.constant 0 : i32
    return %c0_i32, %c0_i32_0 : i32, i32
  }
  func.func @transform_4(%arg0: i32) -> (i32, i32) {
    %c0_i32 = arith.constant 0 : i32
    %c0_i32_0 = arith.constant 0 : i32
    return %arg0, %c0_i32 : i32, i32
  }
}

</mosaic_0001>

<bundles_post_ra>
// kernel: stylegan_forward.1
= control target key start
LH: loop header
LB: loop body
LE: loop exit
PB: predicated region body
PF: predicated region fallthrough
CT: control target
= control target key end

     0   :  { %9 = vsyncpa [#allocation3], 0  ;;  %s5651_s0 = inlined_call_operand.hbm [shape: f32[512,128], index: 0, kind: input, shape index: {}]   ;;  %s5652_s1 = inlined_call_operand.hbm [shape: bf16[128,256], index: 1, kind: input, shape index: {}]   ;;  %s5653_s2 = inlined_call_operand.hbm [shape: bf16[3,256,256], index: 2, kind: input, shape index: {}]   ;;  %s5654_s3 = inlined_call_operand.vmem [shape: f32[4,256], index: 3, kind: input, shape index: {}]   ;;  %s5655_s4 = inlined_call_operand.hbm [shape: f32[512,256], index: 4, kind: output, shape index: {}]  }
   0x1   :  { %10 = vsyncpa [#allocation6], 0 }
   0x2   :  { %11 = vsyncpa [#allocation4], 0  ;;  %s4593_s15 = smov [#allocation5]   ;;  %s4594_s17 = smov [#allocation2]  }
   0x3   :  { %s29_s16 = sshll.u32 %s4593_s15, 4  ;;  %s17_s18 = sshll.u32 %s4594_s17, 4  ;;  %s30_s16 = int_to_ptr.vmem [resolvable:$true] %s29_s16  ;;  %s4627_s18 = int_to_ptr.vmem [resolvable:$true] %s17_s18 }
   0x4   :  { %s4499_s21 = scalar_lea.hbm %s5652_s1, 2048 }
   0x5   :  { %p4500_p0 = scmp.ne.s32.totalorder %s5652_s1, %s4499_s21  ;;  %p4503_p1 = scmp.lt.u32.totalorder %s4499_s21, %s5652_s1 }
   0x7   :  { %p4505_p2 = pnand %p4503_p1, %p4500_p0 }
   0x9   :  { %4508 = shalt.err (!%p4505_p2)
}
   0xa   :  { %s4509_s26 = scalar_lea.vmem %s30_s16, 2048  ;;  %p4514_p4 = scmp.lt.s32.totalorder %s30_s16, %s30_s16 }
   0xb   :  { %p4510_p3 = scmp.ne.s32.totalorder %s30_s16, %s4509_s26  ;;  %p4515_p5 = scmp.lt.s32.totalorder %s4509_s26, %s4509_s26 }
   0xd   :  { %p4516_p6 = por %p4515_p5, %p4514_p4 }
   0xf   :  { %p4517_p7 = pnand %p4516_p6, %p4510_p3 }
  0x11   :  { %4520 = shalt.err (!%p4517_p7)
}
  0x12   :  { %s4595_s27 = smov 128   ;;  %s4596_s28 = smov 8  }
  0x13   :  { %35 = dma.hbm_to_vmem [thread:$0]  %s5652_s1, 2048, %s30_s16, [#allocation6], %s4595_s27, %s4595_s27, %s4596_s28  }
  0x14   :  { %s4521_s7 = scalar_lea.hbm %s5651_s0, 8192 }
  0x15   :  { %p4522_p8 = scmp.ne.s32.totalorder %s5651_s0, %s4521_s7  ;;  %p4525_p9 = scmp.lt.u32.totalorder %s4521_s7, %s5651_s0 }
  0x17   :  { %p4527_p10 = pnand %p4525_p9, %p4522_p8 }
  0x19   :  { %4530 = shalt.err (!%p4527_p10)
}
  0x1a   :  { %s4531_s12 = scalar_lea.vmem %s4627_s18, 8192  ;;  %p4536_p12 = scmp.lt.s32.totalorder %s4627_s18, %s4627_s18 }
  0x1b   :  { %p4532_p11 = scmp.ne.s32.totalorder %s4627_s18, %s4531_s12  ;;  %p4537_p13 = scmp.lt.s32.totalorder %s4531_s12, %s4531_s12 }
  0x1d   :  { %p4538_p0 = por %p4537_p13, %p4536_p12 }
  0x1f   :  { %p4539_p1 = pnand %p4538_p0, %p4532_p11 }
  0x21   :  { %4542 = shalt.err (!%p4539_p1)
}
  0x22   :  { %23 = dma.hbm_to_vmem [thread:$0]  %s5651_s0, 8192, %s4627_s18, [#allocation3], %s4595_s27, %s4595_s27, %s4596_s28  }
  0x23   :  { %s4597_s14 = smov [#allocation7]   ;;  %s4543_s19 = scalar_lea.hbm %s5653_s2, 12288 }
  0x24   :  { %s41_s15 = sshll.u32 %s4597_s14, 4  ;;  %p4544_p2 = scmp.ne.s32.totalorder %s5653_s2, %s4543_s19  ;;  %s42_s15 = int_to_ptr.vmem [resolvable:$true] %s41_s15 }
  0x25   :  { %p4547_p3 = scmp.lt.u32.totalorder %s4543_s19, %s5653_s2 }
  0x27   :  { %p4549_p4 = pnand %p4547_p3, %p4544_p2 }
  0x29   :  { %4552 = shalt.err (!%p4549_p4)
}
  0x2a   :  { %s4553_s24 = scalar_lea.vmem %s42_s15, 12288  ;;  %p4558_p6 = scmp.lt.s32.totalorder %s42_s15, %s42_s15 }
  0x2b   :  { %p4554_p5 = scmp.ne.s32.totalorder %s42_s15, %s4553_s24  ;;  %p4559_p7 = scmp.lt.s32.totalorder %s4553_s24, %s4553_s24 }
  0x2d   :  { %p4560_p8 = por %p4559_p7, %p4558_p6 }
  0x2f   :  { %p4561_p9 = pnand %p4560_p8, %p4554_p5 }
  0x31   :  { %4564 = shalt.err (!%p4561_p9)
}
  0x32   :  { %47 = dma.hbm_to_vmem [thread:$0]  %s5653_s2, 12288, %s42_s15, [#allocation6], %s4595_s27, %s4595_s27, %s4596_s28  }
  0x33   :  { %4587 = dma.done.wait [#allocation3], 8192  }
  0x34   :  { %4588 = vsyncadd [#allocation3], 4294959104 }
  0x35   :  { %4589 = dma.done.wait [#allocation6], 14336  }
  0x36   :  { %4590 = vsyncadd [#allocation6], 4294952960  ;;  %v4679_v0 = vld [vmem:[#allocation2] sm:$0xff]  ;;  %v4681_v1 = vld [vmem:[#allocation2 + $0x10] sm:$0xff]  ;;  %v5656_v46 = vmov 0  }
  0x37   :  { %v4683_v2 = vld [vmem:[#allocation2 + $0x8] sm:$0xff]  ;;  %v124_v3 = vmul.f32 %v4679_v0, %v4679_v0  ;;  %v126_v4 = vmul.f32 %v4681_v1, %v4681_v1  ;;  %v4689_v5 = vld [vmem:[#allocation2 + $0x18] sm:$0xff]  ;;  %v4697_v9 = vld [vmem:[#allocation2 + $0x20] sm:$0xff]  ;;  %680 = vmatprep.mubr.bf16.mxu0 %v5656_v46 }
  0x38   :  { %v125_v6 = vmul.f32 %v4683_v2, %v4683_v2  ;;  %v127_v7 = vmul.f32 %v4689_v5, %v4689_v5  ;;  %v4695_v8 = vld [vmem:[#allocation2 + $0x28] sm:$0xff]  ;;  %v128_v11 = vmul.f32 %v4697_v9, %v4697_v9  ;;  %v4703_v12 = vld [vmem:[#allocation2 + $0x38] sm:$0xff]  ;;  %v4705_v13 = vld [vmem:[#allocation2 + $0x30] sm:$0xff] }
  0x39   :  { %188 = vadd.xlane.f32.xlu0 %v124_v3  ;;  %192 = vadd.xlane.f32.xlu1 %v126_v4  ;;  %v129_v10 = vmul.f32 %v4695_v8, %v4695_v8  ;;  %v131_v14 = vmul.f32 %v4703_v12, %v4703_v12  ;;  %v130_v15 = vmul.f32 %v4705_v13, %v4705_v13  ;;  %v4195_v16 = vld [vmem:[#allocation5 + $0x4] ss:$8 sps:$4 sm:$0xff]   ;;  %v4197_v17 = vld [vmem:[#allocation5] ss:$8 sps:$4 sm:$0xff]   ;;  %v4198_v20 = vld [vmem:[#allocation5 + $0x14] ss:$8 sps:$4 sm:$0xff]  }
  0x3a   :  { %v4711_v18 = vld [vmem:[#allocation2 + $0x48] sm:$0xff]  ;;  %v4713_v19 = vld [vmem:[#allocation2 + $0x40] sm:$0xff]  ;;  %648 = vmatprep.subr.bf16.mxu0 %v4195_v16  ;;  %v4200_v21 = vld [vmem:[#allocation5 + $0x10] ss:$8 sps:$4 sm:$0xff]  }
  0x3b   :  { %649 = vmatpush1.bf16.msra.mxu0 %v4197_v17  ;;  %v133_v22 = vmul.f32 %v4711_v18, %v4711_v18  ;;  %v132_v23 = vmul.f32 %v4713_v19, %v4713_v19  ;;  %v4719_v24 = vld [vmem:[#allocation2 + $0x58] sm:$0xff]  ;;  %v4721_v25 = vld [vmem:[#allocation2 + $0x50] sm:$0xff]  ;;  %v4201_v26 = vld [vmem:[#allocation5 + $0x24] ss:$8 sps:$4 sm:$0xff]  }
  0x3c   :  { %650 = vmatprep.subr.bf16.mxu0 %v4198_v20  ;;  %v4203_v27 = vld [vmem:[#allocation5 + $0x20] ss:$8 sps:$4 sm:$0xff]   ;;  %v135_v28 = vmul.f32 %v4719_v24, %v4719_v24  ;;  %v134_v29 = vmul.f32 %v4721_v25, %v4721_v25  ;;  %v4204_v32 = vld [vmem:[#allocation5 + $0x34] ss:$8 sps:$4 sm:$0xff]   ;;  %v4206_v33 = vld [vmem:[#allocation5 + $0x30] ss:$8 sps:$4 sm:$0xff]  }
  0x3d   :  { %190 = vadd.xlane.f32.xlu0 %v125_v6  ;;  %194 = vadd.xlane.f32.xlu1 %v127_v7  ;;  %v4727_v30 = vld [vmem:[#allocation2 + $0x68] sm:$0xff]  ;;  %v4729_v31 = vld [vmem:[#allocation2 + $0x60] sm:$0xff]  ;;  %v4735_v36 = vld [vmem:[#allocation2 + $0x78] sm:$0xff] }
  0x3e   :  { %v137_v34 = vmul.f32 %v4727_v30, %v4727_v30  ;;  %v136_v35 = vmul.f32 %v4729_v31, %v4729_v31  ;;  %v4737_v37 = vld [vmem:[#allocation2 + $0x70] sm:$0xff]  ;;  %v4207_v38 = vld [vmem:[#allocation5 + $0x44] ss:$8 sps:$4 sm:$0xff]   ;;  %v4209_v41 = vld [vmem:[#allocation5 + $0x40] ss:$8 sps:$4 sm:$0xff]   ;;  %v139_v43 = vmul.f32 %v4735_v36, %v4735_v36 }
  0x3f   :  { %651 = vmatpush1.bf16.msra.mxu0 %v4200_v21  ;;  %v4739_v39 = vld [vmem:[#allocation2 + $0x88] sm:$0xff]  ;;  %v4741_v40 = vld [vmem:[#allocation2 + $0x80] sm:$0xff]  ;;  %v4210_v42 = vld [vmem:[#allocation5 + $0x54] ss:$8 sps:$4 sm:$0xff]   ;;  %v138_v44 = vmul.f32 %v4737_v37, %v4737_v37 }
  0x40   :  { %652 = vmatprep.subr.bf16.mxu0 %v4201_v26  ;;  %v4212_v45 = vld [vmem:[#allocation5 + $0x50] ss:$8 sps:$4 sm:$0xff]   ;;  %v4213_v49 = vld [vmem:[#allocation5 + $0x64] ss:$8 sps:$4 sm:$0xff]   ;;  %v141_v50 = vmul.f32 %v4739_v39, %v4739_v39  ;;  %v140_v51 = vmul.f32 %v4741_v40, %v4741_v40  ;;  %v4215_v52 = vld [vmem:[#allocation5 + $0x60] ss:$8 sps:$4 sm:$0xff]  }
  0x41   :  { %198 = vadd.xlane.f32.xlu1 %v129_v10  ;;  %196 = vadd.xlane.f32.xlu0 %v128_v11  ;;  %v4748_v47 = vld [vmem:[#allocation2 + $0x98] sm:$0xff]  ;;  %v4750_v48 = vld [vmem:[#allocation2 + $0x90] sm:$0xff]  ;;  %v4756_v53 = vld [vmem:[#allocation2 + $0xa8] sm:$0xff] }
  0x42   :  { %v4758_v54 = vld [vmem:[#allocation2 + $0xa0] sm:$0xff]  ;;  %v143_v55 = vmul.f32 %v4748_v47, %v4748_v47  ;;  %v142_v56 = vmul.f32 %v4750_v48, %v4750_v48  ;;  %v4216_v57 = vld [vmem:[#allocation5 + $0x74] ss:$8 sps:$4 sm:$0xff]   ;;  %v4218_v58 = vld [vmem:[#allocation5 + $0x70] ss:$8 sps:$4 sm:$0xff]   ;;  %v145_v61 = vmul.f32 %v4756_v53, %v4756_v53 }
  0x43   :  { %653 = vmatpush1.bf16.msra.mxu0 %v4203_v27  ;;  %v4764_v59 = vld [vmem:[#allocation2 + $0xb8] sm:$0xff]  ;;  %v4766_v60 = vld [vmem:[#allocation2 + $0xb0] sm:$0xff]  ;;  %v144_v62 = vmul.f32 %v4758_v54, %v4758_v54  ;;  %v4776_v4 = vld [vmem:[#allocation2 + $0xc8] sm:$0xff] }
  0x44   :  { %654 = vmatprep.subr.bf16.mxu0 %v4204_v32  ;;  %v147_v63 = vmul.f32 %v4764_v59, %v4764_v59  ;;  %v146_v3 = vmul.f32 %v4766_v60, %v4766_v60  ;;  %v4778_v6 = vld [vmem:[#allocation2 + $0xc0] sm:$0xff]  ;;  %v4780_v7 = vld [vmem:[#allocation2 + $0xd8] sm:$0xff]  ;;  %v4782_v10 = vld [vmem:[#allocation2 + $0xd0] sm:$0xff]  ;;  %v149_v11 = vmul.f32 %v4776_v4, %v4776_v4 }
  0x45   :  { %202 = vadd.xlane.f32.xlu1 %v131_v14  ;;  %200 = vadd.xlane.f32.xlu0 %v130_v15  ;;  %v148_v14 = vmul.f32 %v4778_v6, %v4778_v6  ;;  %v151_v15 = vmul.f32 %v4780_v7, %v4780_v7  ;;  %v150_v16 = vmul.f32 %v4782_v10, %v4782_v10  ;;  %v4792_v17 = vld [vmem:[#allocation2 + $0xe8] sm:$0xff]  ;;  %v4794_v20 = vld [vmem:[#allocation2 + $0xe0] sm:$0xff]  ;;  %v4796_v21 = vld [vmem:[#allocation2 + $0xf8] sm:$0xff] }
  0x46   :  { %v152_v26 = vmul.f32 %v4794_v20, %v4794_v20  ;;  %v155_v27 = vmul.f32 %v4796_v21, %v4796_v21  ;;  %v4810_v32 = vld [vmem:[#allocation2 + $0x100] sm:$0xff] }
  0x47   :  { %655 = vmatpush1.bf16.msra.mxu0 %v4206_v33 }
  0x48   :  { %656 = vmatprep.subr.bf16.mxu0 %v4207_v38  ;;  %v4818_v38 = vld [vmem:[#allocation2 + $0x110] sm:$0xff] }
  0x49   :  { %206 = vadd.xlane.f32.xlu1 %v133_v22  ;;  %204 = vadd.xlane.f32.xlu0 %v132_v23  ;;  %v4798_v22 = vld [vmem:[#allocation2 + $0xf0] sm:$0xff]  ;;  %v153_v23 = vmul.f32 %v4792_v17, %v4792_v17 }
  0x4b   :  { %657 = vmatpush1.bf16.msra.mxu0 %v4209_v41 }
  0x4c   :  { %658 = vmatprep.subr.bf16.mxu0 %v4210_v42  ;;  %v158_v42 = vmul.f32 %v4818_v38, %v4818_v38 }
  0x4d   :  { %210 = vadd.xlane.f32.xlu1 %v135_v28  ;;  %208 = vadd.xlane.f32.xlu0 %v134_v29  ;;  %v154_v28 = vmul.f32 %v4798_v22, %v4798_v22  ;;  %v4808_v29 = vld [vmem:[#allocation2 + $0x108] sm:$0xff] }
  0x4e   :  { %v157_v33 = vmul.f32 %v4808_v29, %v4808_v29 }
  0x4f   :  { %659 = vmatpush1.bf16.msra.mxu0 %v4212_v45 }
  0x50   :  { %660 = vmatprep.subr.bf16.mxu0 %v4213_v49 }
  0x51   :  { %214 = vadd.xlane.f32.xlu1 %v137_v34  ;;  %212 = vadd.xlane.f32.xlu0 %v136_v35  ;;  %v156_v34 = vmul.f32 %v4810_v32, %v4810_v32  ;;  %v4816_v35 = vld [vmem:[#allocation2 + $0x118] sm:$0xff] }
  0x52   :  { %v159_v41 = vmul.f32 %v4816_v35, %v4816_v35 }
  0x53   :  { %661 = vmatpush1.bf16.msra.mxu0 %v4215_v52 }
  0x54   :  { %662 = vmatprep.subr.bf16.mxu0 %v4216_v57  ;;  %v4842_v57 = vld [vmem:[#allocation2 + $0x140] sm:$0xff] }
  0x55   :  { %218 = vadd.xlane.f32.xlu1 %v139_v43  ;;  %216 = vadd.xlane.f32.xlu0 %v138_v44  ;;  %v4824_v43 = vld [vmem:[#allocation2 + $0x128] sm:$0xff]  ;;  %v4826_v44 = vld [vmem:[#allocation2 + $0x120] sm:$0xff] }
  0x56   :  { %v161_v45 = vmul.f32 %v4824_v43, %v4824_v43  ;;  %v160_v49 = vmul.f32 %v4826_v44, %v4826_v44 }
  0x57   :  { %663 = vmatpush1.bf16.msra.mxu0 %v4218_v58 }
  0x59   :  { %222 = vadd.xlane.f32.xlu1 %v141_v50  ;;  %220 = vadd.xlane.f32.xlu0 %v140_v51  ;;  %v4832_v50 = vld [vmem:[#allocation2 + $0x138] sm:$0xff]  ;;  %v4834_v51 = vld [vmem:[#allocation2 + $0x130] sm:$0xff] }
  0x5a   :  { %v163_v52 = vmul.f32 %v4832_v50, %v4832_v50 }
  0x5d   :  { %226 = vadd.xlane.f32.xlu1 %v143_v55  ;;  %224 = vadd.xlane.f32.xlu0 %v142_v56  ;;  %v162_v55 = vmul.f32 %v4834_v51, %v4834_v51  ;;  %v4840_v56 = vld [vmem:[#allocation2 + $0x148] sm:$0xff] }
  0x5e   :  { %v165_v58 = vmul.f32 %v4840_v56, %v4840_v56 }
  0x61   :  { %230 = vadd.xlane.f32.xlu1 %v145_v61  ;;  %228 = vadd.xlane.f32.xlu0 %v144_v62  ;;  %v164_v61 = vmul.f32 %v4842_v57, %v4842_v57  ;;  %v4848_v62 = vld [vmem:[#allocation2 + $0x158] sm:$0xff] }
  0x65   :  { %234 = vadd.xlane.f32.xlu1 %v147_v63  ;;  %232 = vadd.xlane.f32.xlu0 %v146_v3  ;;  %v4850_v63 = vld [vmem:[#allocation2 + $0x150] sm:$0xff]  ;;  %v167_v3 = vmul.f32 %v4848_v62, %v4848_v62 }
  0x69   :  { %238 = vadd.xlane.f32.xlu1 %v149_v11  ;;  %236 = vadd.xlane.f32.xlu0 %v148_v14  ;;  %v166_v11 = vmul.f32 %v4850_v63, %v4850_v63  ;;  %v4856_v14 = vld [vmem:[#allocation2 + $0x168] sm:$0xff] }
  0x6d   :  { %242 = vadd.xlane.f32.xlu1 %v151_v15  ;;  %240 = vadd.xlane.f32.xlu0 %v150_v16  ;;  %v4858_v15 = vld [vmem:[#allocation2 + $0x160] sm:$0xff]  ;;  %v169_v16 = vmul.f32 %v4856_v14, %v4856_v14 }
  0x71   :  { %246 = vadd.xlane.f32.xlu1 %v153_v23  ;;  %244 = vadd.xlane.f32.xlu0 %v152_v26  ;;  %v168_v23 = vmul.f32 %v4858_v15, %v4858_v15  ;;  %v4864_v26 = vld [vmem:[#allocation2 + $0x178] sm:$0xff] }
  0x72   :  { %5667 = vst [vmem:[#allocation12_spill] sm:$0xff] %v4864_v26 }
  0x75   :  { %250 = vadd.xlane.f32.xlu1 %v155_v27  ;;  %248 = vadd.xlane.f32.xlu0 %v154_v28  ;;  %v4866_v27 = vld [vmem:[#allocation2 + $0x170] sm:$0xff]  ;;  %v171_v28 = vmul.f32 %v4864_v26, %v4864_v26 }
  0x79   :  { %254 = vadd.xlane.f32.xlu1 %v157_v33  ;;  %252 = vadd.xlane.f32.xlu0 %v156_v34  ;;  %v170_v33 = vmul.f32 %v4866_v27, %v4866_v27  ;;  %v4872_v34 = vld [vmem:[#allocation2 + $0x188] sm:$0xff] }
  0x7a   :  { %5668 = vst [vmem:[#allocation13_spill] sm:$0xff] %v4872_v34 }
  0x7d   :  { %258 = vadd.xlane.f32.xlu1 %v159_v41  ;;  %256 = vadd.xlane.f32.xlu0 %v158_v42  ;;  %v4874_v41 = vld [vmem:[#allocation2 + $0x180] sm:$0xff]  ;;  %v173_v42 = vmul.f32 %v4872_v34, %v4872_v34 }
  0x7e   :  { %5669 = vst [vmem:[#allocation14_spill] sm:$0xff] %v4874_v41 }
  0x81   :  { %262 = vadd.xlane.f32.xlu1 %v161_v45  ;;  %260 = vadd.xlane.f32.xlu0 %v160_v49  ;;  %v172_v45 = vmul.f32 %v4874_v41, %v4874_v41  ;;  %v4880_v49 = vld [vmem:[#allocation2 + $0x198] sm:$0xff]  ;;  %v122_v41 = vld [vmem:[#allocation2 + $0x1f0] sm:$0xff] }
  0x82   :  { %5670 = vst [vmem:[#allocation15_spill] sm:$0xff] %v4880_v49 }
  0x85   :  { %266 = vadd.xlane.f32.xlu1 %v163_v52  ;;  %264 = vadd.xlane.f32.xlu0 %v162_v55  ;;  %v4882_v52 = vld [vmem:[#allocation2 + $0x190] sm:$0xff]  ;;  %v175_v55 = vmul.f32 %v4880_v49, %v4880_v49 }
  0x86   :  { %5671 = vst [vmem:[#allocation16_spill] sm:$0xff] %v4882_v52 }
  0x89   :  { %270 = vadd.xlane.f32.xlu1 %v165_v58  ;;  %268 = vadd.xlane.f32.xlu0 %v164_v61  ;;  %v174_v58 = vmul.f32 %v4882_v52, %v4882_v52  ;;  %v4888_v61 = vld [vmem:[#allocation2 + $0x1a8] sm:$0xff] }
  0x8a   :  { %5672 = vst [vmem:[#allocation17_spill] sm:$0xff] %v4888_v61 }
  0x8d   :  { %274 = vadd.xlane.f32.xlu1 %v167_v3  ;;  %272 = vadd.xlane.f32.xlu0 %v166_v11  ;;  %v4890_v3 = vld [vmem:[#allocation2 + $0x1a0] sm:$0xff]  ;;  %v177_v11 = vmul.f32 %v4888_v61, %v4888_v61  ;;  %v119_v61 = vld [vmem:[#allocation2 + $0x1d8] sm:$0xff] }
  0x8e   :  { %5673 = vst [vmem:[#allocation18_spill] sm:$0xff] %v4890_v3  ;;  %v183_v49 = vmul.f32 %v119_v61, %v119_v61 }
  0x91   :  { %278 = vadd.xlane.f32.xlu1 %v169_v16  ;;  %276 = vadd.xlane.f32.xlu0 %v168_v23  ;;  %v176_v16 = vmul.f32 %v4890_v3, %v4890_v3  ;;  %v4896_v23 = vld [vmem:[#allocation2 + $0x1b8] sm:$0xff]  ;;  %v118_v3 = vld [vmem:[#allocation2 + $0x1d0] sm:$0xff] }
  0x92   :  { %5674 = vst [vmem:[#allocation19_spill] sm:$0xff] %v4896_v23  ;;  %v182_v52 = vmul.f32 %v118_v3, %v118_v3 }
  0x95   :  { %282 = vadd.xlane.f32.xlu1 %v171_v28  ;;  %280 = vadd.xlane.f32.xlu0 %v170_v33  ;;  %v4898_v28 = vld [vmem:[#allocation2 + $0x1b0] sm:$0xff]  ;;  %v179_v33 = vmul.f32 %v4896_v23, %v4896_v23 }
  0x96   :  { %5675 = vst [vmem:[#allocation20_spill] sm:$0xff] %v4898_v28 }
  0x99   :  { %286 = vadd.xlane.f32.xlu1 %v173_v42  ;;  %284 = vadd.xlane.f32.xlu0 %v172_v45  ;;  %v178_v42 = vmul.f32 %v4898_v28, %v4898_v28  ;;  %v117_v45 = vld [vmem:[#allocation2 + $0x1c8] sm:$0xff]  ;;  %v123_v28 = vld [vmem:[#allocation2 + $0x1f8] sm:$0xff] }
  0x9d   :  { %290 = vadd.xlane.f32.xlu1 %v175_v55  ;;  %288 = vadd.xlane.f32.xlu0 %v174_v58  ;;  %v116_v55 = vld [vmem:[#allocation2 + $0x1c0] sm:$0xff]  ;;  %v181_v58 = vmul.f32 %v117_v45, %v117_v45 }
  0x9e   :  { %v180_v46 = vmul.f32 %v116_v55, %v116_v55 }
  0xa1   :  { %294 = vadd.xlane.f32.xlu1 %v177_v11  ;;  %292 = vadd.xlane.f32.xlu0 %v176_v16  ;;  %v121_v11 = vld [vmem:[#allocation2 + $0x1e8] sm:$0xff]  ;;  %v120_v16 = vld [vmem:[#allocation2 + $0x1e0] sm:$0xff] }
  0xa2   :  { %v185_v23 = vmul.f32 %v121_v11, %v121_v11  ;;  %v184_v34 = vmul.f32 %v120_v16, %v120_v16 }
  0xa5   :  { %298 = vadd.xlane.f32.xlu1 %v179_v33  ;;  %296 = vadd.xlane.f32.xlu0 %v178_v42  ;;  %v187_v33 = vmul.f32 %v123_v28, %v123_v28  ;;  %v186_v42 = vmul.f32 %v122_v41, %v122_v41 }
  0xa9   :  { %302 = vadd.xlane.f32.xlu1 %v181_v58  ;;  %300 = vadd.xlane.f32.xlu0 %v180_v46 }
  0xad   :  { %306 = vadd.xlane.f32.xlu1 %v183_v49  ;;  %304 = vadd.xlane.f32.xlu0 %v182_v52 }
  0xb1   :  { %310 = vadd.xlane.f32.xlu1 %v185_v23  ;;  %308 = vadd.xlane.f32.xlu0 %v184_v34 }
  0xb5   :  { %314 = vadd.xlane.f32.xlu1 %v187_v33  ;;  %312 = vadd.xlane.f32.xlu0 %v186_v42 }
  0xc6   :  { %v189_v45 = vpop.xlane.xlu0 %188  ;;  %v193_v55 = vpop.xlane.xlu1 %192 }
  0xc7   :  { %v316_v58 = vmax.f32 %v189_v45, 1e-24  ;;  %v318_v26 = vmax.f32 %v193_v55, 1e-24 }
  0xc9   :  { %4363 = vrsqrt.f32 %v316_v58 }
  0xca   :  { %v191_v46 = vpop.xlane.xlu0 %190  ;;  %v195_v61 = vpop.xlane.xlu1 %194 }
  0xcb   :  { %v317_v3 = vmax.f32 %v191_v46, 1e-24  ;;  %v319_v49 = vmax.f32 %v195_v61, 1e-24 }
  0xcd   :  { %4365 = vrsqrt.f32 %v317_v3 }
  0xce   :  { %v199_v52 = vpop.xlane.xlu1 %198  ;;  %4367 = vrsqrt.f32 %v318_v26  ;;  %v197_v23 = vpop.xlane.xlu0 %196  ;;  %v5676_v26 = vmov 0  }
  0xcf   :  { %4369 = vrsqrt.f32 %v319_v49  ;;  %v321_v34 = vmax.f32 %v199_v52, 1e-24  ;;  %v320_v11 = vmax.f32 %v197_v23, 1e-24 }
  0xd1   :  { %4371 = vrsqrt.f32 %v321_v34 }
  0xd2   :  { %4373 = vrsqrt.f32 %v320_v11  ;;  %v203_v16 = vpop.xlane.xlu1 %202  ;;  %v201_v45 = vpop.xlane.xlu0 %200 }
  0xd3   :  { %v4364_v28 = vpop.eup %4363  ;;  %v323_v46 = vmax.f32 %v203_v16, 1e-24  ;;  %v322_v3 = vmax.f32 %v201_v45, 1e-24 }
  0xd4   :  { %v444_v33 = vmul.f32 %v4364_v28, %v4679_v0 }
  0xd5   :  { %4375 = vrsqrt.f32 %v323_v46 }
  0xd6   :  { %4377 = vrsqrt.f32 %v322_v3  ;;  %v207_v23 = vpop.xlane.xlu1 %206  ;;  %v205_v0 = vpop.xlane.xlu0 %204 }
  0xd7   :  { %v4366_v41 = vpop.eup %4365  ;;  %v325_v28 = vmax.f32 %v207_v23, 1e-24 }
  0xd8   :  { %v445_v42 = vmul.f32 %v4366_v41, %v4683_v2  ;;  %v4368_v58 = vpop.eup %4367  ;;  %v324_v41 = vmax.f32 %v205_v0, 1e-24 }
  0xd9   :  { %v4370_v61 = vpop.eup %4369  ;;  %v446_v49 = vmul.f32 %v4368_v58, %v4681_v1  ;;  %4379 = vrsqrt.f32 %v325_v28 }
  0xda   :  { %v508_v55 = vpack.c.bf16 %v445_v42, %v444_v33  ;;  %v447_v52 = vmul.f32 %v4370_v61, %v4689_v5  ;;  %4381 = vrsqrt.f32 %v324_v41  ;;  %v211_v1 = vpop.xlane.xlu1 %210  ;;  %v209_v45 = vpop.xlane.xlu0 %208 }
  0xdb   :  { %v4372_v34 = vpop.eup %4371  ;;  %v326_v46 = vmax.f32 %v209_v45, 1e-24 }
  0xdc   :  { %681 = vmatmul.mubr.bf16.vlgmr.msra.gmra.mrb[0].mxu0 %v508_v55  ;;  %v4374_v11 = vpop.eup %4373  ;;  %v509_v2 = vpack.c.bf16 %v447_v52, %v446_v49  ;;  %v449_v33 = vmul.f32 %v4372_v34, %v4695_v8  ;;  %v327_v55 = vmax.f32 %v211_v1, 1e-24  ;;  %v4219_v1 = vld [vmem:[#allocation7 + $0x4] ss:$8 sps:$4 sm:$0xff]  }
  0xdd   :  { %690 = vmatprep.mubr.bf16.mxu0 %v5676_v26  ;;  %v448_v16 = vmul.f32 %v4374_v11, %v4697_v9  ;;  %1526 = vmatprep.subr.bf16.mxu1 %v4219_v1 }
  0xde   :  { %4383 = vrsqrt.f32 %v327_v55  ;;  %v215_v8 = vpop.xlane.xlu1 %214  ;;  %v213_v52 = vpop.xlane.xlu0 %212 }
  0xdf   :  { %v4376_v42 = vpop.eup %4375  ;;  %v510_v5 = vpack.c.bf16 %v449_v33, %v448_v16  ;;  %4385 = vrsqrt.f32 %v326_v46  ;;  %v329_v34 = vmax.f32 %v215_v8, 1e-24  ;;  %v328_v0 = vmax.f32 %v213_v52, 1e-24  ;;  %v4227_v52 = vld [vmem:[#allocation7 + $0x20] ss:$8 sps:$4 sm:$0xff]  }
  0xe0   :  { %v4378_v58 = vpop.eup %4377  ;;  %v451_v3 = vmul.f32 %v4376_v42, %v4703_v12 }
  0xe1   :  { %v450_v61 = vmul.f32 %v4378_v58, %v4705_v13  ;;  %4387 = vrsqrt.f32 %v329_v34  ;;  %v4224_v58 = vld [vmem:[#allocation7 + $0x10] ss:$8 sps:$4 sm:$0xff]   ;;  %v4228_v34 = vld [vmem:[#allocation7 + $0x34] ss:$8 sps:$4 sm:$0xff]  }
  0xe2   :  { %4389 = vrsqrt.f32 %v328_v0  ;;  %v219_v12 = vpop.xlane.xlu1 %218  ;;  %v217_v41 = vpop.xlane.xlu0 %216  ;;  %v4230_v0 = vld [vmem:[#allocation7 + $0x30] ss:$8 sps:$4 sm:$0xff]  }
  0xe3   :  { %v4380_v9 = vpop.eup %4379  ;;  %v511_v49 = vpack.c.bf16 %v451_v3, %v450_v61  ;;  %v331_v33 = vmax.f32 %v219_v12, 1e-24  ;;  %v330_v42 = vmax.f32 %v217_v41, 1e-24 }
  0xe4   :  { %691 = vmatmul.mubr.bf16.gmra.mrb[4].mxu0 %v509_v2  ;;  %v4382_v23 = vpop.eup %4381  ;;  %v453_v2 = vmul.f32 %v4380_v9, %v4711_v18  ;;  %v4222_v18 = vld [vmem:[#allocation7 + $0x14] ss:$8 sps:$4 sm:$0xff]  }
  0xe5   :  { %700 = vmatprep.mubr.bf16.mxu0 %v5676_v26  ;;  %v452_v11 = vmul.f32 %v4382_v23, %v4713_v19  ;;  %4391 = vrsqrt.f32 %v331_v33  ;;  %v4233_v33 = vld [vmem:[#allocation7 + $0x40] ss:$8 sps:$4 sm:$0xff]  }
  0xe6   :  { %4393 = vrsqrt.f32 %v330_v42  ;;  %v223_v55 = vpop.xlane.xlu1 %222  ;;  %v221_v3 = vpop.xlane.xlu0 %220  ;;  %v4234_v42 = vld [vmem:[#allocation7 + $0x54] ss:$8 sps:$4 sm:$0xff]  }
  0xe7   :  { %v512_v28 = vpack.c.bf16 %v453_v2, %v452_v11  ;;  %v333_v9 = vmax.f32 %v223_v55, 1e-24 }
  0xe8   :  { %v4384_v13 = vpop.eup %4383 }
  0xe9   :  { %v4386_v16 = vpop.eup %4385  ;;  %v455_v19 = vmul.f32 %v4384_v13, %v4719_v24  ;;  %4395 = vrsqrt.f32 %v333_v9  ;;  %v4240_v9 = vld [vmem:[#allocation7 + $0x74] ss:$8 sps:$4 sm:$0xff]  }
  0xea   :  { %v454_v45 = vmul.f32 %v4386_v16, %v4721_v25  ;;  %v332_v25 = vmax.f32 %v221_v3, 1e-24  ;;  %v227_v11 = vpop.xlane.xlu1 %226  ;;  %v225_v13 = vpop.xlane.xlu0 %224  ;;  %v4231_v16 = vld [vmem:[#allocation7 + $0x44] ss:$8 sps:$4 sm:$0xff]   ;;  %v4239_v3 = vld [vmem:[#allocation7 + $0x60] ss:$8 sps:$4 sm:$0xff]  }
  0xeb   :  { %v4388_v46 = vpop.eup %4387  ;;  %v335_v41 = vmax.f32 %v227_v11, 1e-24  ;;  %v4246_v11 = vld [vmem:[#allocation7 + $0x84] ss:$8 sps:$4 sm:$0xff]  }
  0xec   :  { %701 = vmatmul.mubr.bf16.gmra.mrb[8].mxu0 %v510_v5  ;;  %v4221_v5 = vld [vmem:[#allocation7] ss:$8 sps:$4 sm:$0xff]   ;;  %v513_v61 = vpack.c.bf16 %v455_v19, %v454_v45  ;;  %v4390_v8 = vpop.eup %4389  ;;  %v457_v23 = vmul.f32 %v4388_v46, %v4727_v30  ;;  %4397 = vrsqrt.f32 %v332_v25 }
  0xed   :  { %710 = vmatprep.mubr.bf16.mxu0 %v5676_v26  ;;  %1527 = vmatpush1.bf16.msra.mxu1 %v4221_v5  ;;  %v456_v24 = vmul.f32 %v4390_v8, %v4729_v31  ;;  %v334_v31 = vmax.f32 %v225_v13, 1e-24  ;;  %v4236_v5 = vld [vmem:[#allocation7 + $0x50] ss:$8 sps:$4 sm:$0xff]   ;;  %4399 = vrsqrt.f32 %v335_v41  ;;  %v4243_v25 = vld [vmem:[#allocation7 + $0x100] ss:$8 sps:$4 sm:$0xff]  }
  0xee   :  { %1528 = vmatprep.subr.bf16.mxu1 %v4222_v18  ;;  %v231_v45 = vpop.xlane.xlu1 %230  ;;  %v4249_v41 = vld [vmem:[#allocation7 + $0x94] ss:$8 sps:$4 sm:$0xff]  }
  0xef   :  { %v4392_v2 = vpop.eup %4391  ;;  %v514_v12 = vpack.c.bf16 %v457_v23, %v456_v24  ;;  %4401 = vrsqrt.f32 %v334_v31  ;;  %v337_v46 = vmax.f32 %v231_v45, 1e-24  ;;  %v4252_v45 = vld [vmem:[#allocation7 + $0xa4] ss:$8 sps:$4 sm:$0xff]  }
  0xf0   :  { %v459_v1 = vmul.f32 %v4392_v2, %v4735_v36 }
  0xf1   :  { %1529 = vmatpush1.bf16.msra.mxu1 %v4224_v58  ;;  %v229_v58 = vpop.xlane.xlu0 %228  ;;  %4403 = vrsqrt.f32 %v337_v46  ;;  %v4258_v46 = vld [vmem:[#allocation7 + $0x110] ss:$8 sps:$4 sm:$0xff]  }
  0xf2   :  { %v235_v24 = vpop.xlane.xlu1 %234 }
  0xf4   :  { %711 = vmatmul.mubr.bf16.gmra.mrb[12].mxu0 %v511_v49  ;;  %v4225_v49 = vld [vmem:[#allocation7 + $0x24] ss:$8 sps:$4 sm:$0xff]  }
  0xf5   :  { %720 = vmatprep.mubr.bf16.mxu0 %v5676_v26  ;;  %1530 = vmatprep.subr.bf16.mxu1 %v4225_v49  ;;  %v4242_v49 = vld [vmem:[#allocation7 + $0x70] ss:$8 sps:$4 sm:$0xff]  }
  0xf6   :  { %1531 = vmatpush1.bf16.msra.mxu1 %v4227_v52  ;;  %v4245_v52 = vld [vmem:[#allocation7 + $0x104] ss:$8 sps:$4 sm:$0xff]   ;;  %v239_v31 = vpop.xlane.xlu1 %238 }
  0xf7   :  { %1532 = vmatprep.subr.bf16.mxu1 %v4228_v34  ;;  %2405 = vmatprep.subr.bf16.mxu0 %v4245_v52 }
  0xf8   :  { %2406 = vmatpush1.bf16.msra.mxu0 %v4243_v25  ;;  %v4263_v25 = vld [vmem:[#allocation7 + $0xc0] ss:$8 sps:$4 sm:$0xff]  }
  0xfa   :  { %1533 = vmatpush1.bf16.msra.mxu1 %v4230_v0  ;;  %v233_v0 = vpop.xlane.xlu0 %232 }
  0xfb   :  { %1534 = vmatprep.subr.bf16.mxu1 %v4231_v16  ;;  %v338_v2 = vmax.f32 %v233_v0, 1e-24  ;;  %v4251_v16 = vld [vmem:[#allocation7 + $0x90] ss:$8 sps:$4 sm:$0xff]  }
  0xfc   :  { %721 = vmatmul.mubr.bf16.gmra.mrb[16].mxu0 %v512_v28  ;;  %v4394_v28 = vpop.eup %4393  ;;  %v4266_v0 = vld [vmem:[#allocation7 + $0xd0] ss:$8 sps:$4 sm:$0xff]  }
  0xfd   :  { %730 = vmatprep.mubr.bf16.mxu0 %v5676_v26  ;;  %v458_v30 = vmul.f32 %v4394_v28, %v4737_v37  ;;  %v4396_v19 = vpop.eup %4395  ;;  %v336_v37 = vmax.f32 %v229_v58, 1e-24  ;;  %v4255_v58 = vld [vmem:[#allocation7 + $0xb4] ss:$8 sps:$4 sm:$0xff]  }
  0xfe   :  { %1535 = vmatpush1.bf16.msra.mxu1 %v4233_v33  ;;  %v4398_v55 = vpop.eup %4397  ;;  %v461_v8 = vmul.f32 %v4396_v19, %v4739_v39  ;;  %v339_v39 = vmax.f32 %v235_v24, 1e-24  ;;  %v4254_v19 = vld [vmem:[#allocation7 + $0xa0] ss:$8 sps:$4 sm:$0xff]  }
  0xff   :  { %1536 = vmatprep.subr.bf16.mxu1 %v4234_v42  ;;  %v515_v18 = vpack.c.bf16 %v459_v1, %v458_v30  ;;  %v460_v36 = vmul.f32 %v4398_v55, %v4741_v40  ;;  %4405 = vrsqrt.f32 %v336_v37  ;;  %v4400_v23 = vpop.eup %4399  ;;  %v237_v1 = vpop.xlane.xlu0 %236  ;;  %v4257_v55 = vld [vmem:[#allocation7 + $0xb0] ss:$8 sps:$4 sm:$0xff]  }
 0x100   :  { %v4402_v40 = vpop.eup %4401  ;;  %v463_v28 = vmul.f32 %v4400_v23, %v4748_v47  ;;  %4407 = vrsqrt.f32 %v339_v39  ;;  %v243_v37 = vpop.xlane.xlu1 %242  ;;  %v4264_v23 = vld [vmem:[#allocation7 + $0xd4] ss:$8 sps:$4 sm:$0xff]  }
 0x101   :  { %v516_v34 = vpack.c.bf16 %v461_v8, %v460_v36  ;;  %v462_v13 = vmul.f32 %v4402_v40, %v4750_v48  ;;  %4409 = vrsqrt.f32 %v338_v2  ;;  %v4404_v33 = vpop.eup %4403  ;;  %v340_v48 = vmax.f32 %v237_v1, 1e-24 }
 0x102   :  { %1537 = vmatpush1.bf16.msra.mxu1 %v4236_v5  ;;  %v341_v5 = vmax.f32 %v239_v31, 1e-24 }
 0x103   :  { %v517_v30 = vpack.c.bf16 %v463_v28, %v462_v13  ;;  %v241_v8 = vpop.xlane.xlu0 %240  ;;  %v4267_v13 = vld [vmem:[#allocation7 + $0xe4] ss:$8 sps:$4 sm:$0xff]   ;;  %v4269_v28 = vld [vmem:[#allocation7 + $0xe0] ss:$8 sps:$4 sm:$0xff]  }
 0x104   :  { %731 = vmatmul.mubr.bf16.gmra.mrb[20].mxu0 %v513_v61  ;;  %v4237_v61 = vld [vmem:[#allocation7 + $0x64] ss:$8 sps:$4 sm:$0xff]   ;;  %4411 = vrsqrt.f32 %v341_v5 }
 0x105   :  { %740 = vmatprep.mubr.bf16.mxu0 %v5676_v26  ;;  %1538 = vmatprep.subr.bf16.mxu1 %v4237_v61  ;;  %v4260_v61 = vld [vmem:[#allocation7 + $0x114] ss:$8 sps:$4 sm:$0xff]   ;;  %4413 = vrsqrt.f32 %v340_v48 }
 0x106   :  { %1539 = vmatpush1.bf16.msra.mxu1 %v4239_v3  ;;  %2407 = vmatprep.subr.bf16.mxu0 %v4260_v61 }
 0x107   :  { %1540 = vmatprep.subr.bf16.mxu1 %v4240_v9  ;;  %2408 = vmatpush1.bf16.msra.mxu0 %v4258_v46  ;;  %v4261_v9 = vld [vmem:[#allocation7 + $0xc4] ss:$8 sps:$4 sm:$0xff]  }
 0x108   :  { %v4275_v46 = vld [vmem:[#allocation7 + $0x124] ss:$8 sps:$4 sm:$0xff]  }
 0x109   :  { %v4406_v42 = vpop.eup %4405  ;;  %2409 = vmatprep.subr.bf16.mxu0 %v4275_v46 }
 0x10a   :  { %1541 = vmatpush1.bf16.msra.mxu1 %v4242_v49  ;;  %v464_v47 = vmul.f32 %v4406_v42, %v4758_v54  ;;  %v4408_v3 = vpop.eup %4407  ;;  %v342_v49 = vmax.f32 %v241_v8, 1e-24 }
 0x10b   :  { %1542 = vmatprep.subr.bf16.mxu1 %v4246_v11  ;;  %v4410_v54 = vpop.eup %4409  ;;  %v467_v24 = vmul.f32 %v4408_v3, %v4764_v59  ;;  %v245_v11 = vpop.xlane.xlu0 %244 }
 0x10c   :  { %741 = vmatmul.mubr.bf16.gmra.mrb[24].mxu0 %v514_v12  ;;  %v4248_v12 = vld [vmem:[#allocation7 + $0x80] ss:$8 sps:$4 sm:$0xff]   ;;  %v466_v52 = vmul.f32 %v4410_v54, %v4766_v60  ;;  %v344_v60 = vmax.f32 %v245_v11, 1e-24 }
 0x10d   :  { %750 = vmatprep.mubr.bf16.mxu0 %v5676_v26 }
 0x10e   :  { %1543 = vmatpush1.bf16.msra.mxu1 %v4248_v12  ;;  %v4412_v40 = vpop.eup %4411  ;;  %v519_v39 = vpack.c.bf16 %v467_v24, %v466_v52 }
 0x10f   :  { %1544 = vmatprep.subr.bf16.mxu1 %v4249_v41  ;;  %v4414_v2 = vpop.eup %4413  ;;  %v469_v41 = vmul.f32 %v4412_v40, %v4776_v4  ;;  %v249_v42 = vpop.xlane.xlu0 %248 }
 0x110   :  { %v468_v59 = vmul.f32 %v4414_v2, %v4778_v6  ;;  %v346_v48 = vmax.f32 %v249_v42, 1e-24 }
 0x112   :  { %1545 = vmatpush1.bf16.msra.mxu1 %v4251_v16  ;;  %v4270_v16 = vld [vmem:[#allocation7 + $0xf4] ss:$8 sps:$4 sm:$0xff]   ;;  %v520_v1 = vpack.c.bf16 %v469_v41, %v468_v59 }
 0x113   :  { %1546 = vmatprep.subr.bf16.mxu1 %v4252_v45 }
 0x114   :  { %751 = vmatmul.mubr.bf16.gmra.mrb[28].mxu0 %v515_v18  ;;  %v465_v18 = vmul.f32 %v4404_v33, %v4756_v53  ;;  %v343_v53 = vmax.f32 %v243_v37, 1e-24  ;;  %v4272_v33 = vld [vmem:[#allocation7 + $0xf0] ss:$8 sps:$4 sm:$0xff]  }
 0x115   :  { %760 = vmatprep.mubr.bf16.mxu0 %v5676_v26 }
 0x116   :  { %1547 = vmatpush1.bf16.msra.mxu1 %v4254_v19  ;;  %v518_v36 = vpack.c.bf16 %v465_v18, %v464_v47  ;;  %4415 = vrsqrt.f32 %v343_v53  ;;  %v4273_v47 = vld [vmem:[#allocation7 + $0x120] ss:$8 sps:$4 sm:$0xff]  }
 0x117   :  { %1548 = vmatprep.subr.bf16.mxu1 %v4255_v58  ;;  %4417 = vrsqrt.f32 %v342_v49  ;;  %2410 = vmatpush1.bf16.msra.mxu0 %v4273_v47 }
 0x11a   :  { %1549 = vmatpush1.bf16.msra.mxu1 %v4257_v55  ;;  %v253_v55 = vpop.xlane.xlu0 %252 }
 0x11b   :  { %1550 = vmatprep.subr.bf16.mxu1 %v4261_v9  ;;  %v348_v3 = vmax.f32 %v253_v55, 1e-24 }
 0x11c   :  { %761 = vmatmul.mubr.bf16.gmra.mrb[32].mxu0 %v516_v34  ;;  %v247_v34 = vpop.xlane.xlu1 %246 }
 0x11d   :  { %770 = vmatprep.mubr.bf16.mxu0 %v5676_v26  ;;  %v345_v12 = vmax.f32 %v247_v34, 1e-24 }
 0x11e   :  { %1551 = vmatpush1.bf16.msra.mxu1 %v4263_v25  ;;  %v257_v53 = vpop.xlane.xlu0 %256 }
 0x11f   :  { %1552 = vmatprep.subr.bf16.mxu1 %v4264_v23  ;;  %4419 = vrsqrt.f32 %v345_v12  ;;  %v350_v25 = vmax.f32 %v257_v53, 1e-24  ;;  %v4278_v23 = vld [vmem:[#allocation7 + $0x134] ss:$8 sps:$4 sm:$0xff]  }
 0x120   :  { %4421 = vrsqrt.f32 %v344_v60  ;;  %v251_v31 = vpop.xlane.xlu1 %250  ;;  %2411 = vmatprep.subr.bf16.mxu0 %v4278_v23 }
 0x121   :  { %v347_v45 = vmax.f32 %v251_v31, 1e-24 }
 0x122   :  { %1553 = vmatpush1.bf16.msra.mxu1 %v4266_v0  ;;  %v261_v40 = vpop.xlane.xlu0 %260 }
 0x123   :  { %1554 = vmatprep.subr.bf16.mxu1 %v4267_v13  ;;  %4423 = vrsqrt.f32 %v347_v45  ;;  %v352_v2 = vmax.f32 %v261_v40, 1e-24 }
 0x124   :  { %771 = vmatmul.mubr.bf16.gmra.mrb[36].mxu0 %v517_v30  ;;  %v4416_v30 = vpop.eup %4415  ;;  %4425 = vrsqrt.f32 %v346_v48  ;;  %v255_v19 = vpop.xlane.xlu1 %254 }
 0x125   :  { %780 = vmatprep.mubr.bf16.mxu0 %v5676_v26  ;;  %v4418_v5 = vpop.eup %4417  ;;  %v471_v6 = vmul.f32 %v4416_v30, %v4780_v7  ;;  %v349_v37 = vmax.f32 %v255_v19, 1e-24  ;;  %v4281_v30 = vld [vmem:[#allocation7 + $0x144] ss:$8 sps:$4 sm:$0xff]  }
 0x126   :  { %1555 = vmatpush1.bf16.msra.mxu1 %v4269_v28  ;;  %v470_v4 = vmul.f32 %v4418_v5, %v4782_v10  ;;  %v265_v28 = vpop.xlane.xlu0 %264 }
 0x127   :  { %1556 = vmatprep.subr.bf16.mxu1 %v4270_v16  ;;  %4427 = vrsqrt.f32 %v349_v37  ;;  %v354_v16 = vmax.f32 %v265_v28, 1e-24 }
 0x128   :  { %v521_v58 = vpack.c.bf16 %v471_v6, %v470_v4  ;;  %4429 = vrsqrt.f32 %v348_v3  ;;  %v4284_v3 = vld [vmem:[#allocation7 + $0x154] ss:$8 sps:$4 sm:$0xff]  }
 0x129   :  { %v4420_v18 = vpop.eup %4419 }
 0x12a   :  { %1557 = vmatpush1.bf16.msra.mxu1 %v4272_v33  ;;  %v4422_v61 = vpop.eup %4421  ;;  %v473_v7 = vmul.f32 %v4420_v18, %v4792_v17  ;;  %v269_v5 = vpop.xlane.xlu0 %268 }
 0x12b   :  { %v472_v10 = vmul.f32 %v4422_v61, %v4794_v20  ;;  %v4276_v20 = vld [vmem:[#allocation7 + $0x130] ss:$8 sps:$4 sm:$0xff]   ;;  %v356_v4 = vmax.f32 %v269_v5, 1e-24 }
 0x12c   :  { %781 = vmatmul.mubr.bf16.gmra.mrb[40].mxu0 %v518_v36  ;;  %v259_v36 = vpop.xlane.xlu1 %258 }
 0x12d   :  { %790 = vmatprep.mubr.bf16.mxu0 %v5676_v26  ;;  %v4424_v8 = vpop.eup %4423  ;;  %v522_v54 = vpack.c.bf16 %v473_v7, %v472_v10  ;;  %v351_v49 = vmax.f32 %v259_v36, 1e-24  ;;  %2412 = vmatpush1.bf16.msra.mxu0 %v4276_v20 }
 0x12e   :  { %v4426_v9 = vpop.eup %4425  ;;  %v475_v24 = vmul.f32 %v4424_v8, %v4796_v21  ;;  %2413 = vmatprep.subr.bf16.mxu0 %v4281_v30  ;;  %v273_v18 = vpop.xlane.xlu0 %272 }
 0x12f   :  { %v474_v52 = vmul.f32 %v4426_v9, %v4798_v22  ;;  %4431 = vrsqrt.f32 %v351_v49  ;;  %v358_v46 = vmax.f32 %v273_v18, 1e-24 }
 0x130   :  { %4433 = vrsqrt.f32 %v350_v25  ;;  %v263_v17 = vpop.xlane.xlu1 %262 }
 0x131   :  { %v4428_v34 = vpop.eup %4427  ;;  %v523_v0 = vpack.c.bf16 %v475_v24, %v474_v52  ;;  %v353_v11 = vmax.f32 %v263_v17, 1e-24 }
 0x132   :  { %v477_v21 = vmul.f32 %v4428_v34, %v4808_v29  ;;  %v277_v36 = vpop.xlane.xlu0 %276 }
 0x133   :  { %4435 = vrsqrt.f32 %v353_v11  ;;  %v360_v53 = vmax.f32 %v277_v36, 1e-24 }
 0x134   :  { %791 = vmatmul.mubr.bf16.gmra.mrb[44].mxu0 %v519_v39  ;;  %v4430_v39 = vpop.eup %4429  ;;  %4437 = vrsqrt.f32 %v352_v2  ;;  %v267_v12 = vpop.xlane.xlu1 %266 }
 0x135   :  { %800 = vmatprep.mubr.bf16.mxu0 %v5676_v26  ;;  %v476_v22 = vmul.f32 %v4430_v39, %v4810_v32  ;;  %v355_v41 = vmax.f32 %v267_v12, 1e-24  ;;  %v4279_v32 = vld [vmem:[#allocation7 + $0x140] ss:$8 sps:$4 sm:$0xff]  }
 0x136   :  { %2414 = vmatpush1.bf16.msra.mxu0 %v4279_v32  ;;  %v281_v52 = vpop.xlane.xlu0 %280  ;;  %v4290_v32 = vld [vmem:[#allocation7 + $0x174] ss:$8 sps:$4 sm:$0xff]  }
 0x137   :  { %v524_v60 = vpack.c.bf16 %v477_v21, %v476_v22  ;;  %4439 = vrsqrt.f32 %v355_v41  ;;  %2415 = vmatprep.subr.bf16.mxu0 %v4284_v3  ;;  %v362_v20 = vmax.f32 %v281_v52, 1e-24  ;;  %v5683_v52 = vld [vmem:[#allocation17_spill] sm:$0xff] }
 0x138   :  { %4441 = vrsqrt.f32 %v354_v16  ;;  %v271_v29 = vpop.xlane.xlu1 %270 }
 0x139   :  { %v4432_v13 = vpop.eup %4431  ;;  %v357_v48 = vmax.f32 %v271_v29, 1e-24 }
 0x13a   :  { %v4434_v59 = vpop.eup %4433  ;;  %v479_v33 = vmul.f32 %v4432_v13, %v4816_v35  ;;  %v285_v11 = vpop.xlane.xlu0 %284 }
 0x13b   :  { %v478_v31 = vmul.f32 %v4434_v59, %v4818_v38  ;;  %4443 = vrsqrt.f32 %v357_v48  ;;  %v364_v21 = vmax.f32 %v285_v11, 1e-24 }
 0x13c   :  { %801 = vmatmul.mubr.bf16.gmra.mrb[48].mxu0 %v520_v1  ;;  %4445 = vrsqrt.f32 %v356_v4  ;;  %v275_v6 = vpop.xlane.xlu1 %274  ;;  %v5678_v4 = vld [vmem:[#allocation14_spill] sm:$0xff] }
 0x13d   :  { %810 = vmatprep.mubr.bf16.mxu0 %v5676_v26  ;;  %v4436_v1 = vpop.eup %4435  ;;  %v525_v42 = vpack.c.bf16 %v479_v33, %v478_v31  ;;  %v359_v55 = vmax.f32 %v275_v6, 1e-24  ;;  %v5677_v33 = vld [vmem:[#allocation12_spill] sm:$0xff] }
 0x13e   :  { %v4438_v45 = vpop.eup %4437  ;;  %v481_v35 = vmul.f32 %v4436_v1, %v4824_v43  ;;  %v289_v28 = vpop.xlane.xlu0 %288 }
 0x13f   :  { %v480_v38 = vmul.f32 %v4438_v45, %v4826_v44  ;;  %4447 = vrsqrt.f32 %v359_v55  ;;  %v4282_v44 = vld [vmem:[#allocation7 + $0x150] ss:$8 sps:$4 sm:$0xff]   ;;  %v366_v16 = vmax.f32 %v289_v28, 1e-24 }
 0x140   :  { %4449 = vrsqrt.f32 %v358_v46  ;;  %v279_v43 = vpop.xlane.xlu1 %278  ;;  %2416 = vmatpush1.bf16.msra.mxu0 %v4282_v44 }
 0x141   :  { %v4440_v19 = vpop.eup %4439  ;;  %v526_v47 = vpack.c.bf16 %v481_v35, %v480_v38  ;;  %v5679_v38 = vld [vmem:[#allocation13_spill] sm:$0xff] }
 0x142   :  { %v483_v37 = vmul.f32 %v4440_v19, %v4832_v50 }
 0x144   :  { %811 = vmatmul.mubr.bf16.gmra.mrb[52].mxu0 %v521_v58  ;;  %v4442_v58 = vpop.eup %4441  ;;  %v283_v9 = vpop.xlane.xlu1 %282 }
 0x145   :  { %820 = vmatprep.mubr.bf16.mxu0 %v5676_v26  ;;  %v482_v61 = vmul.f32 %v4442_v58, %v4834_v51  ;;  %v4444_v10 = vpop.eup %4443  ;;  %v363_v17 = vmax.f32 %v283_v9, 1e-24 }
 0x146   :  { %v4446_v8 = vpop.eup %4445  ;;  %v485_v50 = vmul.f32 %v4444_v10, %v4840_v56  ;;  %v4291_v10 = vld [vmem:[#allocation7 + $0x180] ss:$8 sps:$4 sm:$0xff]  }
 0x147   :  { %v527_v7 = vpack.c.bf16 %v483_v37, %v482_v61  ;;  %v484_v51 = vmul.f32 %v4446_v8, %v4842_v57  ;;  %v4285_v57 = vld [vmem:[#allocation7 + $0x160] ss:$8 sps:$4 sm:$0xff]  }
 0x148   :  { %v287_v56 = vpop.xlane.xlu1 %286  ;;  %v5680_v61 = vld [vmem:[#allocation16_spill] sm:$0xff] }
 0x149   :  { %v4448_v49 = vpop.eup %4447  ;;  %v528_v25 = vpack.c.bf16 %v485_v50, %v484_v51  ;;  %v365_v22 = vmax.f32 %v287_v56, 1e-24 }
 0x14a   :  { %v4450_v24 = vpop.eup %4449  ;;  %v487_v34 = vmul.f32 %v4448_v49, %v4848_v62  ;;  %v5682_v49 = vld [vmem:[#allocation18_spill] sm:$0xff] }
 0x14b   :  { %v486_v23 = vmul.f32 %v4450_v24, %v4850_v63 }
 0x14c   :  { %821 = vmatmul.mubr.bf16.gmra.mrb[56].mxu0 %v522_v54  ;;  %v361_v54 = vmax.f32 %v279_v43, 1e-24  ;;  %v291_v12 = vpop.xlane.xlu1 %290  ;;  %v5681_v43 = vld [vmem:[#allocation15_spill] sm:$0xff] }
 0x14d   :  { %830 = vmatprep.mubr.bf16.mxu0 %v5676_v26  ;;  %v529_v39 = vpack.c.bf16 %v487_v34, %v486_v23  ;;  %v367_v41 = vmax.f32 %v291_v12, 1e-24 }
 0x14e   :  { %4451 = vrsqrt.f32 %v361_v54 }
 0x14f   :  { %4453 = vrsqrt.f32 %v360_v53  ;;  %v558_v53 = vlaneseq }
 0x150   :  { %4455 = vrsqrt.f32 %v363_v17 }
 0x151   :  { %4457 = vrsqrt.f32 %v362_v20  ;;  %v559_v17 = vshrl.u32 %v558_v53, 7 }
 0x152   :  { %4459 = vrsqrt.f32 %v365_v22 }
 0x153   :  { %4461 = vrsqrt.f32 %v364_v21  ;;  %v4984_v56 = vsub.s32 0, %v559_v17  ;;  %v5684_v21 = vld [vmem:[#allocation20_spill] sm:$0xff] }
 0x154   :  { %831 = vmatmul.mubr.bf16.gmra.mrb[60].mxu0 %v523_v0  ;;  %v4287_v0 = vld [vmem:[#allocation7 + $0x164] ss:$8 sps:$4 sm:$0xff]   ;;  %4463 = vrsqrt.f32 %v367_v41  ;;  %v4296_v41 = vld [vmem:[#allocation7 + $0x194] ss:$8 sps:$4 sm:$0xff]  }
 0x155   :  { %840 = vmatprep.mubr.bf16.mxu0 %v5676_v26  ;;  %2417 = vmatprep.subr.bf16.mxu0 %v4287_v0  ;;  %4465 = vrsqrt.f32 %v366_v16 }
 0x156   :  { %2418 = vmatpush1.bf16.msra.mxu0 %v4285_v57 }
 0x157   :  { %2419 = vmatprep.subr.bf16.mxu0 %v4290_v32 }
 0x158   :  { %v4452_v40 = vpop.eup %4451 }
 0x159   :  { %v4454_v2 = vpop.eup %4453  ;;  %v489_v62 = vmul.f32 %v4452_v40, %v4856_v14  ;;  %v295_v14 = vpop.xlane.xlu1 %294  ;;  %v556_v40 = vld [vmem:[%s5654_s3] ss:$4 sm:$0x3] }
 0x15a   :  { %v488_v63 = vmul.f32 %v4454_v2, %v4858_v15  ;;  %v4456_v13 = vpop.eup %4455  ;;  %v4288_v15 = vld [vmem:[#allocation7 + $0x170] ss:$8 sps:$4 sm:$0xff]   ;;  %v369_v45 = vmax.f32 %v295_v14, 1e-24  ;;  %v4992_v22 = vrot.slane %v556_v40, %v4984_v56 }
 0x15b   :  { %v4458_v59 = vpop.eup %4457  ;;  %v491_v29 = vmul.f32 %v4456_v13, %v5677_v33  ;;  %2420 = vmatpush1.bf16.msra.mxu0 %v4288_v15 }
 0x15c   :  { %841 = vmatmul.mubr.bf16.gmra.mrb[64].mxu0 %v524_v60  ;;  %v530_v60 = vpack.c.bf16 %v489_v62, %v488_v63  ;;  %v490_v31 = vmul.f32 %v4458_v59, %v4866_v27  ;;  %v4460_v30 = vpop.eup %4459  ;;  %4467 = vrsqrt.f32 %v369_v45  ;;  %v5685_v62 = vld [vmem:[#allocation19_spill] sm:$0xff] }
 0x15d   :  { %850 = vmatprep.mubr.bf16.mxu0 %v5676_v26  ;;  %v4462_v5 = vpop.eup %4461  ;;  %v493_v35 = vmul.f32 %v4460_v30, %v5679_v38  ;;  %v299_v6 = vpop.xlane.xlu1 %298  ;;  %v4294_v59 = vld [vmem:[#allocation7 + $0x190] ss:$8 sps:$4 sm:$0xff]  }
 0x15e   :  { %v531_v1 = vpack.c.bf16 %v491_v29, %v490_v31  ;;  %v492_v27 = vmul.f32 %v4462_v5, %v5678_v4  ;;  %v4464_v19 = vpop.eup %4463  ;;  %v371_v55 = vmax.f32 %v299_v6, 1e-24 }
 0x15f   :  { %v4466_v58 = vpop.eup %4465  ;;  %v495_v44 = vmul.f32 %v4464_v19, %v5681_v43  ;;  %v4492_v19 = vld [vmem:[#allocation2 + $0x1c8] sm:$0xff] }
 0x160   :  { %v494_v37 = vmul.f32 %v4466_v58, %v5680_v61 }
 0x161   :  { %v303_v3 = vpop.xlane.xlu1 %302 }
 0x162   :  { %v533_v8 = vpack.c.bf16 %v495_v44, %v494_v37  ;;  %v373_v50 = vmax.f32 %v303_v3, 1e-24 }
 0x164   :  { %851 = vmatmul.mubr.bf16.gmra.mrb[68].mxu0 %v525_v42  ;;  %v293_v42 = vpop.xlane.xlu0 %292 }
 0x165   :  { %860 = vmatprep.mubr.bf16.mxu0 %v5676_v26  ;;  %v368_v48 = vmax.f32 %v293_v42, 1e-24  ;;  %v307_v20 = vpop.xlane.xlu1 %306 }
 0x166   :  { %v4468_v36 = vpop.eup %4467  ;;  %v375_v11 = vmax.f32 %v307_v20, 1e-24 }
 0x167   :  { %4469 = vrsqrt.f32 %v368_v48  ;;  %v497_v24 = vmul.f32 %v4468_v36, %v5683_v52 }
 0x168   :  { %v297_v18 = vpop.xlane.xlu0 %296  ;;  %4471 = vrsqrt.f32 %v371_v55 }
 0x169   :  { %v370_v46 = vmax.f32 %v297_v18, 1e-24  ;;  %v311_v28 = vpop.xlane.xlu1 %310 }
 0x16a   :  { %v377_v45 = vmax.f32 %v311_v28, 1e-24  ;;  %v4299_v28 = vld [vmem:[#allocation7 + $0x1a4] ss:$8 sps:$4 sm:$0xff]  }
 0x16b   :  { %4473 = vrsqrt.f32 %v370_v46 }
 0x16c   :  { %861 = vmatmul.mubr.bf16.gmra.mrb[72].mxu0 %v526_v47  ;;  %v532_v47 = vpack.c.bf16 %v493_v35, %v492_v27  ;;  %v301_v54 = vpop.xlane.xlu0 %300  ;;  %4475 = vrsqrt.f32 %v373_v50  ;;  %v4491_v35 = vld [vmem:[#allocation2 + $0x1c0] sm:$0xff] }
 0x16d   :  { %870 = vmatprep.mubr.bf16.mxu0 %v5676_v26  ;;  %v372_v9 = vmax.f32 %v301_v54, 1e-24  ;;  %v315_v43 = vpop.xlane.xlu1 %314 }
 0x16e   :  { %v379_v52 = vmax.f32 %v315_v43, 1e-24 }
 0x16f   :  { %4477 = vrsqrt.f32 %v372_v9 }
 0x170   :  { %v305_v57 = vpop.xlane.xlu0 %304  ;;  %4479 = vrsqrt.f32 %v375_v11 }
 0x171   :  { %v4470_v51 = vpop.eup %4469  ;;  %v374_v2 = vmax.f32 %v305_v57, 1e-24 }
 0x172   :  { %v4472_v23 = vpop.eup %4471 }
 0x173   :  { %v499_v12 = vmul.f32 %v4472_v23, %v5685_v62  ;;  %4481 = vrsqrt.f32 %v374_v2 }
 0x174   :  { %871 = vmatmul.mubr.bf16.gmra.mrb[76].mxu0 %v527_v7  ;;  %v4293_v7 = vld [vmem:[#allocation7 + $0x184] ss:$8 sps:$4 sm:$0xff]   ;;  %v309_v14 = vpop.xlane.xlu0 %308  ;;  %4483 = vrsqrt.f32 %v377_v45 }
 0x175   :  { %880 = vmatprep.mubr.bf16.mxu0 %v5676_v26  ;;  %2421 = vmatprep.subr.bf16.mxu0 %v4293_v7  ;;  %v4474_v0 = vpop.eup %4473  ;;  %v376_v4 = vmax.f32 %v309_v14, 1e-24 }
 0x176   :  { %2422 = vmatpush1.bf16.msra.mxu0 %v4291_v10  ;;  %v498_v63 = vmul.f32 %v4474_v0, %v5684_v21  ;;  %v4476_v16 = vpop.eup %4475  ;;  %v4494_v0 = vld [vmem:[#allocation2 + $0x1d8] sm:$0xff] }
 0x177   :  { %2423 = vmatprep.subr.bf16.mxu0 %v4296_v41  ;;  %4485 = vrsqrt.f32 %v376_v4  ;;  %v4495_v4 = vld [vmem:[#allocation2 + $0x1e0] sm:$0xff] }
 0x178   :  { %v535_v29 = vpack.c.bf16 %v499_v12, %v498_v63  ;;  %4487 = vrsqrt.f32 %v379_v52  ;;  %v4498_v52 = vld [vmem:[#allocation2 + $0x1f8] sm:$0xff] }
 0x179   :  { %v4478_v15 = vpop.eup %4477 }
 0x17a   :  { %2424 = vmatpush1.bf16.msra.mxu0 %v4294_v59  ;;  %v500_v6 = vmul.f32 %v4491_v35, %v4478_v15  ;;  %v4480_v44 = vpop.eup %4479 }
 0x17b   :  { %2425 = vmatprep.subr.bf16.mxu0 %v4299_v28 }
 0x17c   :  { %881 = vmatmul.mubr.bf16.gmra.mrb[80].mxu0 %v528_v25  ;;  %v496_v25 = vmul.f32 %v4470_v51, %v5682_v49 }
 0x17d   :  { %890 = vmatprep.mubr.bf16.mxu0 %v5676_v26  ;;  %v4482_v54 = vpop.eup %4481 }
 0x17e   :  { %v534_v34 = vpack.c.bf16 %v497_v24, %v496_v25  ;;  %v4484_v59 = vpop.eup %4483 }
 0x184   :  { %891 = vmatmul.mubr.bf16.gmra.mrb[84].mxu0 %v529_v39  ;;  %v4989_v39 = vsub.s32 1, %v559_v17 }
 0x185   :  { %900 = vmatprep.mubr.bf16.mxu0 %v5676_v26 }
 0x186   :  { %v4997_v13 = vrot.slane %v556_v40, %v4989_v39  ;;  %v503_v40 = vmul.f32 %v4494_v0, %v4480_v44 }
 0x18c   :  { %901 = vmatmul.mubr.bf16.gmra.mrb[88].mxu0 %v530_v60 }
 0x18d   :  { %910 = vmatprep.mubr.bf16.mxu0 %v5676_v26 }
 0x194   :  { %911 = vmatmul.mubr.bf16.gmra.mrb[92].mxu0 %v531_v1 }
 0x195   :  { %920 = vmatprep.mubr.bf16.mxu0 %v5676_v26 }
 0x19c   :  { %921 = vmatmul.mubr.bf16.gmra.mrb[96].mxu0 %v532_v47  ;;  %v501_v47 = vmul.f32 %v4492_v19, %v4476_v16 }
 0x19d   :  { %930 = vmatprep.mubr.bf16.mxu0 %v5676_v26 }
 0x19e   :  { %v536_v7 = vpack.c.bf16 %v501_v47, %v500_v6 }
 0x1a4   :  { %931 = vmatmul.mubr.bf16.gmra.mrb[100].mxu0 %v533_v8  ;;  %v313_v8 = vpop.xlane.xlu0 %312 }
 0x1a5   :  { %940 = vmatprep.mubr.bf16.mxu0 %v5676_v26  ;;  %v378_v20 = vmax.f32 %v313_v8, 1e-24 }
 0x1a7   :  { %4489 = vrsqrt.f32 %v378_v20 }
 0x1ac   :  { %941 = vmatmul.mubr.bf16.gmra.mrb[104].mxu0 %v534_v34  ;;  %v4493_v34 = vld [vmem:[#allocation2 + $0x1d0] sm:$0xff] }
 0x1ad   :  { %950 = vmatprep.mubr.bf16.mxu0 %v5676_v26  ;;  %v502_v57 = vmul.f32 %v4493_v34, %v4482_v54 }
 0x1af   :  { %v682_v60 = vpop.f32.mrb[0].mxu0 }
 0x1b0   :  { %v683_v31 = vadd.f32 %v682_v60, %v4992_v22  ;;  %v684_v33 = vpop.f32.mrb[1].mxu0  ;;  %v4297_v60 = vld [vmem:[#allocation7 + $0x1a0] ss:$8 sps:$4 sm:$0xff]  }
 0x1b1   :  { %v685_v32 = vadd.f32 %v684_v33, %v4997_v13  ;;  %v686_v30 = vpop.f32.mrb[2].mxu0  ;;  %2426 = vmatpush1.bf16.msra.mxu0 %v4297_v60 }
 0x1b2   :  { %v1001_v1 = vmul.f32 0.2, %v683_v31  ;;  %v687_v42 = vadd.f32 %v686_v30, %v4992_v22  ;;  %v688_v5 = vpop.f32.mrb[3].mxu0 }
 0x1b3   :  { %v689_v48 = vadd.f32 %v688_v5, %v4997_v13  ;;  %v1002_v27 = vmul.f32 0.2, %v685_v32 }
 0x1b4   :  { %v1003_v38 = vmul.f32 0.2, %v687_v42  ;;  %951 = vmatmul.mubr.bf16.gmra.mrb[108].mxu0 %v535_v29  ;;  %v1129_v58 = vmax.f32 %v683_v31, %v1001_v1  ;;  %v537_v31 = vpack.c.bf16 %v503_v40, %v502_v57  ;;  %v4486_v29 = vpop.eup %4485  ;;  %v4300_v40 = vld [vmem:[#allocation7 + $0x1b0] ss:$8 sps:$4 sm:$0xff]  }
 0x1b5   :  { %960 = vmatprep.mubr.bf16.mxu0 %v5676_v26  ;;  %v1004_v18 = vmul.f32 0.2, %v689_v48  ;;  %v1130_v61 = vmax.f32 %v685_v32, %v1002_v27  ;;  %v504_v27 = vmul.f32 %v4495_v4, %v4486_v29 }
 0x1b6   :  { %v1131_v55 = vmax.f32 %v687_v42, %v1003_v38  ;;  %v4496_v38 = vld [vmem:[#allocation2 + $0x1e8] sm:$0xff] }
 0x1b7   :  { %v692_v46 = vpop.f32.mrb[4].mxu0  ;;  %v1132_v37 = vmax.f32 %v689_v48, %v1004_v18  ;;  %v505_v35 = vmul.f32 %v4496_v38, %v4484_v59 }
 0x1b8   :  { %v693_v3 = vadd.f32 %v692_v46, %v4992_v22  ;;  %v694_v10 = vpop.f32.mrb[5].mxu0  ;;  %v1257_v36 = vpack.c.bf16 %v1131_v55, %v1129_v58  ;;  %v4488_v46 = vpop.eup %4487 }
 0x1b9   :  { %v695_v53 = vadd.f32 %v694_v10, %v4997_v13  ;;  %v696_v51 = vpop.f32.mrb[6].mxu0  ;;  %v1258_v50 = vpack.c.bf16 %v1132_v37, %v1130_v61  ;;  %v538_v43 = vpack.c.bf16 %v505_v35, %v504_v27 }
 0x1ba   :  { %v1005_v9 = vmul.f32 0.2, %v693_v3  ;;  %v697_v49 = vadd.f32 %v696_v51, %v4992_v22  ;;  %v698_v25 = vpop.f32.mrb[7].mxu0 }
 0x1bb   :  { %v1006_v24 = vmul.f32 0.2, %v695_v53  ;;  %v699_v17 = vadd.f32 %v698_v25, %v4997_v13  ;;  %1558 = vmatprep.mubr.bf16.mxu1 %v1258_v50 }
 0x1bc   :  { %v1007_v23 = vmul.f32 0.2, %v697_v49  ;;  %961 = vmatmul.mubr.bf16.gmra.mrb[112].mxu0 %v536_v7  ;;  %1559 = vmatmul.mubr.bf16.vlgmr.msra.gmra.mrb[0].mxu1 %v1257_v36  ;;  %v1133_v2 = vmax.f32 %v693_v3, %v1005_v9  ;;  %v4490_v3 = vpop.eup %4489 }
 0x1bd   :  { %v1008_v11 = vmul.f32 0.2, %v699_v17  ;;  %970 = vmatprep.mubr.bf16.mxu0 %v5676_v26  ;;  %v1134_v63 = vmax.f32 %v695_v53, %v1006_v24  ;;  %v507_v24 = vmul.f32 %v4498_v52, %v4488_v46 }
 0x1be   :  { %v1135_v21 = vmax.f32 %v697_v49, %v1007_v23  ;;  %v4497_v49 = vld [vmem:[#allocation2 + $0x1f0] sm:$0xff] }
 0x1bf   :  { %v1136_v62 = vmax.f32 %v699_v17, %v1008_v11  ;;  %v702_v12 = vpop.f32.mrb[8].mxu0  ;;  %v506_v25 = vmul.f32 %v4497_v49, %v4490_v3  ;;  %v4302_v11 = vld [vmem:[#allocation7 + $0x1b4] ss:$8 sps:$4 sm:$0xff]   ;;  %v4305_v3 = vld [vmem:[#allocation7 + $0x1c4] ss:$8 sps:$4 sm:$0xff]  }
 0x1c0   :  { %v703_v41 = vadd.f32 %v702_v12, %v4992_v22  ;;  %v704_v16 = vpop.f32.mrb[9].mxu0  ;;  %v1259_v33 = vpack.c.bf16 %v1135_v21, %v1133_v2  ;;  %2427 = vmatprep.subr.bf16.mxu0 %v4302_v11 }
 0x1c1   :  { %v705_v14 = vadd.f32 %v704_v16, %v4997_v13  ;;  %v706_v15 = vpop.f32.mrb[10].mxu0  ;;  %v1260_v32 = vpack.c.bf16 %v1136_v62, %v1134_v63  ;;  %v539_v63 = vpack.c.bf16 %v507_v24, %v506_v25  ;;  %2428 = vmatpush1.bf16.msra.mxu0 %v4300_v40 }
 0x1c2   :  { %v1009_v30 = vmul.f32 0.2, %v703_v41  ;;  %v707_v1 = vadd.f32 %v706_v15, %v4992_v22  ;;  %v708_v42 = vpop.f32.mrb[11].mxu0  ;;  %2429 = vmatprep.subr.bf16.mxu0 %v4305_v3 }
 0x1c3   :  { %v1010_v5 = vmul.f32 0.2, %v705_v14  ;;  %v709_v45 = vadd.f32 %v708_v42, %v4997_v13  ;;  %1568 = vmatprep.mubr.bf16.mxu1 %v1260_v32 }
 0x1c4   :  { %v1011_v48 = vmul.f32 0.2, %v707_v1  ;;  %971 = vmatmul.mubr.bf16.gmra.mrb[116].mxu0 %v537_v31  ;;  %1569 = vmatmul.mubr.bf16.gmra.mrb[4].mxu1 %v1259_v33  ;;  %v1137_v19 = vmax.f32 %v703_v41, %v1009_v30 }
 0x1c5   :  { %v1012_v6 = vmul.f32 0.2, %v709_v45  ;;  %980 = vmatprep.mubr.bf16.mxu0 %v5676_v26  ;;  %v1138_v18 = vmax.f32 %v705_v14, %v1010_v5 }
 0x1c6   :  { %v1139_v47 = vmax.f32 %v707_v1, %v1011_v48 }
 0x1c7   :  { %v1140_v58 = vmax.f32 %v709_v45, %v1012_v6  ;;  %v712_v55 = vpop.f32.mrb[12].mxu0 }
 0x1c8   :  { %v713_v61 = vadd.f32 %v712_v55, %v4992_v22  ;;  %v714_v37 = vpop.f32.mrb[13].mxu0  ;;  %v1261_v44 = vpack.c.bf16 %v1139_v47, %v1137_v19 }
 0x1c9   :  { %v715_v10 = vadd.f32 %v714_v37, %v4997_v13  ;;  %v716_v7 = vpop.f32.mrb[14].mxu0  ;;  %v1262_v36 = vpack.c.bf16 %v1140_v58, %v1138_v18 }
 0x1ca   :  { %v1013_v8 = vmul.f32 0.2, %v713_v61  ;;  %v717_v54 = vadd.f32 %v716_v7, %v4992_v22  ;;  %v718_v53 = vpop.f32.mrb[15].mxu0 }
 0x1cb   :  { %v1014_v51 = vmul.f32 0.2, %v715_v10  ;;  %v719_v50 = vadd.f32 %v718_v53, %v4997_v13  ;;  %1578 = vmatprep.mubr.bf16.mxu1 %v1262_v36 }
 0x1cc   :  { %v1015_v9 = vmul.f32 0.2, %v717_v54  ;;  %981 = vmatmul.mubr.bf16.gmra.mrb[120].mxu0 %v538_v43  ;;  %1579 = vmatmul.mubr.bf16.gmra.mrb[8].mxu1 %v1261_v44  ;;  %v1141_v20 = vmax.f32 %v713_v61, %v1013_v8  ;;  %v4303_v44 = vld [vmem:[#allocation7 + $0x1c0] ss:$8 sps:$4 sm:$0xff]  }
 0x1cd   :  { %v1016_v17 = vmul.f32 0.2, %v719_v50  ;;  %990 = vmatprep.mubr.bf16.mxu0 %v5676_v26  ;;  %v1142_v34 = vmax.f32 %v715_v10, %v1014_v51  ;;  %2430 = vmatpush1.bf16.msra.mxu0 %v4303_v44 }
 0x1ce   :  { %v1143_v23 = vmax.f32 %v717_v54, %v1015_v9 }
 0x1cf   :  { %v1144_v57 = vmax.f32 %v719_v50, %v1016_v17  ;;  %v722_v0 = vpop.f32.mrb[16].mxu0 }
 0x1d0   :  { %v723_v2 = vadd.f32 %v722_v0, %v4992_v22  ;;  %v724_v21 = vpop.f32.mrb[17].mxu0  ;;  %v1263_v62 = vpack.c.bf16 %v1143_v23, %v1141_v20 }
 0x1d1   :  { %v725_v12 = vadd.f32 %v724_v21, %v4997_v13  ;;  %v726_v60 = vpop.f32.mrb[18].mxu0  ;;  %v1264_v28 = vpack.c.bf16 %v1144_v57, %v1142_v34 }
 0x1d2   :  { %v1017_v59 = vmul.f32 0.2, %v723_v2  ;;  %v727_v26 = vadd.f32 %v726_v60, %v4992_v22  ;;  %v728_v41 = vpop.f32.mrb[19].mxu0 }
 0x1d3   :  { %v1018_v16 = vmul.f32 0.2, %v725_v12  ;;  %v729_v31 = vadd.f32 %v728_v41, %v4997_v13  ;;  %1588 = vmatprep.mubr.bf16.mxu1 %v1264_v28 }
 0x1d4   :  { %v1019_v33 = vmul.f32 0.2, %v727_v26  ;;  %991 = vmatmul.mubr.bf16.gmra.mrb[124].mxu0 %v539_v63  ;;  %1589 = vmatmul.mubr.bf16.gmra.mrb[12].mxu1 %v1263_v62  ;;  %v1145_v14 = vmax.f32 %v723_v2, %v1017_v59 }
 0x1d5   :  { %v1020_v29 = vmul.f32 0.2, %v729_v31  ;;  %v1146_v32 = vmax.f32 %v725_v12, %v1018_v16 }
 0x1d6   :  { %v1147_v15 = vmax.f32 %v727_v26, %v1019_v33 }
 0x1d7   :  { %v1148_v30 = vmax.f32 %v729_v31, %v1020_v29  ;;  %v732_v1 = vpop.f32.mrb[20].mxu0 }
 0x1d8   :  { %v733_v42 = vadd.f32 %v732_v1, %v4992_v22  ;;  %v734_v5 = vpop.f32.mrb[21].mxu0  ;;  %v1265_v45 = vpack.c.bf16 %v1147_v15, %v1145_v14  ;;  %v4306_v15 = vld [vmem:[#allocation7 + $0x1d0] ss:$8 sps:$4 sm:$0xff]  }
 0x1d9   :  { %v735_v48 = vadd.f32 %v734_v5, %v4997_v13  ;;  %v736_v4 = vpop.f32.mrb[22].mxu0  ;;  %v1266_v27 = vpack.c.bf16 %v1148_v30, %v1146_v32  ;;  %v4308_v32 = vld [vmem:[#allocation7 + $0x1d4] ss:$8 sps:$4 sm:$0xff]  }
 0x1da   :  { %v1021_v38 = vmul.f32 0.2, %v733_v42  ;;  %v737_v35 = vadd.f32 %v736_v4, %v4992_v22  ;;  %v738_v6 = vpop.f32.mrb[23].mxu0  ;;  %2431 = vmatprep.subr.bf16.mxu0 %v4308_v32 }
 0x1db   :  { %v1022_v19 = vmul.f32 0.2, %v735_v48  ;;  %v739_v47 = vadd.f32 %v738_v6, %v4997_v13  ;;  %1598 = vmatprep.mubr.bf16.mxu1 %v1266_v27  ;;  %2432 = vmatpush1.bf16.msra.mxu0 %v4306_v15 }
 0x1dc   :  { %v1023_v18 = vmul.f32 0.2, %v737_v35  ;;  %1599 = vmatmul.mubr.bf16.gmra.mrb[16].mxu1 %v1265_v45  ;;  %v1149_v55 = vmax.f32 %v733_v42, %v1021_v38 }
 0x1dd   :  { %v1024_v58 = vmul.f32 0.2, %v739_v47  ;;  %v1150_v61 = vmax.f32 %v735_v48, %v1022_v19 }
 0x1de   :  { %v1151_v46 = vmax.f32 %v737_v35, %v1023_v18 }
 0x1df   :  { %v1152_v37 = vmax.f32 %v739_v47, %v1024_v58  ;;  %v742_v43 = vpop.f32.mrb[24].mxu0 }
 0x1e0   :  { %v743_v10 = vadd.f32 %v742_v43, %v4992_v22  ;;  %v744_v7 = vpop.f32.mrb[25].mxu0  ;;  %v1267_v36 = vpack.c.bf16 %v1151_v46, %v1149_v55 }
 0x1e1   :  { %v745_v8 = vadd.f32 %v744_v7, %v4997_v13  ;;  %v746_v54 = vpop.f32.mrb[26].mxu0  ;;  %v1268_v53 = vpack.c.bf16 %v1152_v37, %v1150_v61 }
 0x1e2   :  { %v1025_v51 = vmul.f32 0.2, %v743_v10  ;;  %v747_v50 = vadd.f32 %v746_v54, %v4992_v22  ;;  %v748_v9 = vpop.f32.mrb[27].mxu0 }
 0x1e3   :  { %v1026_v49 = vmul.f32 0.2, %v745_v8  ;;  %v749_v25 = vadd.f32 %v748_v9, %v4997_v13  ;;  %1608 = vmatprep.mubr.bf16.mxu1 %v1268_v53 }
 0x1e4   :  { %v1027_v52 = vmul.f32 0.2, %v747_v50  ;;  %1609 = vmatmul.mubr.bf16.gmra.mrb[20].mxu1 %v1267_v36  ;;  %v1153_v17 = vmax.f32 %v743_v10, %v1025_v51 }
 0x1e5   :  { %v1028_v24 = vmul.f32 0.2, %v749_v25  ;;  %v1154_v23 = vmax.f32 %v745_v8, %v1026_v49 }
 0x1e6   :  { %v1155_v20 = vmax.f32 %v747_v50, %v1027_v52 }
 0x1e7   :  { %v1156_v34 = vmax.f32 %v749_v25, %v1028_v24  ;;  %v752_v57 = vpop.f32.mrb[28].mxu0 }
 0x1e8   :  { %v753_v0 = vadd.f32 %v752_v57, %v4992_v22  ;;  %v754_v40 = vpop.f32.mrb[29].mxu0  ;;  %v1269_v11 = vpack.c.bf16 %v1155_v20, %v1153_v17  ;;  %v4309_v20 = vld [vmem:[#allocation7 + $0x1e0] ss:$8 sps:$4 sm:$0xff]  }
 0x1e9   :  { %v755_v2 = vadd.f32 %v754_v40, %v4997_v13  ;;  %v756_v21 = vpop.f32.mrb[30].mxu0  ;;  %v1270_v63 = vpack.c.bf16 %v1156_v34, %v1154_v23  ;;  %v4311_v23 = vld [vmem:[#allocation7 + $0x1e4] ss:$8 sps:$4 sm:$0xff]  }
 0x1ea   :  { %v1029_v62 = vmul.f32 0.2, %v753_v0  ;;  %v757_v12 = vadd.f32 %v756_v21, %v4992_v22  ;;  %v758_v60 = vpop.f32.mrb[31].mxu0  ;;  %2433 = vmatprep.subr.bf16.mxu0 %v4311_v23 }
 0x1eb   :  { %v1030_v28 = vmul.f32 0.2, %v755_v2  ;;  %v759_v59 = vadd.f32 %v758_v60, %v4997_v13  ;;  %1618 = vmatprep.mubr.bf16.mxu1 %v1270_v63  ;;  %2434 = vmatpush1.bf16.msra.mxu0 %v4309_v20 }
 0x1ec   :  { %v1031_v26 = vmul.f32 0.2, %v757_v12  ;;  %1619 = vmatmul.mubr.bf16.gmra.mrb[24].mxu1 %v1269_v11  ;;  %v1157_v16 = vmax.f32 %v753_v0, %v1029_v62 }
 0x1ed   :  { %v1032_v41 = vmul.f32 0.2, %v759_v59  ;;  %v1158_v33 = vmax.f32 %v755_v2, %v1030_v28 }
 0x1ee   :  { %v1159_v31 = vmax.f32 %v757_v12, %v1031_v26 }
 0x1ef   :  { %v1160_v29 = vmax.f32 %v759_v59, %v1032_v41  ;;  %v762_v14 = vpop.f32.mrb[32].mxu0 }
 0x1f0   :  { %v763_v30 = vadd.f32 %v762_v14, %v4992_v22  ;;  %v764_v1 = vpop.f32.mrb[33].mxu0  ;;  %v1271_v42 = vpack.c.bf16 %v1159_v31, %v1157_v16 }
 0x1f1   :  { %v765_v5 = vadd.f32 %v764_v1, %v4997_v13  ;;  %v766_v45 = vpop.f32.mrb[34].mxu0  ;;  %v1272_v48 = vpack.c.bf16 %v1160_v29, %v1158_v33 }
 0x1f2   :  { %v1033_v4 = vmul.f32 0.2, %v763_v30  ;;  %v767_v27 = vadd.f32 %v766_v45, %v4992_v22  ;;  %v768_v38 = vpop.f32.mrb[35].mxu0 }
 0x1f3   :  { %v1034_v35 = vmul.f32 0.2, %v765_v5  ;;  %v769_v6 = vadd.f32 %v768_v38, %v4997_v13  ;;  %1628 = vmatprep.mubr.bf16.mxu1 %v1272_v48 }
 0x1f4   :  { %v1035_v19 = vmul.f32 0.2, %v767_v27  ;;  %1629 = vmatmul.mubr.bf16.gmra.mrb[28].mxu1 %v1271_v42  ;;  %v1161_v18 = vmax.f32 %v763_v30, %v1033_v4 }
 0x1f5   :  { %v1036_v47 = vmul.f32 0.2, %v769_v6  ;;  %v1162_v55 = vmax.f32 %v765_v5, %v1034_v35 }
 0x1f6   :  { %v1163_v58 = vmax.f32 %v767_v27, %v1035_v19 }
 0x1f7   :  { %v1164_v46 = vmax.f32 %v769_v6, %v1036_v47  ;;  %v772_v61 = vpop.f32.mrb[36].mxu0 }
 0x1f8   :  { %v773_v37 = vadd.f32 %v772_v61, %v4992_v22  ;;  %v774_v43 = vpop.f32.mrb[37].mxu0  ;;  %v1273_v44 = vpack.c.bf16 %v1163_v58, %v1161_v18  ;;  %v4312_v58 = vld [vmem:[#allocation7 + $0x1f0] ss:$8 sps:$4 sm:$0xff]  }
 0x1f9   :  { %v775_v3 = vadd.f32 %v774_v43, %v4997_v13  ;;  %v776_v10 = vpop.f32.mrb[38].mxu0  ;;  %v1274_v7 = vpack.c.bf16 %v1164_v46, %v1162_v55  ;;  %v4314_v55 = vld [vmem:[#allocation7 + $0x1f4] ss:$8 sps:$4 sm:$0xff]   ;;  %v5053_v43 = vld [vmem:[#allocation7 + $0x200] ss:$8 sps:$4 sm:$0xff]  }
 0x1fa   :  { %v1037_v36 = vmul.f32 0.2, %v773_v37  ;;  %v777_v8 = vadd.f32 %v776_v10, %v4992_v22  ;;  %v778_v54 = vpop.f32.mrb[39].mxu0  ;;  %2435 = vmatprep.subr.bf16.mxu0 %v4314_v55 }
 0x1fb   :  { %v1038_v53 = vmul.f32 0.2, %v775_v3  ;;  %v779_v51 = vadd.f32 %v778_v54, %v4997_v13  ;;  %1638 = vmatprep.mubr.bf16.mxu1 %v1274_v7  ;;  %2436 = vmatpush1.bf16.msra.mxu0 %v4312_v58 }
 0x1fc   :  { %v1039_v50 = vmul.f32 0.2, %v777_v8  ;;  %1639 = vmatmul.mubr.bf16.gmra.mrb[32].mxu1 %v1273_v44  ;;  %v1165_v49 = vmax.f32 %v773_v37, %v1037_v36  ;;  %v4317_v44 = vld [vmem:[#allocation7 + $0x204] ss:$8 sps:$4 sm:$0xff]  }
 0x1fd   :  { %v1040_v9 = vmul.f32 0.2, %v779_v51  ;;  %v1166_v52 = vmax.f32 %v775_v3, %v1038_v53  ;;  %4154 = vmatprep.subr.bf16.mxu1 %v4317_v44  ;;  %3284 = vmatprep.subr.bf16.mxu0 %v4317_v44 }
 0x1fe   :  { %v1167_v25 = vmax.f32 %v777_v8, %v1039_v50  ;;  %4170 = vmatpush1.bf16.msra.mxu1 %v5053_v43 }
 0x1ff   :  { %v1168_v24 = vmax.f32 %v779_v51, %v1040_v9  ;;  %v782_v17 = vpop.f32.mrb[40].mxu0 }
 0x200   :  { %v783_v34 = vadd.f32 %v782_v17, %v4992_v22  ;;  %v784_v57 = vpop.f32.mrb[41].mxu0  ;;  %v1275_v0 = vpack.c.bf16 %v1167_v25, %v1165_v49 }
 0x201   :  { %v785_v40 = vadd.f32 %v784_v57, %v4997_v13  ;;  %v786_v11 = vpop.f32.mrb[42].mxu0  ;;  %v1276_v2 = vpack.c.bf16 %v1168_v24, %v1166_v52 }
 0x202   :  { %v1041_v21 = vmul.f32 0.2, %v783_v34  ;;  %v787_v63 = vadd.f32 %v786_v11, %v4992_v22  ;;  %v788_v62 = vpop.f32.mrb[43].mxu0 }
 0x203   :  { %v1042_v12 = vmul.f32 0.2, %v785_v40  ;;  %v789_v60 = vadd.f32 %v788_v62, %v4997_v13  ;;  %1648 = vmatprep.mubr.bf16.mxu1 %v1276_v2 }
 0x204   :  { %v1043_v28 = vmul.f32 0.2, %v787_v63  ;;  %1649 = vmatmul.mubr.bf16.gmra.mrb[36].mxu1 %v1275_v0  ;;  %v1169_v26 = vmax.f32 %v783_v34, %v1041_v21 }
 0x205   :  { %v1044_v59 = vmul.f32 0.2, %v789_v60  ;;  %v1170_v16 = vmax.f32 %v785_v40, %v1042_v12 }
 0x206   :  { %v1171_v41 = vmax.f32 %v787_v63, %v1043_v28 }
 0x207   :  { %v1172_v31 = vmax.f32 %v789_v60, %v1044_v59  ;;  %v792_v33 = vpop.f32.mrb[44].mxu0 }
 0x208   :  { %v793_v29 = vadd.f32 %v792_v33, %v4992_v22  ;;  %v794_v14 = vpop.f32.mrb[45].mxu0  ;;  %v1277_v15 = vpack.c.bf16 %v1171_v41, %v1169_v26  ;;  %v5065_v33 = vld [vmem:[#allocation7 + $0x214] ss:$8 sps:$4 sm:$0xff]  }
 0x209   :  { %v795_v32 = vadd.f32 %v794_v14, %v4997_v13  ;;  %v796_v30 = vpop.f32.mrb[46].mxu0  ;;  %v1278_v1 = vpack.c.bf16 %v1172_v31, %v1170_v16  ;;  %v5063_v31 = vld [vmem:[#allocation7 + $0x210] ss:$8 sps:$4 sm:$0xff]   ;;  %4155 = vmatprep.subr.bf16.mxu1 %v5065_v33 }
 0x20a   :  { %v1045_v42 = vmul.f32 0.2, %v793_v29  ;;  %v797_v5 = vadd.f32 %v796_v30, %v4992_v22  ;;  %v798_v45 = vpop.f32.mrb[47].mxu0  ;;  %4171 = vmatpush1.bf16.msra.mxu1 %v5063_v31 }
 0x20b   :  { %v1046_v48 = vmul.f32 0.2, %v795_v32  ;;  %v799_v4 = vadd.f32 %v798_v45, %v4997_v13  ;;  %1658 = vmatprep.mubr.bf16.mxu1 %v1278_v1 }
 0x20c   :  { %v1047_v27 = vmul.f32 0.2, %v797_v5  ;;  %1659 = vmatmul.mubr.bf16.gmra.mrb[40].mxu1 %v1277_v15  ;;  %v1173_v35 = vmax.f32 %v793_v29, %v1045_v42 }
 0x20d   :  { %v1048_v38 = vmul.f32 0.2, %v799_v4  ;;  %v1174_v19 = vmax.f32 %v795_v32, %v1046_v48 }
 0x20e   :  { %v1175_v6 = vmax.f32 %v797_v5, %v1047_v27 }
 0x20f   :  { %v1176_v47 = vmax.f32 %v799_v4, %v1048_v38  ;;  %v802_v18 = vpop.f32.mrb[48].mxu0 }
 0x210   :  { %v803_v46 = vadd.f32 %v802_v18, %v4992_v22  ;;  %v804_v61 = vpop.f32.mrb[49].mxu0  ;;  %v1279_v37 = vpack.c.bf16 %v1175_v6, %v1173_v35 }
 0x211   :  { %v805_v3 = vadd.f32 %v804_v61, %v4997_v13  ;;  %v806_v10 = vpop.f32.mrb[50].mxu0  ;;  %v1280_v7 = vpack.c.bf16 %v1176_v47, %v1174_v19 }
 0x212   :  { %v1049_v36 = vmul.f32 0.2, %v803_v46  ;;  %v807_v8 = vadd.f32 %v806_v10, %v4992_v22  ;;  %v808_v54 = vpop.f32.mrb[51].mxu0 }
 0x213   :  { %v1050_v53 = vmul.f32 0.2, %v805_v3  ;;  %v809_v51 = vadd.f32 %v808_v54, %v4997_v13  ;;  %1668 = vmatprep.mubr.bf16.mxu1 %v1280_v7 }
 0x214   :  { %v1051_v50 = vmul.f32 0.2, %v807_v8  ;;  %1669 = vmatmul.mubr.bf16.gmra.mrb[44].mxu1 %v1279_v37  ;;  %v1177_v49 = vmax.f32 %v803_v46, %v1049_v36 }
 0x215   :  { %v1052_v9 = vmul.f32 0.2, %v809_v51  ;;  %v1178_v52 = vmax.f32 %v805_v3, %v1050_v53 }
 0x216   :  { %v1179_v25 = vmax.f32 %v807_v8, %v1051_v50 }
 0x217   :  { %v1180_v24 = vmax.f32 %v809_v51, %v1052_v9  ;;  %v812_v17 = vpop.f32.mrb[52].mxu0 }
 0x218   :  { %v813_v20 = vadd.f32 %v812_v17, %v4992_v22  ;;  %v814_v23 = vpop.f32.mrb[53].mxu0  ;;  %v1281_v34 = vpack.c.bf16 %v1179_v25, %v1177_v49 }
 0x219   :  { %v815_v57 = vadd.f32 %v814_v23, %v4997_v13  ;;  %v816_v0 = vpop.f32.mrb[54].mxu0  ;;  %v1282_v40 = vpack.c.bf16 %v1180_v24, %v1178_v52  ;;  %v5077_v52 = vld [vmem:[#allocation7 + $0x220] ss:$8 sps:$4 sm:$0xff]   ;;  %v5079_v24 = vld [vmem:[#allocation7 + $0x224] ss:$8 sps:$4 sm:$0xff]  }
 0x21a   :  { %v1053_v11 = vmul.f32 0.2, %v813_v20  ;;  %v817_v2 = vadd.f32 %v816_v0, %v4992_v22  ;;  %v818_v21 = vpop.f32.mrb[55].mxu0  ;;  %4156 = vmatprep.subr.bf16.mxu1 %v5079_v24 }
 0x21b   :  { %v1054_v63 = vmul.f32 0.2, %v815_v57  ;;  %v819_v62 = vadd.f32 %v818_v21, %v4997_v13  ;;  %1678 = vmatprep.mubr.bf16.mxu1 %v1282_v40  ;;  %4172 = vmatpush1.bf16.msra.mxu1 %v5077_v52 }
 0x21c   :  { %v1055_v12 = vmul.f32 0.2, %v817_v2  ;;  %1679 = vmatmul.mubr.bf16.gmra.mrb[48].mxu1 %v1281_v34  ;;  %v1181_v28 = vmax.f32 %v813_v20, %v1053_v11 }
 0x21d   :  { %v1056_v60 = vmul.f32 0.2, %v819_v62  ;;  %v1182_v26 = vmax.f32 %v815_v57, %v1054_v63 }
 0x21e   :  { %v1183_v59 = vmax.f32 %v817_v2, %v1055_v12 }
 0x21f   :  { %v1184_v41 = vmax.f32 %v819_v62, %v1056_v60  ;;  %v822_v16 = vpop.f32.mrb[56].mxu0 }
 0x220   :  { %v823_v29 = vadd.f32 %v822_v16, %v4992_v22  ;;  %v824_v14 = vpop.f32.mrb[57].mxu0  ;;  %v1283_v15 = vpack.c.bf16 %v1183_v59, %v1181_v28 }
 0x221   :  { %v825_v32 = vadd.f32 %v824_v14, %v4997_v13  ;;  %v826_v30 = vpop.f32.mrb[58].mxu0  ;;  %v1284_v1 = vpack.c.bf16 %v1184_v41, %v1182_v26 }
 0x222   :  { %v1057_v42 = vmul.f32 0.2, %v823_v29  ;;  %v827_v5 = vadd.f32 %v826_v30, %v4992_v22  ;;  %v828_v45 = vpop.f32.mrb[59].mxu0 }
 0x223   :  { %v1058_v48 = vmul.f32 0.2, %v825_v32  ;;  %v829_v4 = vadd.f32 %v828_v45, %v4997_v13  ;;  %1688 = vmatprep.mubr.bf16.mxu1 %v1284_v1 }
 0x224   :  { %v1059_v27 = vmul.f32 0.2, %v827_v5  ;;  %1689 = vmatmul.mubr.bf16.gmra.mrb[52].mxu1 %v1283_v15  ;;  %v1185_v35 = vmax.f32 %v823_v29, %v1057_v42 }
 0x225   :  { %v1060_v38 = vmul.f32 0.2, %v829_v4  ;;  %v1186_v19 = vmax.f32 %v825_v32, %v1058_v48 }
 0x226   :  { %v1187_v6 = vmax.f32 %v827_v5, %v1059_v27 }
 0x227   :  { %v1188_v47 = vmax.f32 %v829_v4, %v1060_v38  ;;  %v832_v18 = vpop.f32.mrb[60].mxu0 }
 0x228   :  { %v833_v58 = vadd.f32 %v832_v18, %v4992_v22  ;;  %v834_v55 = vpop.f32.mrb[61].mxu0  ;;  %v1285_v46 = vpack.c.bf16 %v1187_v6, %v1185_v35  ;;  %v5091_v18 = vld [vmem:[#allocation7 + $0x230] ss:$8 sps:$4 sm:$0xff]  }
 0x229   :  { %v835_v61 = vadd.f32 %v834_v55, %v4997_v13  ;;  %v836_v37 = vpop.f32.mrb[62].mxu0  ;;  %v1286_v44 = vpack.c.bf16 %v1188_v47, %v1186_v19 }
 0x22a   :  { %v1061_v3 = vmul.f32 0.2, %v833_v58  ;;  %v837_v10 = vadd.f32 %v836_v37, %v4992_v22  ;;  %v838_v7 = vpop.f32.mrb[63].mxu0 }
 0x22b   :  { %v1062_v36 = vmul.f32 0.2, %v835_v61  ;;  %v839_v8 = vadd.f32 %v838_v7, %v4997_v13  ;;  %1698 = vmatprep.mubr.bf16.mxu1 %v1286_v44 }
 0x22c   :  { %v1063_v54 = vmul.f32 0.2, %v837_v10  ;;  %1699 = vmatmul.mubr.bf16.gmra.mrb[56].mxu1 %v1285_v46  ;;  %v1189_v51 = vmax.f32 %v833_v58, %v1061_v3  ;;  %v5093_v58 = vld [vmem:[#allocation7 + $0x234] ss:$8 sps:$4 sm:$0xff]  }
 0x22d   :  { %v1064_v53 = vmul.f32 0.2, %v839_v8  ;;  %v1190_v9 = vmax.f32 %v835_v61, %v1062_v36  ;;  %4157 = vmatprep.subr.bf16.mxu1 %v5093_v58 }
 0x22e   :  { %v1191_v50 = vmax.f32 %v837_v10, %v1063_v54  ;;  %4173 = vmatpush1.bf16.msra.mxu1 %v5091_v18 }
 0x22f   :  { %v1192_v49 = vmax.f32 %v839_v8, %v1064_v53  ;;  %v842_v25 = vpop.f32.mrb[64].mxu0 }
 0x230   :  { %v843_v17 = vadd.f32 %v842_v25, %v4992_v22  ;;  %v844_v20 = vpop.f32.mrb[65].mxu0  ;;  %v1287_v23 = vpack.c.bf16 %v1191_v50, %v1189_v51 }
 0x231   :  { %v845_v34 = vadd.f32 %v844_v20, %v4997_v13  ;;  %v846_v57 = vpop.f32.mrb[66].mxu0  ;;  %v1288_v0 = vpack.c.bf16 %v1192_v49, %v1190_v9 }
 0x232   :  { %v1065_v40 = vmul.f32 0.2, %v843_v17  ;;  %v847_v11 = vadd.f32 %v846_v57, %v4992_v22  ;;  %v848_v2 = vpop.f32.mrb[67].mxu0 }
 0x233   :  { %v1066_v21 = vmul.f32 0.2, %v845_v34  ;;  %v849_v63 = vadd.f32 %v848_v2, %v4997_v13  ;;  %1708 = vmatprep.mubr.bf16.mxu1 %v1288_v0 }
 0x234   :  { %v1067_v62 = vmul.f32 0.2, %v847_v11  ;;  %1709 = vmatmul.mubr.bf16.gmra.mrb[60].mxu1 %v1287_v23  ;;  %v1193_v60 = vmax.f32 %v843_v17, %v1065_v40 }
 0x235   :  { %v1068_v12 = vmul.f32 0.2, %v849_v63  ;;  %v1194_v59 = vmax.f32 %v845_v34, %v1066_v21 }
 0x236   :  { %v1195_v28 = vmax.f32 %v847_v11, %v1067_v62 }
 0x237   :  { %v1196_v26 = vmax.f32 %v849_v63, %v1068_v12  ;;  %v852_v41 = vpop.f32.mrb[68].mxu0 }
 0x238   :  { %v853_v16 = vadd.f32 %v852_v41, %v4992_v22  ;;  %v854_v29 = vpop.f32.mrb[69].mxu0  ;;  %v1289_v14 = vpack.c.bf16 %v1195_v28, %v1193_v60 }
 0x239   :  { %v855_v15 = vadd.f32 %v854_v29, %v4997_v13  ;;  %v856_v32 = vpop.f32.mrb[70].mxu0  ;;  %v1290_v30 = vpack.c.bf16 %v1196_v26, %v1194_v59  ;;  %v5105_v29 = vld [vmem:[#allocation7 + $0x240] ss:$8 sps:$4 sm:$0xff]  }
 0x23a   :  { %v1069_v1 = vmul.f32 0.2, %v853_v16  ;;  %v857_v42 = vadd.f32 %v856_v32, %v4992_v22  ;;  %v858_v5 = vpop.f32.mrb[71].mxu0 }
 0x23b   :  { %v1070_v45 = vmul.f32 0.2, %v855_v15  ;;  %v859_v48 = vadd.f32 %v858_v5, %v4997_v13  ;;  %1718 = vmatprep.mubr.bf16.mxu1 %v1290_v30 }
 0x23c   :  { %v1071_v4 = vmul.f32 0.2, %v857_v42  ;;  %1719 = vmatmul.mubr.bf16.gmra.mrb[64].mxu1 %v1289_v14  ;;  %v1197_v38 = vmax.f32 %v853_v16, %v1069_v1  ;;  %v5107_v14 = vld [vmem:[#allocation7 + $0x244] ss:$8 sps:$4 sm:$0xff]  }
 0x23d   :  { %v1072_v27 = vmul.f32 0.2, %v859_v48  ;;  %v1198_v6 = vmax.f32 %v855_v15, %v1070_v45  ;;  %4158 = vmatprep.subr.bf16.mxu1 %v5107_v14 }
 0x23e   :  { %v1199_v35 = vmax.f32 %v857_v42, %v1071_v4  ;;  %4174 = vmatpush1.bf16.msra.mxu1 %v5105_v29 }
 0x23f   :  { %v1200_v19 = vmax.f32 %v859_v48, %v1072_v27  ;;  %v862_v47 = vpop.f32.mrb[72].mxu0 }
 0x240   :  { %v863_v55 = vadd.f32 %v862_v47, %v4992_v22  ;;  %v864_v46 = vpop.f32.mrb[73].mxu0  ;;  %v1291_v61 = vpack.c.bf16 %v1199_v35, %v1197_v38 }
 0x241   :  { %v865_v37 = vadd.f32 %v864_v46, %v4997_v13  ;;  %v866_v44 = vpop.f32.mrb[74].mxu0  ;;  %v1292_v3 = vpack.c.bf16 %v1200_v19, %v1198_v6 }
 0x242   :  { %v1073_v10 = vmul.f32 0.2, %v863_v55  ;;  %v867_v7 = vadd.f32 %v866_v44, %v4992_v22  ;;  %v868_v36 = vpop.f32.mrb[75].mxu0 }
 0x243   :  { %v1074_v8 = vmul.f32 0.2, %v865_v37  ;;  %v869_v54 = vadd.f32 %v868_v36, %v4997_v13  ;;  %1728 = vmatprep.mubr.bf16.mxu1 %v1292_v3 }
 0x244   :  { %v1075_v53 = vmul.f32 0.2, %v867_v7  ;;  %1729 = vmatmul.mubr.bf16.gmra.mrb[68].mxu1 %v1291_v61  ;;  %v1201_v50 = vmax.f32 %v863_v55, %v1073_v10 }
 0x245   :  { %v1076_v51 = vmul.f32 0.2, %v869_v54  ;;  %v1202_v49 = vmax.f32 %v865_v37, %v1074_v8 }
 0x246   :  { %v1203_v9 = vmax.f32 %v867_v7, %v1075_v53 }
 0x247   :  { %v1204_v25 = vmax.f32 %v869_v54, %v1076_v51  ;;  %v872_v17 = vpop.f32.mrb[76].mxu0 }
 0x248   :  { %v873_v20 = vadd.f32 %v872_v17, %v4992_v22  ;;  %v874_v23 = vpop.f32.mrb[77].mxu0  ;;  %v1293_v34 = vpack.c.bf16 %v1203_v9, %v1201_v50 }
 0x249   :  { %v875_v57 = vadd.f32 %v874_v23, %v4997_v13  ;;  %v876_v0 = vpop.f32.mrb[78].mxu0  ;;  %v1294_v40 = vpack.c.bf16 %v1204_v25, %v1202_v49 }
 0x24a   :  { %v1077_v11 = vmul.f32 0.2, %v873_v20  ;;  %v877_v2 = vadd.f32 %v876_v0, %v4992_v22  ;;  %v878_v21 = vpop.f32.mrb[79].mxu0  ;;  %v5121_v0 = vld [vmem:[#allocation7 + $0x254] ss:$8 sps:$4 sm:$0xff]  }
 0x24b   :  { %v1078_v63 = vmul.f32 0.2, %v875_v57  ;;  %v879_v62 = vadd.f32 %v878_v21, %v4997_v13  ;;  %1738 = vmatprep.mubr.bf16.mxu1 %v1294_v40  ;;  %4159 = vmatprep.subr.bf16.mxu1 %v5121_v0 }
 0x24c   :  { %v1079_v12 = vmul.f32 0.2, %v877_v2  ;;  %1739 = vmatmul.mubr.bf16.gmra.mrb[72].mxu1 %v1293_v34  ;;  %v1205_v28 = vmax.f32 %v873_v20, %v1077_v11 }
 0x24d   :  { %v1080_v60 = vmul.f32 0.2, %v879_v62  ;;  %v1206_v26 = vmax.f32 %v875_v57, %v1078_v63  ;;  %v5119_v57 = vld [vmem:[#allocation7 + $0x250] ss:$8 sps:$4 sm:$0xff]  }
 0x24e   :  { %v1207_v59 = vmax.f32 %v877_v2, %v1079_v12  ;;  %4175 = vmatpush1.bf16.msra.mxu1 %v5119_v57 }
 0x24f   :  { %v1208_v41 = vmax.f32 %v879_v62, %v1080_v60  ;;  %v882_v16 = vpop.f32.mrb[80].mxu0 }
 0x250   :  { %v883_v15 = vadd.f32 %v882_v16, %v4992_v22  ;;  %v884_v32 = vpop.f32.mrb[81].mxu0  ;;  %v1295_v30 = vpack.c.bf16 %v1207_v59, %v1205_v28 }
 0x251   :  { %v885_v1 = vadd.f32 %v884_v32, %v4997_v13  ;;  %v886_v42 = vpop.f32.mrb[82].mxu0  ;;  %v1296_v5 = vpack.c.bf16 %v1208_v41, %v1206_v26 }
 0x252   :  { %v1081_v45 = vmul.f32 0.2, %v883_v15  ;;  %v887_v48 = vadd.f32 %v886_v42, %v4992_v22  ;;  %v888_v4 = vpop.f32.mrb[83].mxu0 }
 0x253   :  { %v1082_v27 = vmul.f32 0.2, %v885_v1  ;;  %v889_v38 = vadd.f32 %v888_v4, %v4997_v13  ;;  %1748 = vmatprep.mubr.bf16.mxu1 %v1296_v5 }
 0x254   :  { %v1083_v35 = vmul.f32 0.2, %v887_v48  ;;  %1749 = vmatmul.mubr.bf16.gmra.mrb[76].mxu1 %v1295_v30  ;;  %v1209_v19 = vmax.f32 %v883_v15, %v1081_v45 }
 0x255   :  { %v1084_v6 = vmul.f32 0.2, %v889_v38  ;;  %v1210_v55 = vmax.f32 %v885_v1, %v1082_v27 }
 0x256   :  { %v1211_v47 = vmax.f32 %v887_v48, %v1083_v35 }
 0x257   :  { %v1212_v46 = vmax.f32 %v889_v38, %v1084_v6  ;;  %v892_v61 = vpop.f32.mrb[84].mxu0 }
 0x258   :  { %v893_v37 = vadd.f32 %v892_v61, %v4992_v22  ;;  %v894_v44 = vpop.f32.mrb[85].mxu0  ;;  %v1297_v3 = vpack.c.bf16 %v1211_v47, %v1209_v19 }
 0x259   :  { %v895_v10 = vadd.f32 %v894_v44, %v4997_v13  ;;  %v896_v7 = vpop.f32.mrb[86].mxu0  ;;  %v1298_v36 = vpack.c.bf16 %v1212_v46, %v1210_v55 }
 0x25a   :  { %v1085_v8 = vmul.f32 0.2, %v893_v37  ;;  %v897_v54 = vadd.f32 %v896_v7, %v4992_v22  ;;  %v898_v53 = vpop.f32.mrb[87].mxu0 }
 0x25b   :  { %v1086_v51 = vmul.f32 0.2, %v895_v10  ;;  %v899_v50 = vadd.f32 %v898_v53, %v4997_v13  ;;  %1758 = vmatprep.mubr.bf16.mxu1 %v1298_v36  ;;  %v5133_v36 = vld [vmem:[#allocation7 + $0x260] ss:$8 sps:$4 sm:$0xff]  }
 0x25c   :  { %v1087_v9 = vmul.f32 0.2, %v897_v54  ;;  %1759 = vmatmul.mubr.bf16.gmra.mrb[80].mxu1 %v1297_v3  ;;  %v1213_v25 = vmax.f32 %v893_v37, %v1085_v8  ;;  %v5135_v8 = vld [vmem:[#allocation7 + $0x264] ss:$8 sps:$4 sm:$0xff]  }
 0x25d   :  { %v1088_v49 = vmul.f32 0.2, %v899_v50  ;;  %v1214_v20 = vmax.f32 %v895_v10, %v1086_v51  ;;  %4160 = vmatprep.subr.bf16.mxu1 %v5135_v8 }
 0x25e   :  { %v1215_v17 = vmax.f32 %v897_v54, %v1087_v9  ;;  %4176 = vmatpush1.bf16.msra.mxu1 %v5133_v36 }
 0x25f   :  { %v1216_v23 = vmax.f32 %v899_v50, %v1088_v49  ;;  %v902_v34 = vpop.f32.mrb[88].mxu0 }
 0x260   :  { %v903_v40 = vadd.f32 %v902_v34, %v4992_v22  ;;  %v904_v11 = vpop.f32.mrb[89].mxu0  ;;  %v1299_v2 = vpack.c.bf16 %v1215_v17, %v1213_v25 }
 0x261   :  { %v905_v21 = vadd.f32 %v904_v11, %v4997_v13  ;;  %v906_v63 = vpop.f32.mrb[90].mxu0  ;;  %v1300_v62 = vpack.c.bf16 %v1216_v23, %v1214_v20 }
 0x262   :  { %v1089_v12 = vmul.f32 0.2, %v903_v40  ;;  %v907_v60 = vadd.f32 %v906_v63, %v4992_v22  ;;  %v908_v28 = vpop.f32.mrb[91].mxu0 }
 0x263   :  { %v1090_v59 = vmul.f32 0.2, %v905_v21  ;;  %v909_v26 = vadd.f32 %v908_v28, %v4997_v13  ;;  %1768 = vmatprep.mubr.bf16.mxu1 %v1300_v62 }
 0x264   :  { %v1091_v41 = vmul.f32 0.2, %v907_v60  ;;  %1769 = vmatmul.mubr.bf16.gmra.mrb[84].mxu1 %v1299_v2  ;;  %v1217_v15 = vmax.f32 %v903_v40, %v1089_v12 }
 0x265   :  { %v1092_v16 = vmul.f32 0.2, %v909_v26  ;;  %v1218_v30 = vmax.f32 %v905_v21, %v1090_v59 }
 0x266   :  { %v1219_v32 = vmax.f32 %v907_v60, %v1091_v41 }
 0x267   :  { %v1220_v1 = vmax.f32 %v909_v26, %v1092_v16  ;;  %v912_v42 = vpop.f32.mrb[92].mxu0 }
 0x268   :  { %v913_v5 = vadd.f32 %v912_v42, %v4992_v22  ;;  %v914_v45 = vpop.f32.mrb[93].mxu0  ;;  %v1301_v48 = vpack.c.bf16 %v1219_v32, %v1217_v15 }
 0x269   :  { %v915_v4 = vadd.f32 %v914_v45, %v4997_v13  ;;  %v916_v27 = vpop.f32.mrb[94].mxu0  ;;  %v1302_v38 = vpack.c.bf16 %v1220_v1, %v1218_v30 }
 0x26a   :  { %v1093_v35 = vmul.f32 0.2, %v913_v5  ;;  %v917_v6 = vadd.f32 %v916_v27, %v4992_v22  ;;  %v918_v19 = vpop.f32.mrb[95].mxu0 }
 0x26b   :  { %v1094_v47 = vmul.f32 0.2, %v915_v4  ;;  %v919_v55 = vadd.f32 %v918_v19, %v4997_v13  ;;  %1778 = vmatprep.mubr.bf16.mxu1 %v1302_v38  ;;  %v5149_v19 = vld [vmem:[#allocation7 + $0x274] ss:$8 sps:$4 sm:$0xff]  }
 0x26c   :  { %v1095_v46 = vmul.f32 0.2, %v917_v6  ;;  %1779 = vmatmul.mubr.bf16.gmra.mrb[88].mxu1 %v1301_v48  ;;  %v1221_v37 = vmax.f32 %v913_v5, %v1093_v35  ;;  %4161 = vmatprep.subr.bf16.mxu1 %v5149_v19 }
 0x26d   :  { %v1096_v61 = vmul.f32 0.2, %v919_v55  ;;  %v1222_v3 = vmax.f32 %v915_v4, %v1094_v47 }
 0x26e   :  { %v1223_v44 = vmax.f32 %v917_v6, %v1095_v46  ;;  %v5147_v6 = vld [vmem:[#allocation7 + $0x270] ss:$8 sps:$4 sm:$0xff]  }
 0x26f   :  { %v1224_v10 = vmax.f32 %v919_v55, %v1096_v61  ;;  %v922_v7 = vpop.f32.mrb[96].mxu0  ;;  %4177 = vmatpush1.bf16.msra.mxu1 %v5147_v6 }
 0x270   :  { %v923_v54 = vadd.f32 %v922_v7, %v4992_v22  ;;  %v924_v53 = vpop.f32.mrb[97].mxu0  ;;  %v1303_v51 = vpack.c.bf16 %v1223_v44, %v1221_v37 }
 0x271   :  { %v925_v50 = vadd.f32 %v924_v53, %v4997_v13  ;;  %v926_v9 = vpop.f32.mrb[98].mxu0  ;;  %v1304_v49 = vpack.c.bf16 %v1224_v10, %v1222_v3 }
 0x272   :  { %v1097_v25 = vmul.f32 0.2, %v923_v54  ;;  %v927_v17 = vadd.f32 %v926_v9, %v4992_v22  ;;  %v928_v20 = vpop.f32.mrb[99].mxu0 }
 0x273   :  { %v1098_v23 = vmul.f32 0.2, %v925_v50  ;;  %v929_v34 = vadd.f32 %v928_v20, %v4997_v13  ;;  %1788 = vmatprep.mubr.bf16.mxu1 %v1304_v49 }
 0x274   :  { %v1099_v40 = vmul.f32 0.2, %v927_v17  ;;  %1789 = vmatmul.mubr.bf16.gmra.mrb[92].mxu1 %v1303_v51  ;;  %v1225_v2 = vmax.f32 %v923_v54, %v1097_v25 }
 0x275   :  { %v1100_v11 = vmul.f32 0.2, %v929_v34  ;;  %v1226_v63 = vmax.f32 %v925_v50, %v1098_v23 }
 0x276   :  { %v1227_v21 = vmax.f32 %v927_v17, %v1099_v40 }
 0x277   :  { %v1228_v62 = vmax.f32 %v929_v34, %v1100_v11  ;;  %v932_v12 = vpop.f32.mrb[100].mxu0 }
 0x278   :  { %v933_v60 = vadd.f32 %v932_v12, %v4992_v22  ;;  %v934_v28 = vpop.f32.mrb[101].mxu0  ;;  %v1305_v59 = vpack.c.bf16 %v1227_v21, %v1225_v2 }
 0x279   :  { %v935_v26 = vadd.f32 %v934_v28, %v4997_v13  ;;  %v936_v41 = vpop.f32.mrb[102].mxu0  ;;  %v1306_v16 = vpack.c.bf16 %v1228_v62, %v1226_v63  ;;  %v4055_v63 = vld [vmem:[%s5654_s3 + $0x1] ss:$4 sm:$0x3] }
 0x27a   :  { %v1101_v15 = vmul.f32 0.2, %v933_v60  ;;  %v937_v32 = vadd.f32 %v936_v41, %v4992_v22  ;;  %v938_v30 = vpop.f32.mrb[103].mxu0  ;;  %v5165_v41 = vrot.slane %v4055_v63, %v4984_v56 }
 0x27b   :  { %v1102_v1 = vmul.f32 0.2, %v935_v26  ;;  %v939_v42 = vadd.f32 %v938_v30, %v4997_v13  ;;  %1798 = vmatprep.mubr.bf16.mxu1 %v1306_v16 }
 0x27c   :  { %v1103_v5 = vmul.f32 0.2, %v937_v32  ;;  %1799 = vmatmul.mubr.bf16.gmra.mrb[96].mxu1 %v1305_v59  ;;  %v1229_v48 = vmax.f32 %v933_v60, %v1101_v15  ;;  %v5168_v15 = vrot.slane %v4055_v63, %v4989_v39 }
 0x27d   :  { %v1104_v45 = vmul.f32 0.2, %v939_v42  ;;  %v1230_v27 = vmax.f32 %v935_v26, %v1102_v1 }
 0x27e   :  { %v1231_v4 = vmax.f32 %v937_v32, %v1103_v5 }
 0x27f   :  { %v1232_v38 = vmax.f32 %v939_v42, %v1104_v45  ;;  %v942_v35 = vpop.f32.mrb[104].mxu0 }
 0x280   :  { %v943_v47 = vadd.f32 %v942_v35, %v4992_v22  ;;  %v944_v55 = vpop.f32.mrb[105].mxu0  ;;  %v1307_v46 = vpack.c.bf16 %v1231_v4, %v1229_v48  ;;  %v5170_v48 = vld [vmem:[#allocation7 + $0x280] ss:$8 sps:$4 sm:$0xff]   ;;  %v5172_v4 = vld [vmem:[#allocation7 + $0x284] ss:$8 sps:$4 sm:$0xff]  }
 0x281   :  { %v945_v61 = vadd.f32 %v944_v55, %v4997_v13  ;;  %v946_v37 = vpop.f32.mrb[106].mxu0  ;;  %v1308_v44 = vpack.c.bf16 %v1232_v38, %v1230_v27  ;;  %4162 = vmatprep.subr.bf16.mxu1 %v5172_v4 }
 0x282   :  { %v1105_v3 = vmul.f32 0.2, %v943_v47  ;;  %v947_v10 = vadd.f32 %v946_v37, %v4992_v22  ;;  %v948_v7 = vpop.f32.mrb[107].mxu0  ;;  %4178 = vmatpush1.bf16.msra.mxu1 %v5170_v48 }
 0x283   :  { %v1106_v54 = vmul.f32 0.2, %v945_v61  ;;  %v949_v53 = vadd.f32 %v948_v7, %v4997_v13  ;;  %1808 = vmatprep.mubr.bf16.mxu1 %v1308_v44 }
 0x284   :  { %v1107_v51 = vmul.f32 0.2, %v947_v10  ;;  %1809 = vmatmul.mubr.bf16.gmra.mrb[100].mxu1 %v1307_v46  ;;  %v1233_v9 = vmax.f32 %v943_v47, %v1105_v3 }
 0x285   :  { %v1108_v50 = vmul.f32 0.2, %v949_v53  ;;  %v1234_v25 = vmax.f32 %v945_v61, %v1106_v54 }
 0x286   :  { %v1235_v49 = vmax.f32 %v947_v10, %v1107_v51 }
 0x287   :  { %v1236_v17 = vmax.f32 %v949_v53, %v1108_v50  ;;  %v952_v20 = vpop.f32.mrb[108].mxu0 }
 0x288   :  { %v953_v23 = vadd.f32 %v952_v20, %v4992_v22  ;;  %v954_v34 = vpop.f32.mrb[109].mxu0  ;;  %v1309_v40 = vpack.c.bf16 %v1235_v49, %v1233_v9 }
 0x289   :  { %v955_v11 = vadd.f32 %v954_v34, %v4997_v13  ;;  %v956_v2 = vpop.f32.mrb[110].mxu0  ;;  %v1310_v21 = vpack.c.bf16 %v1236_v17, %v1234_v25 }
 0x28a   :  { %v1109_v62 = vmul.f32 0.2, %v953_v23  ;;  %v957_v12 = vadd.f32 %v956_v2, %v4992_v22  ;;  %v958_v60 = vpop.f32.mrb[111].mxu0 }
 0x28b   :  { %v1110_v28 = vmul.f32 0.2, %v955_v11  ;;  %v959_v59 = vadd.f32 %v958_v60, %v4997_v13  ;;  %1818 = vmatprep.mubr.bf16.mxu1 %v1310_v21 }
 0x28c   :  { %v1111_v26 = vmul.f32 0.2, %v957_v12  ;;  %1819 = vmatmul.mubr.bf16.gmra.mrb[104].mxu1 %v1309_v40  ;;  %v1237_v32 = vmax.f32 %v953_v23, %v1109_v62 }
 0x28d   :  { %v1112_v16 = vmul.f32 0.2, %v959_v59  ;;  %v1238_v1 = vmax.f32 %v955_v11, %v1110_v28 }
 0x28e   :  { %v1239_v30 = vmax.f32 %v957_v12, %v1111_v26 }
 0x28f   :  { %v1240_v42 = vmax.f32 %v959_v59, %v1112_v16  ;;  %v962_v5 = vpop.f32.mrb[112].mxu0  ;;  %v1560_v45 = vpop.f32.mrb[0].mxu1 }
 0x290   :  { %v963_v27 = vadd.f32 %v962_v5, %v4992_v22  ;;  %v1561_v38 = vadd.f32 %v1560_v45, %v5165_v41  ;;  %v964_v35 = vpop.f32.mrb[113].mxu0  ;;  %v1562_v47 = vpop.f32.mrb[1].mxu1  ;;  %v1311_v55 = vpack.c.bf16 %v1239_v30, %v1237_v32 }
 0x291   :  { %v965_v46 = vadd.f32 %v964_v35, %v4997_v13  ;;  %v1563_v61 = vadd.f32 %v1562_v47, %v5168_v15  ;;  %v966_v37 = vpop.f32.mrb[114].mxu0  ;;  %v1564_v44 = vpop.f32.mrb[2].mxu1  ;;  %v1312_v3 = vpack.c.bf16 %v1240_v42, %v1238_v1 }
 0x292   :  { %v1113_v10 = vmul.f32 0.2, %v963_v27  ;;  %v1879_v7 = vmul.f32 0.2, %v1561_v38  ;;  %v967_v54 = vadd.f32 %v966_v37, %v4992_v22  ;;  %v1565_v53 = vadd.f32 %v1564_v44, %v5165_v41  ;;  %v968_v51 = vpop.f32.mrb[115].mxu0  ;;  %v1566_v50 = vpop.f32.mrb[3].mxu1 }
 0x293   :  { %v1114_v9 = vmul.f32 0.2, %v965_v46  ;;  %v1880_v49 = vmul.f32 0.2, %v1563_v61  ;;  %v969_v25 = vadd.f32 %v968_v51, %v4997_v13  ;;  %v1567_v17 = vadd.f32 %v1566_v50, %v5168_v15  ;;  %1828 = vmatprep.mubr.bf16.mxu1 %v1312_v3 }
 0x294   :  { %v1115_v20 = vmul.f32 0.2, %v967_v54  ;;  %v1881_v23 = vmul.f32 0.2, %v1565_v53  ;;  %1829 = vmatmul.mubr.bf16.gmra.mrb[108].mxu1 %v1311_v55  ;;  %v1241_v11 = vmax.f32 %v963_v27, %v1113_v10  ;;  %v2007_v2 = vmax.f32 %v1561_v38, %v1879_v7 }
 0x295   :  { %v1116_v34 = vmul.f32 0.2, %v969_v25  ;;  %v1882_v40 = vmul.f32 0.2, %v1567_v17  ;;  %v1242_v62 = vmax.f32 %v965_v46, %v1114_v9  ;;  %v2008_v12 = vmax.f32 %v1563_v61, %v1880_v49 }
 0x296   :  { %v1243_v21 = vmax.f32 %v967_v54, %v1115_v20  ;;  %v2009_v63 = vmax.f32 %v1565_v53, %v1881_v23 }
 0x297   :  { %v1244_v60 = vmax.f32 %v969_v25, %v1116_v34  ;;  %v2010_v28 = vmax.f32 %v1567_v17, %v1882_v40  ;;  %v972_v59 = vpop.f32.mrb[116].mxu0  ;;  %v1570_v26 = vpop.f32.mrb[4].mxu1 }
 0x298   :  { %v2135_v16 = vpack.c.bf16 %v2009_v63, %v2007_v2  ;;  %v973_v32 = vadd.f32 %v972_v59, %v4992_v22  ;;  %v1571_v30 = vadd.f32 %v1570_v26, %v5165_v41  ;;  %v974_v1 = vpop.f32.mrb[117].mxu0  ;;  %v1572_v42 = vpop.f32.mrb[5].mxu1  ;;  %v1313_v5 = vpack.c.bf16 %v1243_v21, %v1241_v11 }
 0x299   :  { %v975_v45 = vadd.f32 %v974_v1, %v4997_v13  ;;  %v1573_v27 = vadd.f32 %v1572_v42, %v5168_v15  ;;  %v976_v38 = vpop.f32.mrb[118].mxu0  ;;  %v1574_v35 = vpop.f32.mrb[6].mxu1  ;;  %v1314_v47 = vpack.c.bf16 %v1244_v60, %v1242_v62  ;;  %v2136_v55 = vpack.c.bf16 %v2010_v28, %v2008_v12  ;;  %v5194_v12 = vld [vmem:[#allocation7 + $0x290] ss:$8 sps:$4 sm:$0xff]   ;;  %v5196_v60 = vld [vmem:[#allocation7 + $0x294] ss:$8 sps:$4 sm:$0xff]  }
 0x29a   :  { %v1117_v46 = vmul.f32 0.2, %v973_v32  ;;  %v1883_v61 = vmul.f32 0.2, %v1571_v30  ;;  %v977_v37 = vadd.f32 %v976_v38, %v4992_v22  ;;  %v1575_v44 = vadd.f32 %v1574_v35, %v5165_v41  ;;  %v978_v3 = vpop.f32.mrb[119].mxu0  ;;  %v1576_v10 = vpop.f32.mrb[7].mxu1  ;;  %4163 = vmatprep.subr.bf16.mxu1 %v5196_v60 }
 0x29b   :  { %v1118_v7 = vmul.f32 0.2, %v975_v45  ;;  %v1884_v54 = vmul.f32 0.2, %v1573_v27  ;;  %v979_v53 = vadd.f32 %v978_v3, %v4997_v13  ;;  %v1577_v51 = vadd.f32 %v1576_v10, %v5168_v15  ;;  %1838 = vmatprep.mubr.bf16.mxu1 %v1314_v47  ;;  %2437 = vmatprep.mubr.bf16.mxu0 %v2136_v55 }
 0x29c   :  { %v1119_v50 = vmul.f32 0.2, %v977_v37  ;;  %v1885_v9 = vmul.f32 0.2, %v1575_v44  ;;  %1839 = vmatmul.mubr.bf16.gmra.mrb[112].mxu1 %v1313_v5  ;;  %2438 = vmatmul.mubr.bf16.vlgmr.msra.gmra.mrb[128].mxu0 %v2135_v16  ;;  %v1245_v17 = vmax.f32 %v973_v32, %v1117_v46  ;;  %v2011_v20 = vmax.f32 %v1571_v30, %v1883_v61 }
 0x29d   :  { %v1120_v49 = vmul.f32 0.2, %v979_v53  ;;  %v1886_v25 = vmul.f32 0.2, %v1577_v51  ;;  %3285 = vmatpush1.bf16.msra.mxu0 %v5053_v43  ;;  %v1246_v40 = vmax.f32 %v975_v45, %v1118_v7  ;;  %v2012_v11 = vmax.f32 %v1573_v27, %v1884_v54  ;;  %4179 = vmatpush1.bf16.msra.mxu1 %v5194_v12 }
 0x29e   :  { %v1247_v23 = vmax.f32 %v977_v37, %v1119_v50  ;;  %v2013_v34 = vmax.f32 %v1575_v44, %v1885_v9  ;;  %3286 = vmatprep.subr.bf16.mxu0 %v5065_v33 }
 0x29f   :  { %v1248_v2 = vmax.f32 %v979_v53, %v1120_v49  ;;  %v2014_v21 = vmax.f32 %v1577_v51, %v1886_v25  ;;  %v982_v63 = vpop.f32.mrb[120].mxu0  ;;  %v1580_v62 = vpop.f32.mrb[8].mxu1 }
 0x2a0   :  { %v983_v28 = vadd.f32 %v982_v63, %v4992_v22  ;;  %v1581_v43 = vadd.f32 %v1580_v62, %v5165_v41  ;;  %v984_v59 = vpop.f32.mrb[121].mxu0  ;;  %v1582_v26 = vpop.f32.mrb[9].mxu1  ;;  %v1315_v16 = vpack.c.bf16 %v1247_v23, %v1245_v17  ;;  %v2137_v32 = vpack.c.bf16 %v2013_v34, %v2011_v20 }
 0x2a1   :  { %v985_v33 = vadd.f32 %v984_v59, %v4997_v13  ;;  %v1583_v30 = vadd.f32 %v1582_v26, %v5168_v15  ;;  %v986_v1 = vpop.f32.mrb[122].mxu0  ;;  %v1584_v42 = vpop.f32.mrb[10].mxu1  ;;  %v1316_v5 = vpack.c.bf16 %v1248_v2, %v1246_v40  ;;  %v2138_v45 = vpack.c.bf16 %v2014_v21, %v2012_v11  ;;  %3287 = vmatpush1.bf16.msra.mxu0 %v5063_v31 }
 0x2a2   :  { %v1121_v27 = vmul.f32 0.2, %v983_v28  ;;  %v1887_v38 = vmul.f32 0.2, %v1581_v43  ;;  %v987_v35 = vadd.f32 %v986_v1, %v4992_v22  ;;  %v1585_v47 = vadd.f32 %v1584_v42, %v5165_v41  ;;  %v988_v55 = vpop.f32.mrb[123].mxu0  ;;  %v1586_v46 = vpop.f32.mrb[11].mxu1  ;;  %3288 = vmatprep.subr.bf16.mxu0 %v5079_v24 }
 0x2a3   :  { %v1122_v61 = vmul.f32 0.2, %v985_v33  ;;  %v1888_v37 = vmul.f32 0.2, %v1583_v30  ;;  %v989_v44 = vadd.f32 %v988_v55, %v4997_v13  ;;  %v1587_v3 = vadd.f32 %v1586_v46, %v5168_v15  ;;  %1848 = vmatprep.mubr.bf16.mxu1 %v1316_v5  ;;  %2447 = vmatprep.mubr.bf16.mxu0 %v2138_v45 }
 0x2a4   :  { %v1123_v10 = vmul.f32 0.2, %v987_v35  ;;  %v1889_v7 = vmul.f32 0.2, %v1585_v47  ;;  %1849 = vmatmul.mubr.bf16.gmra.mrb[116].mxu1 %v1315_v16  ;;  %2448 = vmatmul.mubr.bf16.gmra.mrb[132].mxu0 %v2137_v32  ;;  %v1249_v51 = vmax.f32 %v983_v28, %v1121_v27  ;;  %v2015_v50 = vmax.f32 %v1581_v43, %v1887_v38 }
 0x2a5   :  { %v1124_v54 = vmul.f32 0.2, %v989_v44  ;;  %v1890_v53 = vmul.f32 0.2, %v1587_v3  ;;  %3289 = vmatpush1.bf16.msra.mxu0 %v5077_v52  ;;  %v1250_v49 = vmax.f32 %v985_v33, %v1122_v61  ;;  %v2016_v25 = vmax.f32 %v1583_v30, %v1888_v37 }
 0x2a6   :  { %v1251_v9 = vmax.f32 %v987_v35, %v1123_v10  ;;  %v2017_v31 = vmax.f32 %v1585_v47, %v1889_v7  ;;  %3290 = vmatprep.subr.bf16.mxu0 %v5093_v58  ;;  %v5223_v7 = vld [vmem:[#allocation7 + $0x2a0] ss:$8 sps:$4 sm:$0xff]  }
 0x2a7   :  { %v1252_v17 = vmax.f32 %v989_v44, %v1124_v54  ;;  %v2018_v20 = vmax.f32 %v1587_v3, %v1890_v53  ;;  %v992_v23 = vpop.f32.mrb[124].mxu0  ;;  %v1590_v34 = vpop.f32.mrb[12].mxu1  ;;  %v5225_v54 = vld [vmem:[#allocation7 + $0x2a4] ss:$8 sps:$4 sm:$0xff]  }
 0x2a8   :  { %v993_v40 = vadd.f32 %v992_v23, %v4992_v22  ;;  %v1591_v11 = vadd.f32 %v1590_v34, %v5165_v41  ;;  %v994_v2 = vpop.f32.mrb[125].mxu0  ;;  %v1592_v24 = vpop.f32.mrb[13].mxu1  ;;  %v1317_v21 = vpack.c.bf16 %v1251_v9, %v1249_v51  ;;  %v2139_v63 = vpack.c.bf16 %v2017_v31, %v2015_v50  ;;  %4164 = vmatprep.subr.bf16.mxu1 %v5225_v54 }
 0x2a9   :  { %v995_v62 = vadd.f32 %v994_v2, %v4997_v13  ;;  %v1593_v52 = vadd.f32 %v1592_v24, %v5168_v15  ;;  %v996_v28 = vpop.f32.mrb[126].mxu0  ;;  %v1594_v43 = vpop.f32.mrb[14].mxu1  ;;  %v1318_v59 = vpack.c.bf16 %v1252_v17, %v1250_v49  ;;  %v2140_v26 = vpack.c.bf16 %v2018_v20, %v2016_v25  ;;  %3291 = vmatpush1.bf16.msra.mxu0 %v5091_v18 }
 0x2aa   :  { %v1125_v16 = vmul.f32 0.2, %v993_v40  ;;  %v1891_v32 = vmul.f32 0.2, %v1591_v11  ;;  %v997_v58 = vadd.f32 %v996_v28, %v4992_v22  ;;  %v1595_v33 = vadd.f32 %v1594_v43, %v5165_v41  ;;  %v998_v30 = vpop.f32.mrb[127].mxu0  ;;  %v1596_v1 = vpop.f32.mrb[15].mxu1  ;;  %3292 = vmatprep.subr.bf16.mxu0 %v5107_v14  ;;  %4180 = vmatpush1.bf16.msra.mxu1 %v5223_v7 }
 0x2ab   :  { %v1126_v42 = vmul.f32 0.2, %v995_v62  ;;  %v1892_v5 = vmul.f32 0.2, %v1593_v52  ;;  %v999_v45 = vadd.f32 %v998_v30, %v4997_v13  ;;  %v1597_v27 = vadd.f32 %v1596_v1, %v5168_v15  ;;  %1858 = vmatprep.mubr.bf16.mxu1 %v1318_v59  ;;  %2457 = vmatprep.mubr.bf16.mxu0 %v2140_v26 }
 0x2ac   :  { %v1127_v38 = vmul.f32 0.2, %v997_v58  ;;  %v1893_v35 = vmul.f32 0.2, %v1595_v33  ;;  %1859 = vmatmul.mubr.bf16.gmra.mrb[120].mxu1 %v1317_v21  ;;  %2458 = vmatmul.mubr.bf16.gmra.mrb[136].mxu0 %v2139_v63  ;;  %v1253_v55 = vmax.f32 %v993_v40, %v1125_v16  ;;  %v2019_v46 = vmax.f32 %v1591_v11, %v1891_v32 }
 0x2ad   :  { %v1128_v47 = vmul.f32 0.2, %v999_v45  ;;  %v1894_v22 = vmul.f32 0.2, %v1597_v27  ;;  %3293 = vmatpush1.bf16.msra.mxu0 %v5105_v29  ;;  %v1254_v37 = vmax.f32 %v995_v62, %v1126_v42  ;;  %v2020_v13 = vmax.f32 %v1593_v52, %v1892_v5 }
 0x2ae   :  { %v1255_v61 = vmax.f32 %v997_v58, %v1127_v38  ;;  %v2021_v18 = vmax.f32 %v1595_v33, %v1893_v35  ;;  %3294 = vmatprep.subr.bf16.mxu0 %v5121_v0 }
 0x2af   :  { %v1256_v44 = vmax.f32 %v999_v45, %v1128_v47  ;;  %v2022_v3 = vmax.f32 %v1597_v27, %v1894_v22  ;;  %v1600_v10 = vpop.f32.mrb[16].mxu1  ;;  %v4348_v45 = vld [vmem:[#allocation7 + $0x2b0] ss:$8 sps:$4 sm:$0xff]   ;;  %v4350_v27 = vld [vmem:[#allocation7 + $0x2b4] ss:$8 sps:$4 sm:$0xff]  }
 0x2b0   :  { %v1601_v53 = vadd.f32 %v1600_v10, %v5165_v41  ;;  %v1602_v14 = vpop.f32.mrb[17].mxu1  ;;  %v1319_v51 = vpack.c.bf16 %v1255_v61, %v1253_v55  ;;  %v2141_v50 = vpack.c.bf16 %v2021_v18, %v2019_v46  ;;  %4165 = vmatprep.subr.bf16.mxu1 %v4350_v27 }
 0x2b1   :  { %v1603_v9 = vadd.f32 %v1602_v14, %v5168_v15  ;;  %v1604_v31 = vpop.f32.mrb[18].mxu1  ;;  %v1320_v29 = vpack.c.bf16 %v1256_v44, %v1254_v37  ;;  %v2142_v49 = vpack.c.bf16 %v2022_v3, %v2020_v13  ;;  %3295 = vmatpush1.bf16.msra.mxu0 %v5119_v57  ;;  %4181 = vmatpush1.bf16.msra.mxu1 %v4348_v45 }
 0x2b2   :  { %v1895_v25 = vmul.f32 0.2, %v1601_v53  ;;  %v1605_v17 = vadd.f32 %v1604_v31, %v5165_v41  ;;  %v1606_v20 = vpop.f32.mrb[19].mxu1  ;;  %3296 = vmatprep.subr.bf16.mxu0 %v5135_v8 }
 0x2b3   :  { %v1896_v0 = vmul.f32 0.2, %v1603_v9  ;;  %v1607_v23 = vadd.f32 %v1606_v20, %v5168_v15  ;;  %1868 = vmatprep.mubr.bf16.mxu1 %v1320_v29  ;;  %2467 = vmatprep.mubr.bf16.mxu0 %v2142_v49 }
 0x2b4   :  { %v1897_v34 = vmul.f32 0.2, %v1605_v17  ;;  %1869 = vmatmul.mubr.bf16.gmra.mrb[124].mxu1 %v1319_v51  ;;  %2468 = vmatmul.mubr.bf16.gmra.mrb[140].mxu0 %v2141_v50  ;;  %v2023_v11 = vmax.f32 %v1601_v53, %v1895_v25 }
 0x2b5   :  { %v1898_v40 = vmul.f32 0.2, %v1607_v23  ;;  %3297 = vmatpush1.bf16.msra.mxu0 %v5133_v36  ;;  %v2024_v24 = vmax.f32 %v1603_v9, %v1896_v0 }
 0x2b6   :  { %v2025_v2 = vmax.f32 %v1605_v17, %v1897_v34  ;;  %3298 = vmatprep.subr.bf16.mxu0 %v5149_v19 }
 0x2b7   :  { %v2026_v21 = vmax.f32 %v1607_v23, %v1898_v40  ;;  %v1610_v63 = vpop.f32.mrb[20].mxu1 }
 0x2b8   :  { %v1611_v57 = vadd.f32 %v1610_v63, %v5165_v41  ;;  %v1612_v62 = vpop.f32.mrb[21].mxu1  ;;  %v2143_v52 = vpack.c.bf16 %v2025_v2, %v2023_v11  ;;  %v4351_v2 = vld [vmem:[#allocation7 + $0x2c0] ss:$8 sps:$4 sm:$0xff]  }
 0x2b9   :  { %v1613_v28 = vadd.f32 %v1612_v62, %v5168_v15  ;;  %v1614_v43 = vpop.f32.mrb[22].mxu1  ;;  %v2144_v59 = vpack.c.bf16 %v2026_v21, %v2024_v24  ;;  %3299 = vmatpush1.bf16.msra.mxu0 %v5147_v6  ;;  %v4353_v24 = vld [vmem:[#allocation7 + $0x2c4] ss:$8 sps:$4 sm:$0xff]  }
 0x2ba   :  { %v1899_v26 = vmul.f32 0.2, %v1611_v57  ;;  %v1615_v8 = vadd.f32 %v1614_v43, %v5165_v41  ;;  %v1616_v16 = vpop.f32.mrb[23].mxu1  ;;  %3300 = vmatprep.subr.bf16.mxu0 %v5172_v4  ;;  %4166 = vmatprep.subr.bf16.mxu1 %v4353_v24 }
 0x2bb   :  { %v1900_v36 = vmul.f32 0.2, %v1613_v28  ;;  %v1617_v32 = vadd.f32 %v1616_v16, %v5168_v15  ;;  %2477 = vmatprep.mubr.bf16.mxu0 %v2144_v59  ;;  %4182 = vmatpush1.bf16.msra.mxu1 %v4351_v2 }
 0x2bc   :  { %v1901_v19 = vmul.f32 0.2, %v1615_v8  ;;  %2478 = vmatmul.mubr.bf16.gmra.mrb[144].mxu0 %v2143_v52  ;;  %v2027_v33 = vmax.f32 %v1611_v57, %v1899_v26 }
 0x2bd   :  { %v1902_v58 = vmul.f32 0.2, %v1617_v32  ;;  %3301 = vmatpush1.bf16.msra.mxu0 %v5170_v48  ;;  %v2028_v1 = vmax.f32 %v1613_v28, %v1900_v36 }
 0x2be   :  { %v2029_v30 = vmax.f32 %v1615_v8, %v1901_v19  ;;  %3302 = vmatprep.subr.bf16.mxu0 %v5196_v60 }
 0x2bf   :  { %v2030_v42 = vmax.f32 %v1617_v32, %v1902_v58  ;;  %v1620_v5 = vpop.f32.mrb[24].mxu1 }
 0x2c0   :  { %v1621_v6 = vadd.f32 %v1620_v5, %v5165_v41  ;;  %v1622_v38 = vpop.f32.mrb[25].mxu1  ;;  %v2145_v35 = vpack.c.bf16 %v2029_v30, %v2027_v33 }
 0x2c1   :  { %v1623_v4 = vadd.f32 %v1622_v38, %v5168_v15  ;;  %v1624_v47 = vpop.f32.mrb[26].mxu1  ;;  %v2146_v22 = vpack.c.bf16 %v2030_v42, %v2028_v1  ;;  %3303 = vmatpush1.bf16.msra.mxu0 %v5194_v12 }
 0x2c2   :  { %v1903_v55 = vmul.f32 0.2, %v1621_v6  ;;  %v1625_v46 = vadd.f32 %v1624_v47, %v5165_v41  ;;  %v1626_v48 = vpop.f32.mrb[27].mxu1  ;;  %3304 = vmatprep.subr.bf16.mxu0 %v5225_v54 }
 0x2c3   :  { %v1904_v61 = vmul.f32 0.2, %v1623_v4  ;;  %v1627_v18 = vadd.f32 %v1626_v48, %v5168_v15  ;;  %2487 = vmatprep.mubr.bf16.mxu0 %v2146_v22 }
 0x2c4   :  { %v1905_v60 = vmul.f32 0.2, %v1625_v46  ;;  %2488 = vmatmul.mubr.bf16.gmra.mrb[148].mxu0 %v2145_v35  ;;  %v2031_v13 = vmax.f32 %v1621_v6, %v1903_v55 }
 0x2c5   :  { %v1906_v37 = vmul.f32 0.2, %v1627_v18  ;;  %3305 = vmatpush1.bf16.msra.mxu0 %v5223_v7  ;;  %v2032_v3 = vmax.f32 %v1623_v4, %v1904_v61 }
 0x2c6   :  { %v2033_v44 = vmax.f32 %v1625_v46, %v1905_v60  ;;  %3306 = vmatprep.subr.bf16.mxu0 %v4350_v27 }
 0x2c7   :  { %v2034_v10 = vmax.f32 %v1627_v18, %v1906_v37  ;;  %v1630_v53 = vpop.f32.mrb[28].mxu1 }
 0x2c8   :  { %v1631_v14 = vadd.f32 %v1630_v53, %v5165_v41  ;;  %v1632_v12 = vpop.f32.mrb[29].mxu1  ;;  %v2147_v51 = vpack.c.bf16 %v2033_v44, %v2031_v13  ;;  %v4354_v44 = vld [vmem:[#allocation7 + $0x2d0] ss:$8 sps:$4 sm:$0xff]  }
 0x2c9   :  { %v1633_v50 = vadd.f32 %v1632_v12, %v5168_v15  ;;  %v1634_v9 = vpop.f32.mrb[30].mxu1  ;;  %v2148_v31 = vpack.c.bf16 %v2034_v10, %v2032_v3  ;;  %3307 = vmatpush1.bf16.msra.mxu0 %v4348_v45  ;;  %v4356_v3 = vld [vmem:[#allocation7 + $0x2d4] ss:$8 sps:$4 sm:$0xff]  }
 0x2ca   :  { %v1907_v54 = vmul.f32 0.2, %v1631_v14  ;;  %v1635_v29 = vadd.f32 %v1634_v9, %v5165_v41  ;;  %v1636_v49 = vpop.f32.mrb[31].mxu1  ;;  %3308 = vmatprep.subr.bf16.mxu0 %v4353_v24  ;;  %4167 = vmatprep.subr.bf16.mxu1 %v4356_v3 }
 0x2cb   :  { %v1908_v25 = vmul.f32 0.2, %v1633_v50  ;;  %v1637_v7 = vadd.f32 %v1636_v49, %v5168_v15  ;;  %2497 = vmatprep.mubr.bf16.mxu0 %v2148_v31  ;;  %4183 = vmatpush1.bf16.msra.mxu1 %v4354_v44 }
 0x2cc   :  { %v1909_v17 = vmul.f32 0.2, %v1635_v29  ;;  %2498 = vmatmul.mubr.bf16.gmra.mrb[152].mxu0 %v2147_v51  ;;  %v2035_v0 = vmax.f32 %v1631_v14, %v1907_v54 }
 0x2cd   :  { %v1910_v20 = vmul.f32 0.2, %v1637_v7  ;;  %v2036_v34 = vmax.f32 %v1633_v50, %v1908_v25  ;;  %3309 = vmatpush1.bf16.msra.mxu0 %v4351_v2 }
 0x2ce   :  { %v2037_v23 = vmax.f32 %v1635_v29, %v1909_v17  ;;  %3310 = vmatprep.subr.bf16.mxu0 %v4356_v3 }
 0x2cf   :  { %v2038_v40 = vmax.f32 %v1637_v7, %v1910_v20  ;;  %v1640_v11 = vpop.f32.mrb[32].mxu1 }
 0x2d0   :  { %v1641_v21 = vadd.f32 %v1640_v11, %v5165_v41  ;;  %v1642_v63 = vpop.f32.mrb[33].mxu1  ;;  %v2149_v57 = vpack.c.bf16 %v2037_v23, %v2035_v0 }
 0x2d1   :  { %v1643_v62 = vadd.f32 %v1642_v63, %v5168_v15  ;;  %v1644_v52 = vpop.f32.mrb[34].mxu1  ;;  %v2150_v28 = vpack.c.bf16 %v2038_v40, %v2036_v34  ;;  %3311 = vmatpush1.bf16.msra.mxu0 %v4354_v44 }
 0x2d2   :  { %v1911_v43 = vmul.f32 0.2, %v1641_v21  ;;  %v1645_v59 = vadd.f32 %v1644_v52, %v5165_v41  ;;  %v1646_v26 = vpop.f32.mrb[35].mxu1 }
 0x2d3   :  { %v1912_v8 = vmul.f32 0.2, %v1643_v62  ;;  %v1647_v16 = vadd.f32 %v1646_v26, %v5168_v15  ;;  %2507 = vmatprep.mubr.bf16.mxu0 %v2150_v28 }
 0x2d4   :  { %v1913_v36 = vmul.f32 0.2, %v1645_v59  ;;  %2508 = vmatmul.mubr.bf16.gmra.mrb[156].mxu0 %v2149_v57  ;;  %v2039_v19 = vmax.f32 %v1641_v21, %v1911_v43 }
 0x2d5   :  { %v1914_v32 = vmul.f32 0.2, %v1647_v16  ;;  %v2040_v33 = vmax.f32 %v1643_v62, %v1912_v8 }
 0x2d6   :  { %v2041_v58 = vmax.f32 %v1645_v59, %v1913_v36 }
 0x2d7   :  { %v2042_v30 = vmax.f32 %v1647_v16, %v1914_v32  ;;  %v1650_v1 = vpop.f32.mrb[36].mxu1 }
 0x2d8   :  { %v1651_v42 = vadd.f32 %v1650_v1, %v5165_v41  ;;  %v1652_v5 = vpop.f32.mrb[37].mxu1  ;;  %v2151_v45 = vpack.c.bf16 %v2041_v58, %v2039_v19  ;;  %v4357_v58 = vld [vmem:[#allocation7 + $0x2e0] ss:$8 sps:$4 sm:$0xff]  }
 0x2d9   :  { %v1653_v27 = vadd.f32 %v1652_v5, %v5168_v15  ;;  %v1654_v6 = vpop.f32.mrb[38].mxu1  ;;  %v2152_v38 = vpack.c.bf16 %v2042_v30, %v2040_v33  ;;  %v4359_v33 = vld [vmem:[#allocation7 + $0x2e4] ss:$8 sps:$4 sm:$0xff]  }
 0x2da   :  { %v1915_v35 = vmul.f32 0.2, %v1651_v42  ;;  %v1655_v4 = vadd.f32 %v1654_v6, %v5165_v41  ;;  %v1656_v47 = vpop.f32.mrb[39].mxu1  ;;  %4168 = vmatprep.subr.bf16.mxu1 %v4359_v33  ;;  %3312 = vmatprep.subr.bf16.mxu0 %v4359_v33 }
 0x2db   :  { %v1916_v22 = vmul.f32 0.2, %v1653_v27  ;;  %v1657_v55 = vadd.f32 %v1656_v47, %v5168_v15  ;;  %2517 = vmatprep.mubr.bf16.mxu0 %v2152_v38  ;;  %4184 = vmatpush1.bf16.msra.mxu1 %v4357_v58 }
 0x2dc   :  { %v1917_v46 = vmul.f32 0.2, %v1655_v4  ;;  %2518 = vmatmul.mubr.bf16.gmra.mrb[160].mxu0 %v2151_v45  ;;  %v2043_v61 = vmax.f32 %v1651_v42, %v1915_v35 }
 0x2dd   :  { %v1918_v48 = vmul.f32 0.2, %v1657_v55  ;;  %v2044_v60 = vmax.f32 %v1653_v27, %v1916_v22  ;;  %3313 = vmatpush1.bf16.msra.mxu0 %v4357_v58 }
 0x2de   :  { %v2045_v18 = vmax.f32 %v1655_v4, %v1917_v46 }
 0x2df   :  { %v2046_v37 = vmax.f32 %v1657_v55, %v1918_v48  ;;  %v1660_v13 = vpop.f32.mrb[40].mxu1 }
 0x2e0   :  { %v1661_v10 = vadd.f32 %v1660_v13, %v5165_v41  ;;  %v1662_v53 = vpop.f32.mrb[41].mxu1  ;;  %v2153_v14 = vpack.c.bf16 %v2045_v18, %v2043_v61 }
 0x2e1   :  { %v1663_v12 = vadd.f32 %v1662_v53, %v5168_v15  ;;  %v1664_v51 = vpop.f32.mrb[42].mxu1  ;;  %v2154_v50 = vpack.c.bf16 %v2046_v37, %v2044_v60 }
 0x2e2   :  { %v1919_v9 = vmul.f32 0.2, %v1661_v10  ;;  %v1665_v31 = vadd.f32 %v1664_v51, %v5165_v41  ;;  %v1666_v54 = vpop.f32.mrb[43].mxu1 }
 0x2e3   :  { %v1920_v29 = vmul.f32 0.2, %v1663_v12  ;;  %v1667_v49 = vadd.f32 %v1666_v54, %v5168_v15  ;;  %2527 = vmatprep.mubr.bf16.mxu0 %v2154_v50 }
 0x2e4   :  { %v1921_v25 = vmul.f32 0.2, %v1665_v31  ;;  %2528 = vmatmul.mubr.bf16.gmra.mrb[164].mxu0 %v2153_v14  ;;  %v2047_v17 = vmax.f32 %v1661_v10, %v1919_v9 }
 0x2e5   :  { %v1922_v7 = vmul.f32 0.2, %v1667_v49  ;;  %v2048_v0 = vmax.f32 %v1663_v12, %v1920_v29 }
 0x2e6   :  { %v2049_v20 = vmax.f32 %v1665_v31, %v1921_v25 }
 0x2e7   :  { %v2050_v23 = vmax.f32 %v1667_v49, %v1922_v7  ;;  %v1670_v34 = vpop.f32.mrb[44].mxu1 }
 0x2e8   :  { %v1671_v40 = vadd.f32 %v1670_v34, %v5165_v41  ;;  %v1672_v11 = vpop.f32.mrb[45].mxu1  ;;  %v2155_v2 = vpack.c.bf16 %v2049_v20, %v2047_v17  ;;  %v4360_v34 = vld [vmem:[#allocation7 + $0x2f0] ss:$8 sps:$4 sm:$0xff]  }
 0x2e9   :  { %v1673_v24 = vadd.f32 %v1672_v11, %v5168_v15  ;;  %v1674_v21 = vpop.f32.mrb[46].mxu1  ;;  %v2156_v63 = vpack.c.bf16 %v2050_v23, %v2048_v0 }
 0x2ea   :  { %v1923_v57 = vmul.f32 0.2, %v1671_v40  ;;  %v1675_v62 = vadd.f32 %v1674_v21, %v5165_v41  ;;  %v1676_v52 = vpop.f32.mrb[47].mxu1 }
 0x2eb   :  { %v1924_v28 = vmul.f32 0.2, %v1673_v24  ;;  %v1677_v43 = vadd.f32 %v1676_v52, %v5168_v15  ;;  %2537 = vmatprep.mubr.bf16.mxu0 %v2156_v63 }
 0x2ec   :  { %v1925_v59 = vmul.f32 0.2, %v1675_v62  ;;  %2538 = vmatmul.mubr.bf16.gmra.mrb[168].mxu0 %v2155_v2  ;;  %v2051_v8 = vmax.f32 %v1671_v40, %v1923_v57  ;;  %v4362_v40 = vld [vmem:[#allocation7 + $0x2f4] ss:$8 sps:$4 sm:$0xff]  }
 0x2ed   :  { %v1926_v26 = vmul.f32 0.2, %v1677_v43  ;;  %v2052_v36 = vmax.f32 %v1673_v24, %v1924_v28  ;;  %4169 = vmatprep.subr.bf16.mxu1 %v4362_v40  ;;  %3314 = vmatprep.subr.bf16.mxu0 %v4362_v40 }
 0x2ee   :  { %v2053_v16 = vmax.f32 %v1675_v62, %v1925_v59  ;;  %4185 = vmatpush1.bf16.msra.mxu1 %v4360_v34  ;;  %3315 = vmatpush1.bf16.msra.mxu0 %v4360_v34 }
 0x2ef   :  { %v2054_v32 = vmax.f32 %v1677_v43, %v1926_v26  ;;  %v1680_v19 = vpop.f32.mrb[48].mxu1 }
 0x2f0   :  { %v1681_v30 = vadd.f32 %v1680_v19, %v5165_v41  ;;  %v1682_v1 = vpop.f32.mrb[49].mxu1  ;;  %v2157_v42 = vpack.c.bf16 %v2053_v16, %v2051_v8 }
 0x2f1   :  { %v1683_v5 = vadd.f32 %v1682_v1, %v5168_v15  ;;  %v1684_v45 = vpop.f32.mrb[50].mxu1  ;;  %v2158_v27 = vpack.c.bf16 %v2054_v32, %v2052_v36 }
 0x2f2   :  { %v1927_v6 = vmul.f32 0.2, %v1681_v30  ;;  %v1685_v38 = vadd.f32 %v1684_v45, %v5165_v41  ;;  %v1686_v35 = vpop.f32.mrb[51].mxu1 }
 0x2f3   :  { %v1928_v4 = vmul.f32 0.2, %v1683_v5  ;;  %v1687_v47 = vadd.f32 %v1686_v35, %v5168_v15  ;;  %2547 = vmatprep.mubr.bf16.mxu0 %v2158_v27 }
 0x2f4   :  { %v1929_v22 = vmul.f32 0.2, %v1685_v38  ;;  %2548 = vmatmul.mubr.bf16.gmra.mrb[172].mxu0 %v2157_v42  ;;  %v2055_v46 = vmax.f32 %v1681_v30, %v1927_v6 }
 0x2f5   :  { %v1930_v55 = vmul.f32 0.2, %v1687_v47  ;;  %v2056_v61 = vmax.f32 %v1683_v5, %v1928_v4 }
 0x2f6   :  { %v2057_v48 = vmax.f32 %v1685_v38, %v1929_v22 }
 0x2f7   :  { %v2058_v18 = vmax.f32 %v1687_v47, %v1930_v55  ;;  %v1690_v60 = vpop.f32.mrb[52].mxu1 }
 0x2f8   :  { %v1691_v37 = vadd.f32 %v1690_v60, %v5165_v41  ;;  %v1692_v13 = vpop.f32.mrb[53].mxu1  ;;  %v2159_v44 = vpack.c.bf16 %v2057_v48, %v2055_v46 }
 0x2f9   :  { %v1693_v3 = vadd.f32 %v1692_v13, %v5168_v15  ;;  %v1694_v10 = vpop.f32.mrb[54].mxu1  ;;  %v2160_v53 = vpack.c.bf16 %v2058_v18, %v2056_v61 }
 0x2fa   :  { %v1931_v14 = vmul.f32 0.2, %v1691_v37  ;;  %v1695_v12 = vadd.f32 %v1694_v10, %v5165_v41  ;;  %v1696_v51 = vpop.f32.mrb[55].mxu1 }
 0x2fb   :  { %v1932_v50 = vmul.f32 0.2, %v1693_v3  ;;  %v1697_v9 = vadd.f32 %v1696_v51, %v5168_v15  ;;  %2557 = vmatprep.mubr.bf16.mxu0 %v2160_v53 }
 0x2fc   :  { %v1933_v31 = vmul.f32 0.2, %v1695_v12  ;;  %2558 = vmatmul.mubr.bf16.gmra.mrb[176].mxu0 %v2159_v44  ;;  %v2059_v29 = vmax.f32 %v1691_v37, %v1931_v14 }
 0x2fd   :  { %v1934_v54 = vmul.f32 0.2, %v1697_v9  ;;  %v2060_v25 = vmax.f32 %v1693_v3, %v1932_v50 }
 0x2fe   :  { %v2061_v49 = vmax.f32 %v1695_v12, %v1933_v31 }
 0x2ff   :  { %v2062_v7 = vmax.f32 %v1697_v9, %v1934_v54  ;;  %v1700_v17 = vpop.f32.mrb[56].mxu1 }
 0x300   :  { %v1701_v20 = vadd.f32 %v1700_v17, %v5165_v41  ;;  %v1702_v0 = vpop.f32.mrb[57].mxu1  ;;  %v2161_v23 = vpack.c.bf16 %v2061_v49, %v2059_v29 }
 0x301   :  { %v1703_v11 = vadd.f32 %v1702_v0, %v5168_v15  ;;  %v1704_v2 = vpop.f32.mrb[58].mxu1  ;;  %v2162_v24 = vpack.c.bf16 %v2062_v7, %v2060_v25 }
 0x302   :  { %v1935_v21 = vmul.f32 0.2, %v1701_v20  ;;  %v1705_v63 = vadd.f32 %v1704_v2, %v5165_v41  ;;  %v1706_v57 = vpop.f32.mrb[59].mxu1 }
 0x303   :  { %v1936_v62 = vmul.f32 0.2, %v1703_v11  ;;  %v1707_v52 = vadd.f32 %v1706_v57, %v5168_v15  ;;  %2567 = vmatprep.mubr.bf16.mxu0 %v2162_v24 }
 0x304   :  { %v1937_v28 = vmul.f32 0.2, %v1705_v63  ;;  %2568 = vmatmul.mubr.bf16.gmra.mrb[180].mxu0 %v2161_v23  ;;  %v2063_v59 = vmax.f32 %v1701_v20, %v1935_v21 }
 0x305   :  { %v1938_v43 = vmul.f32 0.2, %v1707_v52  ;;  %v2064_v8 = vmax.f32 %v1703_v11, %v1936_v62 }
 0x306   :  { %v2065_v26 = vmax.f32 %v1705_v63, %v1937_v28 }
 0x307   :  { %v2066_v16 = vmax.f32 %v1707_v52, %v1938_v43  ;;  %v1710_v36 = vpop.f32.mrb[60].mxu1 }
 0x308   :  { %v1711_v32 = vadd.f32 %v1710_v36, %v5165_v41  ;;  %v1712_v19 = vpop.f32.mrb[61].mxu1  ;;  %v2163_v58 = vpack.c.bf16 %v2065_v26, %v2063_v59 }
 0x309   :  { %v1713_v33 = vadd.f32 %v1712_v19, %v5168_v15  ;;  %v1714_v30 = vpop.f32.mrb[62].mxu1  ;;  %v2164_v1 = vpack.c.bf16 %v2066_v16, %v2064_v8 }
 0x30a   :  { %v1939_v42 = vmul.f32 0.2, %v1711_v32  ;;  %v1715_v5 = vadd.f32 %v1714_v30, %v5165_v41  ;;  %v1716_v45 = vpop.f32.mrb[63].mxu1 }
 0x30b   :  { %v1940_v27 = vmul.f32 0.2, %v1713_v33  ;;  %v1717_v6 = vadd.f32 %v1716_v45, %v5168_v15  ;;  %2577 = vmatprep.mubr.bf16.mxu0 %v2164_v1 }
 0x30c   :  { %v1941_v38 = vmul.f32 0.2, %v1715_v5  ;;  %2578 = vmatmul.mubr.bf16.gmra.mrb[184].mxu0 %v2163_v58  ;;  %v2067_v4 = vmax.f32 %v1711_v32, %v1939_v42 }
 0x30d   :  { %v1942_v35 = vmul.f32 0.2, %v1717_v6  ;;  %v2068_v22 = vmax.f32 %v1713_v33, %v1940_v27 }
 0x30e   :  { %v2069_v47 = vmax.f32 %v1715_v5, %v1941_v38 }
 0x30f   :  { %v2070_v55 = vmax.f32 %v1717_v6, %v1942_v35  ;;  %v1720_v46 = vpop.f32.mrb[64].mxu1 }
 0x310   :  { %v1721_v48 = vadd.f32 %v1720_v46, %v5165_v41  ;;  %v1722_v61 = vpop.f32.mrb[65].mxu1  ;;  %v2165_v18 = vpack.c.bf16 %v2069_v47, %v2067_v4 }
 0x311   :  { %v1723_v60 = vadd.f32 %v1722_v61, %v5168_v15  ;;  %v1724_v37 = vpop.f32.mrb[66].mxu1  ;;  %v2166_v13 = vpack.c.bf16 %v2070_v55, %v2068_v22 }
 0x312   :  { %v1943_v44 = vmul.f32 0.2, %v1721_v48  ;;  %v1725_v3 = vadd.f32 %v1724_v37, %v5165_v41  ;;  %v1726_v10 = vpop.f32.mrb[67].mxu1 }
 0x313   :  { %v1944_v53 = vmul.f32 0.2, %v1723_v60  ;;  %v1727_v14 = vadd.f32 %v1726_v10, %v5168_v15  ;;  %2587 = vmatprep.mubr.bf16.mxu0 %v2166_v13 }
 0x314   :  { %v1945_v12 = vmul.f32 0.2, %v1725_v3  ;;  %2588 = vmatmul.mubr.bf16.gmra.mrb[188].mxu0 %v2165_v18  ;;  %v2071_v50 = vmax.f32 %v1721_v48, %v1943_v44 }
 0x315   :  { %v1946_v51 = vmul.f32 0.2, %v1727_v14  ;;  %v2072_v31 = vmax.f32 %v1723_v60, %v1944_v53 }
 0x316   :  { %v2073_v9 = vmax.f32 %v1725_v3, %v1945_v12 }
 0x317   :  { %v2074_v54 = vmax.f32 %v1727_v14, %v1946_v51  ;;  %v1730_v29 = vpop.f32.mrb[68].mxu1 }
 0x318   :  { %v1731_v49 = vadd.f32 %v1730_v29, %v5165_v41  ;;  %v1732_v25 = vpop.f32.mrb[69].mxu1  ;;  %v2167_v7 = vpack.c.bf16 %v2073_v9, %v2071_v50 }
 0x319   :  { %v1733_v17 = vadd.f32 %v1732_v25, %v5168_v15  ;;  %v1734_v20 = vpop.f32.mrb[70].mxu1  ;;  %v2168_v0 = vpack.c.bf16 %v2074_v54, %v2072_v31 }
 0x31a   :  { %v1947_v23 = vmul.f32 0.2, %v1731_v49  ;;  %v1735_v34 = vadd.f32 %v1734_v20, %v5165_v41  ;;  %v1736_v40 = vpop.f32.mrb[71].mxu1 }
 0x31b   :  { %v1948_v11 = vmul.f32 0.2, %v1733_v17  ;;  %v1737_v2 = vadd.f32 %v1736_v40, %v5168_v15  ;;  %2597 = vmatprep.mubr.bf16.mxu0 %v2168_v0 }
 0x31c   :  { %v1949_v24 = vmul.f32 0.2, %v1735_v34  ;;  %2598 = vmatmul.mubr.bf16.gmra.mrb[192].mxu0 %v2167_v7  ;;  %v2075_v63 = vmax.f32 %v1731_v49, %v1947_v23 }
 0x31d   :  { %v1950_v21 = vmul.f32 0.2, %v1737_v2  ;;  %v2076_v62 = vmax.f32 %v1733_v17, %v1948_v11 }
 0x31e   :  { %v2077_v57 = vmax.f32 %v1735_v34, %v1949_v24 }
 0x31f   :  { %v2078_v52 = vmax.f32 %v1737_v2, %v1950_v21  ;;  %v1740_v28 = vpop.f32.mrb[72].mxu1 }
 0x320   :  { %v1741_v43 = vadd.f32 %v1740_v28, %v5165_v41  ;;  %v1742_v59 = vpop.f32.mrb[73].mxu1  ;;  %v2169_v26 = vpack.c.bf16 %v2077_v57, %v2075_v63 }
 0x321   :  { %v1743_v8 = vadd.f32 %v1742_v59, %v5168_v15  ;;  %v1744_v16 = vpop.f32.mrb[74].mxu1  ;;  %v2170_v36 = vpack.c.bf16 %v2078_v52, %v2076_v62 }
 0x322   :  { %v1951_v32 = vmul.f32 0.2, %v1741_v43  ;;  %v1745_v19 = vadd.f32 %v1744_v16, %v5165_v41  ;;  %v1746_v58 = vpop.f32.mrb[75].mxu1 }
 0x323   :  { %v1952_v33 = vmul.f32 0.2, %v1743_v8  ;;  %v1747_v30 = vadd.f32 %v1746_v58, %v5168_v15  ;;  %2607 = vmatprep.mubr.bf16.mxu0 %v2170_v36 }
 0x324   :  { %v1953_v1 = vmul.f32 0.2, %v1745_v19  ;;  %2608 = vmatmul.mubr.bf16.gmra.mrb[196].mxu0 %v2169_v26  ;;  %v2079_v5 = vmax.f32 %v1741_v43, %v1951_v32 }
 0x325   :  { %v1954_v42 = vmul.f32 0.2, %v1747_v30  ;;  %v2080_v27 = vmax.f32 %v1743_v8, %v1952_v33 }
 0x326   :  { %v2081_v45 = vmax.f32 %v1745_v19, %v1953_v1 }
 0x327   :  { %v2082_v6 = vmax.f32 %v1747_v30, %v1954_v42  ;;  %v1750_v38 = vpop.f32.mrb[76].mxu1 }
 0x328   :  { %v1751_v35 = vadd.f32 %v1750_v38, %v5165_v41  ;;  %v1752_v4 = vpop.f32.mrb[77].mxu1  ;;  %v2171_v47 = vpack.c.bf16 %v2081_v45, %v2079_v5 }
 0x329   :  { %v1753_v22 = vadd.f32 %v1752_v4, %v5168_v15  ;;  %v1754_v55 = vpop.f32.mrb[78].mxu1  ;;  %v2172_v46 = vpack.c.bf16 %v2082_v6, %v2080_v27 }
 0x32a   :  { %v1955_v48 = vmul.f32 0.2, %v1751_v35  ;;  %v1755_v61 = vadd.f32 %v1754_v55, %v5165_v41  ;;  %v1756_v18 = vpop.f32.mrb[79].mxu1 }
 0x32b   :  { %v1956_v60 = vmul.f32 0.2, %v1753_v22  ;;  %v1757_v37 = vadd.f32 %v1756_v18, %v5168_v15  ;;  %2617 = vmatprep.mubr.bf16.mxu0 %v2172_v46 }
 0x32c   :  { %v1957_v13 = vmul.f32 0.2, %v1755_v61  ;;  %2618 = vmatmul.mubr.bf16.gmra.mrb[200].mxu0 %v2171_v47  ;;  %v2083_v3 = vmax.f32 %v1751_v35, %v1955_v48 }
 0x32d   :  { %v1958_v44 = vmul.f32 0.2, %v1757_v37  ;;  %v2084_v53 = vmax.f32 %v1753_v22, %v1956_v60 }
 0x32e   :  { %v2085_v10 = vmax.f32 %v1755_v61, %v1957_v13 }
 0x32f   :  { %v2086_v14 = vmax.f32 %v1757_v37, %v1958_v44  ;;  %v1760_v12 = vpop.f32.mrb[80].mxu1 }
 0x330   :  { %v1761_v51 = vadd.f32 %v1760_v12, %v5165_v41  ;;  %v1762_v50 = vpop.f32.mrb[81].mxu1  ;;  %v2173_v9 = vpack.c.bf16 %v2085_v10, %v2083_v3 }
 0x331   :  { %v1763_v31 = vadd.f32 %v1762_v50, %v5168_v15  ;;  %v1764_v54 = vpop.f32.mrb[82].mxu1  ;;  %v2174_v29 = vpack.c.bf16 %v2086_v14, %v2084_v53 }
 0x332   :  { %v1959_v49 = vmul.f32 0.2, %v1761_v51  ;;  %v1765_v25 = vadd.f32 %v1764_v54, %v5165_v41  ;;  %v1766_v7 = vpop.f32.mrb[83].mxu1 }
 0x333   :  { %v1960_v17 = vmul.f32 0.2, %v1763_v31  ;;  %v1767_v20 = vadd.f32 %v1766_v7, %v5168_v15  ;;  %2627 = vmatprep.mubr.bf16.mxu0 %v2174_v29 }
 0x334   :  { %v1961_v0 = vmul.f32 0.2, %v1765_v25  ;;  %2628 = vmatmul.mubr.bf16.gmra.mrb[204].mxu0 %v2173_v9  ;;  %v2087_v34 = vmax.f32 %v1761_v51, %v1959_v49 }
 0x335   :  { %v1962_v23 = vmul.f32 0.2, %v1767_v20  ;;  %v2088_v11 = vmax.f32 %v1763_v31, %v1960_v17 }
 0x336   :  { %v2089_v40 = vmax.f32 %v1765_v25, %v1961_v0 }
 0x337   :  { %v2090_v2 = vmax.f32 %v1767_v20, %v1962_v23  ;;  %v1770_v24 = vpop.f32.mrb[84].mxu1 }
 0x338   :  { %v1771_v21 = vadd.f32 %v1770_v24, %v5165_v41  ;;  %v1772_v63 = vpop.f32.mrb[85].mxu1  ;;  %v2175_v57 = vpack.c.bf16 %v2089_v40, %v2087_v34 }
 0x339   :  { %v1773_v62 = vadd.f32 %v1772_v63, %v5168_v15  ;;  %v1774_v52 = vpop.f32.mrb[86].mxu1  ;;  %v2176_v28 = vpack.c.bf16 %v2090_v2, %v2088_v11 }
 0x33a   :  { %v1963_v43 = vmul.f32 0.2, %v1771_v21  ;;  %v1775_v59 = vadd.f32 %v1774_v52, %v5165_v41  ;;  %v1776_v26 = vpop.f32.mrb[87].mxu1 }
 0x33b   :  { %v1964_v8 = vmul.f32 0.2, %v1773_v62  ;;  %v1777_v16 = vadd.f32 %v1776_v26, %v5168_v15  ;;  %2637 = vmatprep.mubr.bf16.mxu0 %v2176_v28 }
 0x33c   :  { %v1965_v36 = vmul.f32 0.2, %v1775_v59  ;;  %2638 = vmatmul.mubr.bf16.gmra.mrb[208].mxu0 %v2175_v57  ;;  %v2091_v19 = vmax.f32 %v1771_v21, %v1963_v43 }
 0x33d   :  { %v1966_v32 = vmul.f32 0.2, %v1777_v16  ;;  %v2092_v33 = vmax.f32 %v1773_v62, %v1964_v8 }
 0x33e   :  { %v2093_v58 = vmax.f32 %v1775_v59, %v1965_v36 }
 0x33f   :  { %v2094_v30 = vmax.f32 %v1777_v16, %v1966_v32  ;;  %v1780_v1 = vpop.f32.mrb[88].mxu1 }
 0x340   :  { %v1781_v42 = vadd.f32 %v1780_v1, %v5165_v41  ;;  %v1782_v5 = vpop.f32.mrb[89].mxu1  ;;  %v2177_v45 = vpack.c.bf16 %v2093_v58, %v2091_v19 }
 0x341   :  { %v1783_v27 = vadd.f32 %v1782_v5, %v5168_v15  ;;  %v1784_v6 = vpop.f32.mrb[90].mxu1  ;;  %v2178_v38 = vpack.c.bf16 %v2094_v30, %v2092_v33 }
 0x342   :  { %v1967_v35 = vmul.f32 0.2, %v1781_v42  ;;  %v1785_v4 = vadd.f32 %v1784_v6, %v5165_v41  ;;  %v1786_v47 = vpop.f32.mrb[91].mxu1 }
 0x343   :  { %v1968_v22 = vmul.f32 0.2, %v1783_v27  ;;  %v1787_v55 = vadd.f32 %v1786_v47, %v5168_v15  ;;  %2647 = vmatprep.mubr.bf16.mxu0 %v2178_v38 }
 0x344   :  { %v1969_v46 = vmul.f32 0.2, %v1785_v4  ;;  %2648 = vmatmul.mubr.bf16.gmra.mrb[212].mxu0 %v2177_v45  ;;  %v2095_v61 = vmax.f32 %v1781_v42, %v1967_v35 }
 0x345   :  { %v1970_v48 = vmul.f32 0.2, %v1787_v55  ;;  %v2096_v60 = vmax.f32 %v1783_v27, %v1968_v22 }
 0x346   :  { %v2097_v18 = vmax.f32 %v1785_v4, %v1969_v46 }
 0x347   :  { %v2098_v37 = vmax.f32 %v1787_v55, %v1970_v48  ;;  %v1790_v13 = vpop.f32.mrb[92].mxu1 }
 0x348   :  { %v1791_v44 = vadd.f32 %v1790_v13, %v5165_v41  ;;  %v1792_v3 = vpop.f32.mrb[93].mxu1  ;;  %v2179_v10 = vpack.c.bf16 %v2097_v18, %v2095_v61 }
 0x349   :  { %v1793_v53 = vadd.f32 %v1792_v3, %v5168_v15  ;;  %v1794_v14 = vpop.f32.mrb[94].mxu1  ;;  %v2180_v12 = vpack.c.bf16 %v2098_v37, %v2096_v60 }
 0x34a   :  { %v1971_v51 = vmul.f32 0.2, %v1791_v44  ;;  %v1795_v50 = vadd.f32 %v1794_v14, %v5165_v41  ;;  %v1796_v9 = vpop.f32.mrb[95].mxu1 }
 0x34b   :  { %v1972_v31 = vmul.f32 0.2, %v1793_v53  ;;  %v1797_v54 = vadd.f32 %v1796_v9, %v5168_v15  ;;  %2657 = vmatprep.mubr.bf16.mxu0 %v2180_v12 }
 0x34c   :  { %v1973_v29 = vmul.f32 0.2, %v1795_v50  ;;  %2658 = vmatmul.mubr.bf16.gmra.mrb[216].mxu0 %v2179_v10  ;;  %v2099_v25 = vmax.f32 %v1791_v44, %v1971_v51 }
 0x34d   :  { %v1974_v49 = vmul.f32 0.2, %v1797_v54  ;;  %v2100_v17 = vmax.f32 %v1793_v53, %v1972_v31 }
 0x34e   :  { %v2101_v7 = vmax.f32 %v1795_v50, %v1973_v29 }
 0x34f   :  { %v2102_v20 = vmax.f32 %v1797_v54, %v1974_v49  ;;  %v1800_v0 = vpop.f32.mrb[96].mxu1 }
 0x350   :  { %v1801_v23 = vadd.f32 %v1800_v0, %v5165_v41  ;;  %v1802_v34 = vpop.f32.mrb[97].mxu1  ;;  %v2181_v40 = vpack.c.bf16 %v2101_v7, %v2099_v25 }
 0x351   :  { %v1803_v11 = vadd.f32 %v1802_v34, %v5168_v15  ;;  %v1804_v2 = vpop.f32.mrb[98].mxu1  ;;  %v2182_v24 = vpack.c.bf16 %v2102_v20, %v2100_v17 }
 0x352   :  { %v1975_v21 = vmul.f32 0.2, %v1801_v23  ;;  %v1805_v63 = vadd.f32 %v1804_v2, %v5165_v41  ;;  %v1806_v57 = vpop.f32.mrb[99].mxu1 }
 0x353   :  { %v1976_v62 = vmul.f32 0.2, %v1803_v11  ;;  %v1807_v52 = vadd.f32 %v1806_v57, %v5168_v15  ;;  %2667 = vmatprep.mubr.bf16.mxu0 %v2182_v24 }
 0x354   :  { %v1977_v28 = vmul.f32 0.2, %v1805_v63  ;;  %2668 = vmatmul.mubr.bf16.gmra.mrb[220].mxu0 %v2181_v40  ;;  %v2103_v59 = vmax.f32 %v1801_v23, %v1975_v21  ;;  %v4088_v23 = vld [vmem:[%s5654_s3 + $0x2] ss:$4 sm:$0x3] }
 0x355   :  { %v1978_v43 = vmul.f32 0.2, %v1807_v52  ;;  %v2104_v8 = vmax.f32 %v1803_v11, %v1976_v62  ;;  %v5344_v62 = vrot.slane %v4088_v23, %v4989_v39 }
 0x356   :  { %v2105_v26 = vmax.f32 %v1805_v63, %v1977_v28  ;;  %v5341_v63 = vrot.slane %v4088_v23, %v4984_v56 }
 0x357   :  { %v2106_v16 = vmax.f32 %v1807_v52, %v1978_v43  ;;  %v1810_v36 = vpop.f32.mrb[100].mxu1 }
 0x358   :  { %v1811_v32 = vadd.f32 %v1810_v36, %v5165_v41  ;;  %v1812_v19 = vpop.f32.mrb[101].mxu1  ;;  %v2183_v58 = vpack.c.bf16 %v2105_v26, %v2103_v59 }
 0x359   :  { %v1813_v33 = vadd.f32 %v1812_v19, %v5168_v15  ;;  %v1814_v30 = vpop.f32.mrb[102].mxu1  ;;  %v2184_v1 = vpack.c.bf16 %v2106_v16, %v2104_v8 }
 0x35a   :  { %v1979_v42 = vmul.f32 0.2, %v1811_v32  ;;  %v1815_v5 = vadd.f32 %v1814_v30, %v5165_v41  ;;  %v1816_v45 = vpop.f32.mrb[103].mxu1 }
 0x35b   :  { %v1980_v27 = vmul.f32 0.2, %v1813_v33  ;;  %v1817_v6 = vadd.f32 %v1816_v45, %v5168_v15  ;;  %2677 = vmatprep.mubr.bf16.mxu0 %v2184_v1 }
 0x35c   :  { %v1981_v38 = vmul.f32 0.2, %v1815_v5  ;;  %2678 = vmatmul.mubr.bf16.gmra.mrb[224].mxu0 %v2183_v58  ;;  %v2107_v4 = vmax.f32 %v1811_v32, %v1979_v42 }
 0x35d   :  { %v1982_v35 = vmul.f32 0.2, %v1817_v6  ;;  %v2108_v22 = vmax.f32 %v1813_v33, %v1980_v27 }
 0x35e   :  { %v2109_v47 = vmax.f32 %v1815_v5, %v1981_v38 }
 0x35f   :  { %v2110_v55 = vmax.f32 %v1817_v6, %v1982_v35  ;;  %v1820_v46 = vpop.f32.mrb[104].mxu1 }
 0x360   :  { %v1821_v48 = vadd.f32 %v1820_v46, %v5165_v41  ;;  %v1822_v61 = vpop.f32.mrb[105].mxu1  ;;  %v2185_v18 = vpack.c.bf16 %v2109_v47, %v2107_v4 }
 0x361   :  { %v1823_v60 = vadd.f32 %v1822_v61, %v5168_v15  ;;  %v1824_v37 = vpop.f32.mrb[106].mxu1  ;;  %v2186_v13 = vpack.c.bf16 %v2110_v55, %v2108_v22 }
 0x362   :  { %v1983_v44 = vmul.f32 0.2, %v1821_v48  ;;  %v1825_v3 = vadd.f32 %v1824_v37, %v5165_v41  ;;  %v1826_v10 = vpop.f32.mrb[107].mxu1 }
 0x363   :  { %v1984_v53 = vmul.f32 0.2, %v1823_v60  ;;  %v1827_v14 = vadd.f32 %v1826_v10, %v5168_v15  ;;  %2687 = vmatprep.mubr.bf16.mxu0 %v2186_v13 }
 0x364   :  { %v1985_v12 = vmul.f32 0.2, %v1825_v3  ;;  %2688 = vmatmul.mubr.bf16.gmra.mrb[228].mxu0 %v2185_v18  ;;  %v2111_v50 = vmax.f32 %v1821_v48, %v1983_v44 }
 0x365   :  { %v1986_v51 = vmul.f32 0.2, %v1827_v14  ;;  %v2112_v31 = vmax.f32 %v1823_v60, %v1984_v53 }
 0x366   :  { %v2113_v9 = vmax.f32 %v1825_v3, %v1985_v12 }
 0x367   :  { %v2114_v54 = vmax.f32 %v1827_v14, %v1986_v51  ;;  %v1830_v29 = vpop.f32.mrb[108].mxu1 }
 0x368   :  { %v1831_v49 = vadd.f32 %v1830_v29, %v5165_v41  ;;  %v1832_v25 = vpop.f32.mrb[109].mxu1  ;;  %v2187_v7 = vpack.c.bf16 %v2113_v9, %v2111_v50 }
 0x369   :  { %v1833_v17 = vadd.f32 %v1832_v25, %v5168_v15  ;;  %v1834_v20 = vpop.f32.mrb[110].mxu1  ;;  %v2188_v0 = vpack.c.bf16 %v2114_v54, %v2112_v31 }
 0x36a   :  { %v1987_v34 = vmul.f32 0.2, %v1831_v49  ;;  %v1835_v40 = vadd.f32 %v1834_v20, %v5165_v41  ;;  %v1836_v11 = vpop.f32.mrb[111].mxu1 }
 0x36b   :  { %v1988_v2 = vmul.f32 0.2, %v1833_v17  ;;  %v1837_v24 = vadd.f32 %v1836_v11, %v5168_v15  ;;  %2697 = vmatprep.mubr.bf16.mxu0 %v2188_v0 }
 0x36c   :  { %v1989_v21 = vmul.f32 0.2, %v1835_v40  ;;  %2698 = vmatmul.mubr.bf16.gmra.mrb[232].mxu0 %v2187_v7  ;;  %v2115_v52 = vmax.f32 %v1831_v49, %v1987_v34 }
 0x36d   :  { %v1990_v57 = vmul.f32 0.2, %v1837_v24  ;;  %v2116_v43 = vmax.f32 %v1833_v17, %v1988_v2 }
 0x36e   :  { %v2117_v28 = vmax.f32 %v1835_v40, %v1989_v21 }
 0x36f   :  { %v2118_v59 = vmax.f32 %v1837_v24, %v1990_v57  ;;  %v1840_v26 = vpop.f32.mrb[112].mxu1  ;;  %v2439_v8 = vpop.f32.mrb[128].mxu0 }
 0x370   :  { %v1841_v16 = vadd.f32 %v1840_v26, %v5165_v41  ;;  %v2440_v36 = vadd.f32 %v2439_v8, %v5341_v63  ;;  %v1842_v32 = vpop.f32.mrb[113].mxu1  ;;  %v2441_v19 = vpop.f32.mrb[129].mxu0  ;;  %v2189_v58 = vpack.c.bf16 %v2117_v28, %v2115_v52 }
 0x371   :  { %v1843_v33 = vadd.f32 %v1842_v32, %v5168_v15  ;;  %v2442_v30 = vadd.f32 %v2441_v19, %v5344_v62  ;;  %v1844_v1 = vpop.f32.mrb[114].mxu1  ;;  %v2443_v42 = vpop.f32.mrb[130].mxu0  ;;  %v2190_v5 = vpack.c.bf16 %v2118_v59, %v2116_v43 }
 0x372   :  { %v1991_v45 = vmul.f32 0.2, %v1841_v16  ;;  %v2758_v27 = vmul.f32 0.2, %v2440_v36  ;;  %v1845_v6 = vadd.f32 %v1844_v1, %v5165_v41  ;;  %v2444_v38 = vadd.f32 %v2443_v42, %v5341_v63  ;;  %v1846_v35 = vpop.f32.mrb[115].mxu1  ;;  %v2445_v4 = vpop.f32.mrb[131].mxu0 }
 0x373   :  { %v1992_v47 = vmul.f32 0.2, %v1843_v33  ;;  %v2759_v22 = vmul.f32 0.2, %v2442_v30  ;;  %v1847_v55 = vadd.f32 %v1846_v35, %v5168_v15  ;;  %v2446_v46 = vadd.f32 %v2445_v4, %v5344_v62  ;;  %2707 = vmatprep.mubr.bf16.mxu0 %v2190_v5 }
 0x374   :  { %v1993_v48 = vmul.f32 0.2, %v1845_v6  ;;  %v2760_v61 = vmul.f32 0.2, %v2444_v38  ;;  %2708 = vmatmul.mubr.bf16.gmra.mrb[236].mxu0 %v2189_v58  ;;  %v2119_v37 = vmax.f32 %v1841_v16, %v1991_v45  ;;  %v2886_v13 = vmax.f32 %v2440_v36, %v2758_v27 }
 0x375   :  { %v1994_v18 = vmul.f32 0.2, %v1847_v55  ;;  %v2761_v60 = vmul.f32 0.2, %v2446_v46  ;;  %v2120_v10 = vmax.f32 %v1843_v33, %v1992_v47  ;;  %v2887_v53 = vmax.f32 %v2442_v30, %v2759_v22 }
 0x376   :  { %v2121_v44 = vmax.f32 %v1845_v6, %v1993_v48  ;;  %v2888_v3 = vmax.f32 %v2444_v38, %v2760_v61 }
 0x377   :  { %v2122_v14 = vmax.f32 %v1847_v55, %v1994_v18  ;;  %v2889_v12 = vmax.f32 %v2446_v46, %v2761_v60  ;;  %v1850_v51 = vpop.f32.mrb[116].mxu1  ;;  %v2449_v50 = vpop.f32.mrb[132].mxu0 }
 0x378   :  { %v5354_v9 = vpack.c.bf16 %v2888_v3, %v2886_v13  ;;  %v1851_v31 = vadd.f32 %v1850_v51, %v5165_v41  ;;  %v2450_v54 = vadd.f32 %v2449_v50, %v5341_v63  ;;  %v1852_v29 = vpop.f32.mrb[117].mxu1  ;;  %v2451_v49 = vpop.f32.mrb[133].mxu0  ;;  %v2191_v25 = vpack.c.bf16 %v2121_v44, %v2119_v37 }
 0x379   :  { %v1853_v7 = vadd.f32 %v1852_v29, %v5168_v15  ;;  %v2452_v17 = vadd.f32 %v2451_v49, %v5344_v62  ;;  %v1854_v20 = vpop.f32.mrb[118].mxu1  ;;  %v2453_v0 = vpop.f32.mrb[134].mxu0  ;;  %v2192_v23 = vpack.c.bf16 %v2122_v14, %v2120_v10  ;;  %v5360_v34 = vpack.c.bf16 %v2889_v12, %v2887_v53 }
 0x37a   :  { %v1995_v40 = vmul.f32 0.2, %v1851_v31  ;;  %v2762_v11 = vmul.f32 0.2, %v2450_v54  ;;  %v1855_v2 = vadd.f32 %v1854_v20, %v5165_v41  ;;  %v2454_v24 = vadd.f32 %v2453_v0, %v5341_v63  ;;  %v1856_v21 = vpop.f32.mrb[119].mxu1  ;;  %v2455_v57 = vpop.f32.mrb[135].mxu0 }
 0x37b   :  { %v1996_v52 = vmul.f32 0.2, %v1853_v7  ;;  %v2763_v28 = vmul.f32 0.2, %v2452_v17  ;;  %v1857_v43 = vadd.f32 %v1856_v21, %v5168_v15  ;;  %v2456_v59 = vadd.f32 %v2455_v57, %v5344_v62  ;;  %2717 = vmatprep.mubr.bf16.mxu0 %v2192_v23 }
 0x37c   :  { %v1997_v26 = vmul.f32 0.2, %v1855_v2  ;;  %v2764_v8 = vmul.f32 0.2, %v2454_v24  ;;  %2718 = vmatmul.mubr.bf16.gmra.mrb[240].mxu0 %v2191_v25  ;;  %v2123_v32 = vmax.f32 %v1851_v31, %v1995_v40  ;;  %v2890_v19 = vmax.f32 %v2450_v54, %v2762_v11 }
 0x37d   :  { %v1998_v16 = vmul.f32 0.2, %v1857_v43  ;;  %v2765_v36 = vmul.f32 0.2, %v2456_v59  ;;  %v2124_v30 = vmax.f32 %v1853_v7, %v1996_v52  ;;  %v2891_v1 = vmax.f32 %v2452_v17, %v2763_v28 }
 0x37e   :  { %v2125_v58 = vmax.f32 %v1855_v2, %v1997_v26  ;;  %v2892_v33 = vmax.f32 %v2454_v24, %v2764_v8 }
 0x37f   :  { %v2126_v42 = vmax.f32 %v1857_v43, %v1998_v16  ;;  %v2893_v5 = vmax.f32 %v2456_v59, %v2765_v36  ;;  %v1860_v45 = vpop.f32.mrb[120].mxu1  ;;  %v2459_v27 = vpop.f32.mrb[136].mxu0 }
 0x380   :  { %v5366_v6 = vpack.c.bf16 %v2892_v33, %v2890_v19  ;;  %v1861_v38 = vadd.f32 %v1860_v45, %v5165_v41  ;;  %v2460_v35 = vadd.f32 %v2459_v27, %v5341_v63  ;;  %v1862_v4 = vpop.f32.mrb[121].mxu1  ;;  %v2461_v47 = vpop.f32.mrb[137].mxu0  ;;  %v2193_v22 = vpack.c.bf16 %v2125_v58, %v2123_v32 }
 0x381   :  { %v1863_v55 = vadd.f32 %v1862_v4, %v5168_v15  ;;  %v2462_v46 = vadd.f32 %v2461_v47, %v5344_v62  ;;  %v1864_v48 = vpop.f32.mrb[122].mxu1  ;;  %v2463_v61 = vpop.f32.mrb[138].mxu0  ;;  %v2194_v18 = vpack.c.bf16 %v2126_v42, %v2124_v30  ;;  %v5372_v60 = vpack.c.bf16 %v2893_v5, %v2891_v1 }
 0x382   :  { %v1999_v37 = vmul.f32 0.2, %v1861_v38  ;;  %v2766_v13 = vmul.f32 0.2, %v2460_v35  ;;  %v1865_v44 = vadd.f32 %v1864_v48, %v5165_v41  ;;  %v2464_v3 = vadd.f32 %v2463_v61, %v5341_v63  ;;  %v1866_v10 = vpop.f32.mrb[123].mxu1  ;;  %v2465_v53 = vpop.f32.mrb[139].mxu0 }
 0x383   :  { %v2000_v14 = vmul.f32 0.2, %v1863_v55  ;;  %v2767_v12 = vmul.f32 0.2, %v2462_v46  ;;  %v1867_v51 = vadd.f32 %v1866_v10, %v5168_v15  ;;  %v2466_v50 = vadd.f32 %v2465_v53, %v5344_v62  ;;  %2727 = vmatprep.mubr.bf16.mxu0 %v2194_v18 }
 0x384   :  { %v2001_v31 = vmul.f32 0.2, %v1865_v44  ;;  %v2768_v54 = vmul.f32 0.2, %v2464_v3  ;;  %2728 = vmatmul.mubr.bf16.gmra.mrb[244].mxu0 %v2193_v22  ;;  %v2127_v25 = vmax.f32 %v1861_v38, %v1999_v37  ;;  %v2894_v7 = vmax.f32 %v2460_v35, %v2766_v13 }
 0x385   :  { %v2002_v29 = vmul.f32 0.2, %v1867_v51  ;;  %v2769_v49 = vmul.f32 0.2, %v2466_v50  ;;  %v2128_v0 = vmax.f32 %v1863_v55, %v2000_v14  ;;  %v2895_v23 = vmax.f32 %v2462_v46, %v2767_v12 }
 0x386   :  { %v2129_v17 = vmax.f32 %v1865_v44, %v2001_v31  ;;  %v2896_v20 = vmax.f32 %v2464_v3, %v2768_v54 }
 0x387   :  { %v2130_v40 = vmax.f32 %v1867_v51, %v2002_v29  ;;  %v2897_v11 = vmax.f32 %v2466_v50, %v2769_v49  ;;  %v1870_v2 = vpop.f32.mrb[124].mxu1  ;;  %v2469_v24 = vpop.f32.mrb[140].mxu0 }
 0x388   :  { %v3018_v21 = vpack.c.bf16 %v2896_v20, %v2894_v7  ;;  %v1871_v57 = vadd.f32 %v1870_v2, %v5165_v41  ;;  %v2470_v52 = vadd.f32 %v2469_v24, %v5341_v63  ;;  %v1872_v28 = vpop.f32.mrb[125].mxu1  ;;  %v2471_v43 = vpop.f32.mrb[141].mxu0  ;;  %v2195_v59 = vpack.c.bf16 %v2129_v17, %v2127_v25 }
 0x389   :  { %v1873_v26 = vadd.f32 %v1872_v28, %v5168_v15  ;;  %v2472_v8 = vadd.f32 %v2471_v43, %v5344_v62  ;;  %v1874_v16 = vpop.f32.mrb[126].mxu1  ;;  %v2473_v36 = vpop.f32.mrb[142].mxu0  ;;  %v2196_v32 = vpack.c.bf16 %v2130_v40, %v2128_v0  ;;  %v3019_v19 = vpack.c.bf16 %v2897_v11, %v2895_v23 }
 0x38a   :  { %v2003_v58 = vmul.f32 0.2, %v1871_v57  ;;  %v2770_v33 = vmul.f32 0.2, %v2470_v52  ;;  %v1875_v30 = vadd.f32 %v1874_v16, %v5165_v41  ;;  %v2474_v1 = vadd.f32 %v2473_v36, %v5341_v63  ;;  %v1876_v42 = vpop.f32.mrb[127].mxu1  ;;  %v2475_v5 = vpop.f32.mrb[143].mxu0 }
 0x38b   :  { %v2004_v45 = vmul.f32 0.2, %v1873_v26  ;;  %v2771_v27 = vmul.f32 0.2, %v2472_v8  ;;  %v1877_v38 = vadd.f32 %v1876_v42, %v5168_v15  ;;  %v2476_v35 = vadd.f32 %v2475_v5, %v5344_v62  ;;  %2737 = vmatprep.mubr.bf16.mxu0 %v2196_v32  ;;  %3336 = vmatprep.mubr.bf16.mxu1 %v3019_v19 }
 0x38c   :  { %v2005_v4 = vmul.f32 0.2, %v1875_v30  ;;  %v2772_v47 = vmul.f32 0.2, %v2474_v1  ;;  %2738 = vmatmul.mubr.bf16.gmra.mrb[248].mxu0 %v2195_v59  ;;  %3337 = vmatmul.mubr.bf16.vlgmr.msra.gmra.mrb[128].mxu1 %v3018_v21  ;;  %v2131_v46 = vmax.f32 %v1871_v57, %v2003_v58  ;;  %v2898_v41 = vmax.f32 %v2470_v52, %v2770_v33 }
 0x38d   :  { %v2006_v22 = vmul.f32 0.2, %v1877_v38  ;;  %v2773_v55 = vmul.f32 0.2, %v2476_v35  ;;  %v2132_v18 = vmax.f32 %v1873_v26, %v2004_v45  ;;  %v2899_v37 = vmax.f32 %v2472_v8, %v2771_v27 }
 0x38e   :  { %v2133_v48 = vmax.f32 %v1875_v30, %v2005_v4  ;;  %v2900_v61 = vmax.f32 %v2474_v1, %v2772_v47 }
 0x38f   :  { %v2134_v13 = vmax.f32 %v1877_v38, %v2006_v22  ;;  %v2901_v44 = vmax.f32 %v2476_v35, %v2773_v55  ;;  %v2479_v3 = vpop.f32.mrb[144].mxu0 }
 0x390   :  { %v2480_v15 = vadd.f32 %v2479_v3, %v5341_v63  ;;  %v2481_v10 = vpop.f32.mrb[145].mxu0  ;;  %v2197_v53 = vpack.c.bf16 %v2133_v48, %v2131_v46  ;;  %v3020_v14 = vpack.c.bf16 %v2900_v61, %v2898_v41 }
 0x391   :  { %v2482_v12 = vadd.f32 %v2481_v10, %v5344_v62  ;;  %v2483_v51 = vpop.f32.mrb[146].mxu0  ;;  %v2198_v50 = vpack.c.bf16 %v2134_v13, %v2132_v18  ;;  %v3021_v31 = vpack.c.bf16 %v2901_v44, %v2899_v37 }
 0x392   :  { %v2774_v54 = vmul.f32 0.2, %v2480_v15  ;;  %v2484_v29 = vadd.f32 %v2483_v51, %v5341_v63  ;;  %v2485_v49 = vpop.f32.mrb[147].mxu0 }
 0x393   :  { %v2775_v25 = vmul.f32 0.2, %v2482_v12  ;;  %v2486_v7 = vadd.f32 %v2485_v49, %v5344_v62  ;;  %2747 = vmatprep.mubr.bf16.mxu0 %v2198_v50  ;;  %3346 = vmatprep.mubr.bf16.mxu1 %v3021_v31 }
 0x394   :  { %v2776_v17 = vmul.f32 0.2, %v2484_v29  ;;  %2748 = vmatmul.mubr.bf16.gmra.mrb[252].mxu0 %v2197_v53  ;;  %3347 = vmatmul.mubr.bf16.gmra.mrb[132].mxu1 %v3020_v14  ;;  %v2902_v0 = vmax.f32 %v2480_v15, %v2774_v54 }
 0x395   :  { %v2777_v20 = vmul.f32 0.2, %v2486_v7  ;;  %3316 = vmatprep.mubr.bf16.mxu0 %v5360_v34  ;;  %v2903_v40 = vmax.f32 %v2482_v12, %v2775_v25 }
 0x396   :  { %v2904_v23 = vmax.f32 %v2484_v29, %v2776_v17 }
 0x397   :  { %v2905_v11 = vmax.f32 %v2486_v7, %v2777_v20  ;;  %v2489_v2 = vpop.f32.mrb[148].mxu0 }
 0x398   :  { %v2490_v24 = vadd.f32 %v2489_v2, %v5341_v63  ;;  %v2491_v21 = vpop.f32.mrb[149].mxu0  ;;  %v3022_v57 = vpack.c.bf16 %v2904_v23, %v2902_v0 }
 0x399   :  { %v2492_v52 = vadd.f32 %v2491_v21, %v5344_v62  ;;  %v2493_v28 = vpop.f32.mrb[150].mxu0  ;;  %v3023_v43 = vpack.c.bf16 %v2905_v11, %v2903_v40 }
 0x39a   :  { %v2778_v59 = vmul.f32 0.2, %v2490_v24  ;;  %v2494_v26 = vadd.f32 %v2493_v28, %v5341_v63  ;;  %v2495_v8 = vpop.f32.mrb[151].mxu0 }
 0x39b   :  { %v2779_v16 = vmul.f32 0.2, %v2492_v52  ;;  %v2496_v34 = vadd.f32 %v2495_v8, %v5344_v62  ;;  %3356 = vmatprep.mubr.bf16.mxu1 %v3023_v43 }
 0x39c   :  { %v2780_v36 = vmul.f32 0.2, %v2494_v26  ;;  %3317 = vmatmul.mubr.bf16.vlgmr.msra.gmra.mrb[0].mxu0 %v5354_v9  ;;  %3357 = vmatmul.mubr.bf16.gmra.mrb[136].mxu1 %v3022_v57  ;;  %v2906_v19 = vmax.f32 %v2490_v24, %v2778_v59 }
 0x39d   :  { %v2781_v32 = vmul.f32 0.2, %v2496_v34  ;;  %3326 = vmatprep.mubr.bf16.mxu0 %v5372_v60  ;;  %v2907_v33 = vmax.f32 %v2492_v52, %v2779_v16 }
 0x39e   :  { %v2908_v58 = vmax.f32 %v2494_v26, %v2780_v36 }
 0x39f   :  { %v2909_v30 = vmax.f32 %v2496_v34, %v2781_v32  ;;  %v2499_v1 = vpop.f32.mrb[152].mxu0 }
 0x3a0   :  { %v2500_v42 = vadd.f32 %v2499_v1, %v5341_v63  ;;  %v2501_v5 = vpop.f32.mrb[153].mxu0  ;;  %v3024_v45 = vpack.c.bf16 %v2908_v58, %v2906_v19 }
 0x3a1   :  { %v2502_v27 = vadd.f32 %v2501_v5, %v5344_v62  ;;  %v2503_v38 = vpop.f32.mrb[154].mxu0  ;;  %v3025_v35 = vpack.c.bf16 %v2909_v30, %v2907_v33 }
 0x3a2   :  { %v2782_v4 = vmul.f32 0.2, %v2500_v42  ;;  %v2504_v9 = vadd.f32 %v2503_v38, %v5341_v63  ;;  %v2505_v47 = vpop.f32.mrb[155].mxu0 }
 0x3a3   :  { %v2783_v22 = vmul.f32 0.2, %v2502_v27  ;;  %v2506_v60 = vadd.f32 %v2505_v47, %v5344_v62  ;;  %3366 = vmatprep.mubr.bf16.mxu1 %v3025_v35 }
 0x3a4   :  { %v2784_v55 = vmul.f32 0.2, %v2504_v9  ;;  %3327 = vmatmul.mubr.bf16.gmra.mrb[4].mxu0 %v5366_v6  ;;  %3367 = vmatmul.mubr.bf16.gmra.mrb[140].mxu1 %v3024_v45  ;;  %v2910_v41 = vmax.f32 %v2500_v42, %v2782_v4 }
 0x3a5   :  { %v2785_v46 = vmul.f32 0.2, %v2506_v60  ;;  %v2911_v61 = vmax.f32 %v2502_v27, %v2783_v22 }
 0x3a6   :  { %v2912_v48 = vmax.f32 %v2504_v9, %v2784_v55 }
 0x3a7   :  { %v2913_v18 = vmax.f32 %v2506_v60, %v2785_v46  ;;  %v2509_v37 = vpop.f32.mrb[156].mxu0 }
 0x3a8   :  { %v2510_v13 = vadd.f32 %v2509_v37, %v5341_v63  ;;  %v2511_v44 = vpop.f32.mrb[157].mxu0  ;;  %v3026_v3 = vpack.c.bf16 %v2912_v48, %v2910_v41 }
 0x3a9   :  { %v2512_v15 = vadd.f32 %v2511_v44, %v5344_v62  ;;  %v2513_v10 = vpop.f32.mrb[158].mxu0  ;;  %v3027_v53 = vpack.c.bf16 %v2913_v18, %v2911_v61 }
 0x3aa   :  { %v2786_v14 = vmul.f32 0.2, %v2510_v13  ;;  %v2514_v12 = vadd.f32 %v2513_v10, %v5341_v63  ;;  %v2515_v51 = vpop.f32.mrb[159].mxu0 }
 0x3ab   :  { %v2787_v6 = vmul.f32 0.2, %v2512_v15  ;;  %v2516_v50 = vadd.f32 %v2515_v51, %v5344_v62  ;;  %3376 = vmatprep.mubr.bf16.mxu1 %v3027_v53 }
 0x3ac   :  { %v2788_v31 = vmul.f32 0.2, %v2514_v12  ;;  %3377 = vmatmul.mubr.bf16.gmra.mrb[144].mxu1 %v3026_v3  ;;  %v2914_v29 = vmax.f32 %v2510_v13, %v2786_v14 }
 0x3ad   :  { %v2789_v54 = vmul.f32 0.2, %v2516_v50  ;;  %v2915_v25 = vmax.f32 %v2512_v15, %v2787_v6 }
 0x3ae   :  { %v2916_v49 = vmax.f32 %v2514_v12, %v2788_v31 }
 0x3af   :  { %v2917_v7 = vmax.f32 %v2516_v50, %v2789_v54  ;;  %v2519_v17 = vpop.f32.mrb[160].mxu0 }
 0x3b0   :  { %v2520_v20 = vadd.f32 %v2519_v17, %v5341_v63  ;;  %v2521_v0 = vpop.f32.mrb[161].mxu0  ;;  %v3028_v23 = vpack.c.bf16 %v2916_v49, %v2914_v29 }
 0x3b1   :  { %v2522_v40 = vadd.f32 %v2521_v0, %v5344_v62  ;;  %v2523_v11 = vpop.f32.mrb[162].mxu0  ;;  %v3029_v2 = vpack.c.bf16 %v2917_v7, %v2915_v25 }
 0x3b2   :  { %v2790_v24 = vmul.f32 0.2, %v2520_v20  ;;  %v2524_v21 = vadd.f32 %v2523_v11, %v5341_v63  ;;  %v2525_v57 = vpop.f32.mrb[163].mxu0 }
 0x3b3   :  { %v2791_v52 = vmul.f32 0.2, %v2522_v40  ;;  %v2526_v28 = vadd.f32 %v2525_v57, %v5344_v62  ;;  %3386 = vmatprep.mubr.bf16.mxu1 %v3029_v2 }
 0x3b4   :  { %v2792_v43 = vmul.f32 0.2, %v2524_v21  ;;  %3387 = vmatmul.mubr.bf16.gmra.mrb[148].mxu1 %v3028_v23  ;;  %v2918_v26 = vmax.f32 %v2520_v20, %v2790_v24 }
 0x3b5   :  { %v2793_v59 = vmul.f32 0.2, %v2526_v28  ;;  %v2919_v16 = vmax.f32 %v2522_v40, %v2791_v52 }
 0x3b6   :  { %v2920_v8 = vmax.f32 %v2524_v21, %v2792_v43 }
 0x3b7   :  { %v2921_v34 = vmax.f32 %v2526_v28, %v2793_v59  ;;  %v2529_v36 = vpop.f32.mrb[164].mxu0 }
 0x3b8   :  { %v2530_v32 = vadd.f32 %v2529_v36, %v5341_v63  ;;  %v2531_v19 = vpop.f32.mrb[165].mxu0  ;;  %v3030_v58 = vpack.c.bf16 %v2920_v8, %v2918_v26 }
 0x3b9   :  { %v2532_v33 = vadd.f32 %v2531_v19, %v5344_v62  ;;  %v2533_v30 = vpop.f32.mrb[166].mxu0  ;;  %v3031_v1 = vpack.c.bf16 %v2921_v34, %v2919_v16 }
 0x3ba   :  { %v2794_v42 = vmul.f32 0.2, %v2530_v32  ;;  %v2534_v5 = vadd.f32 %v2533_v30, %v5341_v63  ;;  %v2535_v45 = vpop.f32.mrb[167].mxu0 }
 0x3bb   :  { %v2795_v27 = vmul.f32 0.2, %v2532_v33  ;;  %v2536_v38 = vadd.f32 %v2535_v45, %v5344_v62  ;;  %3396 = vmatprep.mubr.bf16.mxu1 %v3031_v1 }
 0x3bc   :  { %v2796_v35 = vmul.f32 0.2, %v2534_v5  ;;  %3397 = vmatmul.mubr.bf16.gmra.mrb[152].mxu1 %v3030_v58  ;;  %v2922_v9 = vmax.f32 %v2530_v32, %v2794_v42 }
 0x3bd   :  { %v2797_v4 = vmul.f32 0.2, %v2536_v38  ;;  %v2923_v22 = vmax.f32 %v2532_v33, %v2795_v27 }
 0x3be   :  { %v2924_v47 = vmax.f32 %v2534_v5, %v2796_v35 }
 0x3bf   :  { %v2925_v60 = vmax.f32 %v2536_v38, %v2797_v4  ;;  %v2539_v55 = vpop.f32.mrb[168].mxu0 }
 0x3c0   :  { %v2540_v46 = vadd.f32 %v2539_v55, %v5341_v63  ;;  %v2541_v41 = vpop.f32.mrb[169].mxu0  ;;  %v3032_v48 = vpack.c.bf16 %v2924_v47, %v2922_v9 }
 0x3c1   :  { %v2542_v61 = vadd.f32 %v2541_v41, %v5344_v62  ;;  %v2543_v18 = vpop.f32.mrb[170].mxu0  ;;  %v3033_v37 = vpack.c.bf16 %v2925_v60, %v2923_v22 }
 0x3c2   :  { %v2798_v13 = vmul.f32 0.2, %v2540_v46  ;;  %v2544_v44 = vadd.f32 %v2543_v18, %v5341_v63  ;;  %v2545_v3 = vpop.f32.mrb[171].mxu0 }
 0x3c3   :  { %v2799_v15 = vmul.f32 0.2, %v2542_v61  ;;  %v2546_v10 = vadd.f32 %v2545_v3, %v5344_v62  ;;  %3406 = vmatprep.mubr.bf16.mxu1 %v3033_v37 }
 0x3c4   :  { %v2800_v53 = vmul.f32 0.2, %v2544_v44  ;;  %3407 = vmatmul.mubr.bf16.gmra.mrb[156].mxu1 %v3032_v48  ;;  %v2926_v12 = vmax.f32 %v2540_v46, %v2798_v13 }
 0x3c5   :  { %v2801_v14 = vmul.f32 0.2, %v2546_v10  ;;  %v2927_v6 = vmax.f32 %v2542_v61, %v2799_v15 }
 0x3c6   :  { %v2928_v51 = vmax.f32 %v2544_v44, %v2800_v53 }
 0x3c7   :  { %v2929_v50 = vmax.f32 %v2546_v10, %v2801_v14  ;;  %v2549_v31 = vpop.f32.mrb[172].mxu0 }
 0x3c8   :  { %v2550_v54 = vadd.f32 %v2549_v31, %v5341_v63  ;;  %v2551_v29 = vpop.f32.mrb[173].mxu0  ;;  %v3034_v49 = vpack.c.bf16 %v2928_v51, %v2926_v12 }
 0x3c9   :  { %v2552_v25 = vadd.f32 %v2551_v29, %v5344_v62  ;;  %v2553_v7 = vpop.f32.mrb[174].mxu0  ;;  %v3035_v17 = vpack.c.bf16 %v2929_v50, %v2927_v6 }
 0x3ca   :  { %v2802_v20 = vmul.f32 0.2, %v2550_v54  ;;  %v2554_v0 = vadd.f32 %v2553_v7, %v5341_v63  ;;  %v2555_v23 = vpop.f32.mrb[175].mxu0 }
 0x3cb   :  { %v2803_v40 = vmul.f32 0.2, %v2552_v25  ;;  %v2556_v11 = vadd.f32 %v2555_v23, %v5344_v62  ;;  %3416 = vmatprep.mubr.bf16.mxu1 %v3035_v17 }
 0x3cc   :  { %v2804_v2 = vmul.f32 0.2, %v2554_v0  ;;  %3417 = vmatmul.mubr.bf16.gmra.mrb[160].mxu1 %v3034_v49  ;;  %v2930_v21 = vmax.f32 %v2550_v54, %v2802_v20 }
 0x3cd   :  { %v2805_v24 = vmul.f32 0.2, %v2556_v11  ;;  %v2931_v52 = vmax.f32 %v2552_v25, %v2803_v40 }
 0x3ce   :  { %v2932_v57 = vmax.f32 %v2554_v0, %v2804_v2 }
 0x3cf   :  { %v2933_v28 = vmax.f32 %v2556_v11, %v2805_v24  ;;  %v2559_v43 = vpop.f32.mrb[176].mxu0 }
 0x3d0   :  { %v2560_v59 = vadd.f32 %v2559_v43, %v5341_v63  ;;  %v2561_v26 = vpop.f32.mrb[177].mxu0  ;;  %v3036_v8 = vpack.c.bf16 %v2932_v57, %v2930_v21 }
 0x3d1   :  { %v2562_v16 = vadd.f32 %v2561_v26, %v5344_v62  ;;  %v2563_v34 = vpop.f32.mrb[178].mxu0  ;;  %v3037_v36 = vpack.c.bf16 %v2933_v28, %v2931_v52 }
 0x3d2   :  { %v2806_v32 = vmul.f32 0.2, %v2560_v59  ;;  %v2564_v19 = vadd.f32 %v2563_v34, %v5341_v63  ;;  %v2565_v58 = vpop.f32.mrb[179].mxu0 }
 0x3d3   :  { %v2807_v33 = vmul.f32 0.2, %v2562_v16  ;;  %v2566_v30 = vadd.f32 %v2565_v58, %v5344_v62  ;;  %3426 = vmatprep.mubr.bf16.mxu1 %v3037_v36 }
 0x3d4   :  { %v2808_v1 = vmul.f32 0.2, %v2564_v19  ;;  %3427 = vmatmul.mubr.bf16.gmra.mrb[164].mxu1 %v3036_v8  ;;  %v2934_v5 = vmax.f32 %v2560_v59, %v2806_v32 }
 0x3d5   :  { %v2809_v42 = vmul.f32 0.2, %v2566_v30  ;;  %v2935_v27 = vmax.f32 %v2562_v16, %v2807_v33 }
 0x3d6   :  { %v2936_v45 = vmax.f32 %v2564_v19, %v2808_v1 }
 0x3d7   :  { %v2937_v38 = vmax.f32 %v2566_v30, %v2809_v42  ;;  %v2569_v35 = vpop.f32.mrb[180].mxu0 }
 0x3d8   :  { %v2570_v4 = vadd.f32 %v2569_v35, %v5341_v63  ;;  %v2571_v9 = vpop.f32.mrb[181].mxu0  ;;  %v3038_v47 = vpack.c.bf16 %v2936_v45, %v2934_v5 }
 0x3d9   :  { %v2572_v22 = vadd.f32 %v2571_v9, %v5344_v62  ;;  %v2573_v60 = vpop.f32.mrb[182].mxu0  ;;  %v3039_v55 = vpack.c.bf16 %v2937_v38, %v2935_v27 }
 0x3da   :  { %v2810_v46 = vmul.f32 0.2, %v2570_v4  ;;  %v2574_v41 = vadd.f32 %v2573_v60, %v5341_v63  ;;  %v2575_v48 = vpop.f32.mrb[183].mxu0 }
 0x3db   :  { %v2811_v61 = vmul.f32 0.2, %v2572_v22  ;;  %v2576_v18 = vadd.f32 %v2575_v48, %v5344_v62  ;;  %3436 = vmatprep.mubr.bf16.mxu1 %v3039_v55 }
 0x3dc   :  { %v2812_v37 = vmul.f32 0.2, %v2574_v41  ;;  %3437 = vmatmul.mubr.bf16.gmra.mrb[168].mxu1 %v3038_v47  ;;  %v2938_v44 = vmax.f32 %v2570_v4, %v2810_v46 }
 0x3dd   :  { %v2813_v13 = vmul.f32 0.2, %v2576_v18  ;;  %v2939_v15 = vmax.f32 %v2572_v22, %v2811_v61 }
 0x3de   :  { %v2940_v3 = vmax.f32 %v2574_v41, %v2812_v37 }
 0x3df   :  { %v2941_v10 = vmax.f32 %v2576_v18, %v2813_v13  ;;  %v2579_v53 = vpop.f32.mrb[184].mxu0 }
 0x3e0   :  { %v2580_v14 = vadd.f32 %v2579_v53, %v5341_v63  ;;  %v2581_v12 = vpop.f32.mrb[185].mxu0  ;;  %v3040_v51 = vpack.c.bf16 %v2940_v3, %v2938_v44 }
 0x3e1   :  { %v2582_v6 = vadd.f32 %v2581_v12, %v5344_v62  ;;  %v2583_v50 = vpop.f32.mrb[186].mxu0  ;;  %v3041_v31 = vpack.c.bf16 %v2941_v10, %v2939_v15 }
 0x3e2   :  { %v2814_v54 = vmul.f32 0.2, %v2580_v14  ;;  %v2584_v29 = vadd.f32 %v2583_v50, %v5341_v63  ;;  %v2585_v49 = vpop.f32.mrb[187].mxu0 }
 0x3e3   :  { %v2815_v25 = vmul.f32 0.2, %v2582_v6  ;;  %v2586_v7 = vadd.f32 %v2585_v49, %v5344_v62  ;;  %3446 = vmatprep.mubr.bf16.mxu1 %v3041_v31 }
 0x3e4   :  { %v2816_v17 = vmul.f32 0.2, %v2584_v29  ;;  %3447 = vmatmul.mubr.bf16.gmra.mrb[172].mxu1 %v3040_v51  ;;  %v2942_v0 = vmax.f32 %v2580_v14, %v2814_v54 }
 0x3e5   :  { %v2817_v20 = vmul.f32 0.2, %v2586_v7  ;;  %v2943_v40 = vmax.f32 %v2582_v6, %v2815_v25 }
 0x3e6   :  { %v2944_v23 = vmax.f32 %v2584_v29, %v2816_v17 }
 0x3e7   :  { %v2945_v11 = vmax.f32 %v2586_v7, %v2817_v20  ;;  %v2589_v2 = vpop.f32.mrb[188].mxu0 }
 0x3e8   :  { %v2590_v24 = vadd.f32 %v2589_v2, %v5341_v63  ;;  %v2591_v21 = vpop.f32.mrb[189].mxu0  ;;  %v3042_v57 = vpack.c.bf16 %v2944_v23, %v2942_v0 }
 0x3e9   :  { %v2592_v52 = vadd.f32 %v2591_v21, %v5344_v62  ;;  %v2593_v28 = vpop.f32.mrb[190].mxu0  ;;  %v3043_v43 = vpack.c.bf16 %v2945_v11, %v2943_v40 }
 0x3ea   :  { %v2818_v59 = vmul.f32 0.2, %v2590_v24  ;;  %v2594_v26 = vadd.f32 %v2593_v28, %v5341_v63  ;;  %v2595_v8 = vpop.f32.mrb[191].mxu0 }
 0x3eb   :  { %v2819_v16 = vmul.f32 0.2, %v2592_v52  ;;  %v2596_v34 = vadd.f32 %v2595_v8, %v5344_v62  ;;  %3456 = vmatprep.mubr.bf16.mxu1 %v3043_v43 }
 0x3ec   :  { %v2820_v36 = vmul.f32 0.2, %v2594_v26  ;;  %3457 = vmatmul.mubr.bf16.gmra.mrb[176].mxu1 %v3042_v57  ;;  %v2946_v19 = vmax.f32 %v2590_v24, %v2818_v59 }
 0x3ed   :  { %v2821_v32 = vmul.f32 0.2, %v2596_v34  ;;  %v2947_v33 = vmax.f32 %v2592_v52, %v2819_v16 }
 0x3ee   :  { %v2948_v58 = vmax.f32 %v2594_v26, %v2820_v36 }
 0x3ef   :  { %v2949_v30 = vmax.f32 %v2596_v34, %v2821_v32  ;;  %v2599_v1 = vpop.f32.mrb[192].mxu0 }
 0x3f0   :  { %v2600_v42 = vadd.f32 %v2599_v1, %v5341_v63  ;;  %v2601_v5 = vpop.f32.mrb[193].mxu0  ;;  %v3044_v45 = vpack.c.bf16 %v2948_v58, %v2946_v19 }
 0x3f1   :  { %v2602_v27 = vadd.f32 %v2601_v5, %v5344_v62  ;;  %v2603_v38 = vpop.f32.mrb[194].mxu0  ;;  %v3045_v35 = vpack.c.bf16 %v2949_v30, %v2947_v33 }
 0x3f2   :  { %v2822_v4 = vmul.f32 0.2, %v2600_v42  ;;  %v2604_v9 = vadd.f32 %v2603_v38, %v5341_v63  ;;  %v2605_v47 = vpop.f32.mrb[195].mxu0 }
 0x3f3   :  { %v2823_v22 = vmul.f32 0.2, %v2602_v27  ;;  %v2606_v60 = vadd.f32 %v2605_v47, %v5344_v62  ;;  %3466 = vmatprep.mubr.bf16.mxu1 %v3045_v35 }
 0x3f4   :  { %v2824_v55 = vmul.f32 0.2, %v2604_v9  ;;  %3467 = vmatmul.mubr.bf16.gmra.mrb[180].mxu1 %v3044_v45  ;;  %v2950_v41 = vmax.f32 %v2600_v42, %v2822_v4 }
 0x3f5   :  { %v2825_v46 = vmul.f32 0.2, %v2606_v60  ;;  %v2951_v61 = vmax.f32 %v2602_v27, %v2823_v22 }
 0x3f6   :  { %v2952_v48 = vmax.f32 %v2604_v9, %v2824_v55 }
 0x3f7   :  { %v2953_v18 = vmax.f32 %v2606_v60, %v2825_v46  ;;  %v2609_v37 = vpop.f32.mrb[196].mxu0 }
 0x3f8   :  { %v2610_v13 = vadd.f32 %v2609_v37, %v5341_v63  ;;  %v2611_v44 = vpop.f32.mrb[197].mxu0  ;;  %v3046_v3 = vpack.c.bf16 %v2952_v48, %v2950_v41 }
 0x3f9   :  { %v2612_v15 = vadd.f32 %v2611_v44, %v5344_v62  ;;  %v2613_v10 = vpop.f32.mrb[198].mxu0  ;;  %v3047_v53 = vpack.c.bf16 %v2953_v18, %v2951_v61 }
 0x3fa   :  { %v2826_v14 = vmul.f32 0.2, %v2610_v13  ;;  %v2614_v12 = vadd.f32 %v2613_v10, %v5341_v63  ;;  %v2615_v51 = vpop.f32.mrb[199].mxu0 }
 0x3fb   :  { %v2827_v6 = vmul.f32 0.2, %v2612_v15  ;;  %v2616_v50 = vadd.f32 %v2615_v51, %v5344_v62  ;;  %3476 = vmatprep.mubr.bf16.mxu1 %v3047_v53 }
 0x3fc   :  { %v2828_v31 = vmul.f32 0.2, %v2614_v12  ;;  %3477 = vmatmul.mubr.bf16.gmra.mrb[184].mxu1 %v3046_v3  ;;  %v2954_v29 = vmax.f32 %v2610_v13, %v2826_v14 }
 0x3fd   :  { %v2829_v54 = vmul.f32 0.2, %v2616_v50  ;;  %v2955_v25 = vmax.f32 %v2612_v15, %v2827_v6 }
 0x3fe   :  { %v2956_v49 = vmax.f32 %v2614_v12, %v2828_v31 }
 0x3ff   :  { %v2957_v7 = vmax.f32 %v2616_v50, %v2829_v54  ;;  %v2619_v17 = vpop.f32.mrb[200].mxu0 }
 0x400   :  { %v2620_v20 = vadd.f32 %v2619_v17, %v5341_v63  ;;  %v2621_v0 = vpop.f32.mrb[201].mxu0  ;;  %v3048_v23 = vpack.c.bf16 %v2956_v49, %v2954_v29 }
 0x401   :  { %v2622_v40 = vadd.f32 %v2621_v0, %v5344_v62  ;;  %v2623_v11 = vpop.f32.mrb[202].mxu0  ;;  %v3049_v2 = vpack.c.bf16 %v2957_v7, %v2955_v25 }
 0x402   :  { %v2830_v24 = vmul.f32 0.2, %v2620_v20  ;;  %v2624_v21 = vadd.f32 %v2623_v11, %v5341_v63  ;;  %v2625_v57 = vpop.f32.mrb[203].mxu0 }
 0x403   :  { %v2831_v52 = vmul.f32 0.2, %v2622_v40  ;;  %v2626_v28 = vadd.f32 %v2625_v57, %v5344_v62  ;;  %3486 = vmatprep.mubr.bf16.mxu1 %v3049_v2 }
 0x404   :  { %v2832_v43 = vmul.f32 0.2, %v2624_v21  ;;  %3487 = vmatmul.mubr.bf16.gmra.mrb[188].mxu1 %v3048_v23  ;;  %v2958_v26 = vmax.f32 %v2620_v20, %v2830_v24 }
 0x405   :  { %v2833_v59 = vmul.f32 0.2, %v2626_v28  ;;  %v2959_v16 = vmax.f32 %v2622_v40, %v2831_v52 }
 0x406   :  { %v2960_v8 = vmax.f32 %v2624_v21, %v2832_v43 }
 0x407   :  { %v2961_v34 = vmax.f32 %v2626_v28, %v2833_v59  ;;  %v2629_v36 = vpop.f32.mrb[204].mxu0 }
 0x408   :  { %v2630_v32 = vadd.f32 %v2629_v36, %v5341_v63  ;;  %v2631_v19 = vpop.f32.mrb[205].mxu0  ;;  %v3050_v58 = vpack.c.bf16 %v2960_v8, %v2958_v26 }
 0x409   :  { %v2632_v33 = vadd.f32 %v2631_v19, %v5344_v62  ;;  %v2633_v30 = vpop.f32.mrb[206].mxu0  ;;  %v3051_v1 = vpack.c.bf16 %v2961_v34, %v2959_v16 }
 0x40a   :  { %v2834_v42 = vmul.f32 0.2, %v2630_v32  ;;  %v2634_v5 = vadd.f32 %v2633_v30, %v5341_v63  ;;  %v2635_v45 = vpop.f32.mrb[207].mxu0 }
 0x40b   :  { %v2835_v27 = vmul.f32 0.2, %v2632_v33  ;;  %v2636_v38 = vadd.f32 %v2635_v45, %v5344_v62  ;;  %3496 = vmatprep.mubr.bf16.mxu1 %v3051_v1 }
 0x40c   :  { %v2836_v35 = vmul.f32 0.2, %v2634_v5  ;;  %3497 = vmatmul.mubr.bf16.gmra.mrb[192].mxu1 %v3050_v58  ;;  %v2962_v9 = vmax.f32 %v2630_v32, %v2834_v42 }
 0x40d   :  { %v2837_v4 = vmul.f32 0.2, %v2636_v38  ;;  %v2963_v22 = vmax.f32 %v2632_v33, %v2835_v27 }
 0x40e   :  { %v2964_v47 = vmax.f32 %v2634_v5, %v2836_v35 }
 0x40f   :  { %v2965_v60 = vmax.f32 %v2636_v38, %v2837_v4  ;;  %v2639_v55 = vpop.f32.mrb[208].mxu0 }
 0x410   :  { %v2640_v46 = vadd.f32 %v2639_v55, %v5341_v63  ;;  %v2641_v41 = vpop.f32.mrb[209].mxu0  ;;  %v3052_v48 = vpack.c.bf16 %v2964_v47, %v2962_v9 }
 0x411   :  { %v2642_v61 = vadd.f32 %v2641_v41, %v5344_v62  ;;  %v2643_v18 = vpop.f32.mrb[210].mxu0  ;;  %v3053_v37 = vpack.c.bf16 %v2965_v60, %v2963_v22 }
 0x412   :  { %v2838_v13 = vmul.f32 0.2, %v2640_v46  ;;  %v2644_v44 = vadd.f32 %v2643_v18, %v5341_v63  ;;  %v2645_v3 = vpop.f32.mrb[211].mxu0 }
 0x413   :  { %v2839_v15 = vmul.f32 0.2, %v2642_v61  ;;  %v2646_v10 = vadd.f32 %v2645_v3, %v5344_v62  ;;  %3506 = vmatprep.mubr.bf16.mxu1 %v3053_v37 }
 0x414   :  { %v2840_v53 = vmul.f32 0.2, %v2644_v44  ;;  %3507 = vmatmul.mubr.bf16.gmra.mrb[196].mxu1 %v3052_v48  ;;  %v2966_v12 = vmax.f32 %v2640_v46, %v2838_v13 }
 0x415   :  { %v2841_v14 = vmul.f32 0.2, %v2646_v10  ;;  %v2967_v6 = vmax.f32 %v2642_v61, %v2839_v15 }
 0x416   :  { %v2968_v51 = vmax.f32 %v2644_v44, %v2840_v53 }
 0x417   :  { %v2969_v50 = vmax.f32 %v2646_v10, %v2841_v14  ;;  %v2649_v31 = vpop.f32.mrb[212].mxu0 }
 0x418   :  { %v2650_v54 = vadd.f32 %v2649_v31, %v5341_v63  ;;  %v2651_v29 = vpop.f32.mrb[213].mxu0  ;;  %v3054_v49 = vpack.c.bf16 %v2968_v51, %v2966_v12 }
 0x419   :  { %v2652_v25 = vadd.f32 %v2651_v29, %v5344_v62  ;;  %v2653_v7 = vpop.f32.mrb[214].mxu0  ;;  %v3055_v17 = vpack.c.bf16 %v2969_v50, %v2967_v6 }
 0x41a   :  { %v2842_v20 = vmul.f32 0.2, %v2650_v54  ;;  %v2654_v0 = vadd.f32 %v2653_v7, %v5341_v63  ;;  %v2655_v23 = vpop.f32.mrb[215].mxu0 }
 0x41b   :  { %v2843_v40 = vmul.f32 0.2, %v2652_v25  ;;  %v2656_v11 = vadd.f32 %v2655_v23, %v5344_v62  ;;  %3516 = vmatprep.mubr.bf16.mxu1 %v3055_v17 }
 0x41c   :  { %v2844_v2 = vmul.f32 0.2, %v2654_v0  ;;  %3517 = vmatmul.mubr.bf16.gmra.mrb[200].mxu1 %v3054_v49  ;;  %v2970_v21 = vmax.f32 %v2650_v54, %v2842_v20 }
 0x41d   :  { %v2845_v24 = vmul.f32 0.2, %v2656_v11  ;;  %v2971_v52 = vmax.f32 %v2652_v25, %v2843_v40 }
 0x41e   :  { %v2972_v57 = vmax.f32 %v2654_v0, %v2844_v2 }
 0x41f   :  { %v2973_v28 = vmax.f32 %v2656_v11, %v2845_v24  ;;  %v2659_v43 = vpop.f32.mrb[216].mxu0 }
 0x420   :  { %v2660_v59 = vadd.f32 %v2659_v43, %v5341_v63  ;;  %v2661_v26 = vpop.f32.mrb[217].mxu0  ;;  %v3056_v8 = vpack.c.bf16 %v2972_v57, %v2970_v21 }
 0x421   :  { %v2662_v16 = vadd.f32 %v2661_v26, %v5344_v62  ;;  %v2663_v34 = vpop.f32.mrb[218].mxu0  ;;  %v3057_v36 = vpack.c.bf16 %v2973_v28, %v2971_v52 }
 0x422   :  { %v2846_v32 = vmul.f32 0.2, %v2660_v59  ;;  %v2664_v19 = vadd.f32 %v2663_v34, %v5341_v63  ;;  %v2665_v58 = vpop.f32.mrb[219].mxu0 }
 0x423   :  { %v2847_v33 = vmul.f32 0.2, %v2662_v16  ;;  %v2666_v30 = vadd.f32 %v2665_v58, %v5344_v62  ;;  %3526 = vmatprep.mubr.bf16.mxu1 %v3057_v36 }
 0x424   :  { %v2848_v1 = vmul.f32 0.2, %v2664_v19  ;;  %3527 = vmatmul.mubr.bf16.gmra.mrb[204].mxu1 %v3056_v8  ;;  %v2974_v5 = vmax.f32 %v2660_v59, %v2846_v32 }
 0x425   :  { %v2849_v42 = vmul.f32 0.2, %v2666_v30  ;;  %v2975_v27 = vmax.f32 %v2662_v16, %v2847_v33 }
 0x426   :  { %v2976_v45 = vmax.f32 %v2664_v19, %v2848_v1 }
 0x427   :  { %v2977_v38 = vmax.f32 %v2666_v30, %v2849_v42  ;;  %v2669_v35 = vpop.f32.mrb[220].mxu0 }
 0x428   :  { %v2670_v4 = vadd.f32 %v2669_v35, %v5341_v63  ;;  %v2671_v9 = vpop.f32.mrb[221].mxu0  ;;  %v3058_v47 = vpack.c.bf16 %v2976_v45, %v2974_v5 }
 0x429   :  { %v2672_v22 = vadd.f32 %v2671_v9, %v5344_v62  ;;  %v2673_v60 = vpop.f32.mrb[222].mxu0  ;;  %v3059_v55 = vpack.c.bf16 %v2977_v38, %v2975_v27 }
 0x42a   :  { %v2850_v46 = vmul.f32 0.2, %v2670_v4  ;;  %v2674_v41 = vadd.f32 %v2673_v60, %v5341_v63  ;;  %v2675_v48 = vpop.f32.mrb[223].mxu0 }
 0x42b   :  { %v2851_v61 = vmul.f32 0.2, %v2672_v22  ;;  %v2676_v18 = vadd.f32 %v2675_v48, %v5344_v62  ;;  %3536 = vmatprep.mubr.bf16.mxu1 %v3059_v55 }
 0x42c   :  { %v2852_v37 = vmul.f32 0.2, %v2674_v41  ;;  %3537 = vmatmul.mubr.bf16.gmra.mrb[208].mxu1 %v3058_v47  ;;  %v2978_v44 = vmax.f32 %v2670_v4, %v2850_v46 }
 0x42d   :  { %v2853_v13 = vmul.f32 0.2, %v2676_v18  ;;  %v2979_v15 = vmax.f32 %v2672_v22, %v2851_v61 }
 0x42e   :  { %v2980_v3 = vmax.f32 %v2674_v41, %v2852_v37 }
 0x42f   :  { %v2981_v10 = vmax.f32 %v2676_v18, %v2853_v13  ;;  %v2679_v53 = vpop.f32.mrb[224].mxu0 }
 0x430   :  { %v2680_v14 = vadd.f32 %v2679_v53, %v5341_v63  ;;  %v2681_v12 = vpop.f32.mrb[225].mxu0  ;;  %v3060_v51 = vpack.c.bf16 %v2980_v3, %v2978_v44 }
 0x431   :  { %v2682_v6 = vadd.f32 %v2681_v12, %v5344_v62  ;;  %v2683_v50 = vpop.f32.mrb[226].mxu0  ;;  %v3061_v31 = vpack.c.bf16 %v2981_v10, %v2979_v15 }
 0x432   :  { %v2854_v54 = vmul.f32 0.2, %v2680_v14  ;;  %v2684_v29 = vadd.f32 %v2683_v50, %v5341_v63  ;;  %v2685_v49 = vpop.f32.mrb[227].mxu0 }
 0x433   :  { %v2855_v25 = vmul.f32 0.2, %v2682_v6  ;;  %v2686_v7 = vadd.f32 %v2685_v49, %v5344_v62  ;;  %3546 = vmatprep.mubr.bf16.mxu1 %v3061_v31 }
 0x434   :  { %v2856_v17 = vmul.f32 0.2, %v2684_v29  ;;  %3547 = vmatmul.mubr.bf16.gmra.mrb[212].mxu1 %v3060_v51  ;;  %v2982_v0 = vmax.f32 %v2680_v14, %v2854_v54 }
 0x435   :  { %v2857_v20 = vmul.f32 0.2, %v2686_v7  ;;  %v2983_v40 = vmax.f32 %v2682_v6, %v2855_v25 }
 0x436   :  { %v2984_v23 = vmax.f32 %v2684_v29, %v2856_v17 }
 0x437   :  { %v2985_v11 = vmax.f32 %v2686_v7, %v2857_v20  ;;  %v2689_v2 = vpop.f32.mrb[228].mxu0 }
 0x438   :  { %v2690_v24 = vadd.f32 %v2689_v2, %v5341_v63  ;;  %v2691_v21 = vpop.f32.mrb[229].mxu0  ;;  %v3062_v57 = vpack.c.bf16 %v2984_v23, %v2982_v0 }
 0x439   :  { %v2692_v52 = vadd.f32 %v2691_v21, %v5344_v62  ;;  %v2693_v28 = vpop.f32.mrb[230].mxu0  ;;  %v3063_v43 = vpack.c.bf16 %v2985_v11, %v2983_v40 }
 0x43a   :  { %v2858_v59 = vmul.f32 0.2, %v2690_v24  ;;  %v2694_v26 = vadd.f32 %v2693_v28, %v5341_v63  ;;  %v2695_v8 = vpop.f32.mrb[231].mxu0 }
 0x43b   :  { %v2859_v16 = vmul.f32 0.2, %v2692_v52  ;;  %v2696_v34 = vadd.f32 %v2695_v8, %v5344_v62  ;;  %3556 = vmatprep.mubr.bf16.mxu1 %v3063_v43 }
 0x43c   :  { %v2860_v36 = vmul.f32 0.2, %v2694_v26  ;;  %3557 = vmatmul.mubr.bf16.gmra.mrb[216].mxu1 %v3062_v57  ;;  %v2986_v19 = vmax.f32 %v2690_v24, %v2858_v59 }
 0x43d   :  { %v2861_v32 = vmul.f32 0.2, %v2696_v34  ;;  %v2987_v33 = vmax.f32 %v2692_v52, %v2859_v16 }
 0x43e   :  { %v2988_v58 = vmax.f32 %v2694_v26, %v2860_v36 }
 0x43f   :  { %v2989_v30 = vmax.f32 %v2696_v34, %v2861_v32  ;;  %v2699_v1 = vpop.f32.mrb[232].mxu0 }
 0x440   :  { %v2700_v42 = vadd.f32 %v2699_v1, %v5341_v63  ;;  %v2701_v5 = vpop.f32.mrb[233].mxu0  ;;  %v3064_v45 = vpack.c.bf16 %v2988_v58, %v2986_v19 }
 0x441   :  { %v2702_v27 = vadd.f32 %v2701_v5, %v5344_v62  ;;  %v2703_v38 = vpop.f32.mrb[234].mxu0  ;;  %v3065_v35 = vpack.c.bf16 %v2989_v30, %v2987_v33 }
 0x442   :  { %v2862_v4 = vmul.f32 0.2, %v2700_v42  ;;  %v2704_v9 = vadd.f32 %v2703_v38, %v5341_v63  ;;  %v2705_v47 = vpop.f32.mrb[235].mxu0 }
 0x443   :  { %v2863_v22 = vmul.f32 0.2, %v2702_v27  ;;  %v2706_v60 = vadd.f32 %v2705_v47, %v5344_v62  ;;  %3566 = vmatprep.mubr.bf16.mxu1 %v3065_v35 }
 0x444   :  { %v2864_v55 = vmul.f32 0.2, %v2704_v9  ;;  %3567 = vmatmul.mubr.bf16.gmra.mrb[220].mxu1 %v3064_v45  ;;  %v2990_v41 = vmax.f32 %v2700_v42, %v2862_v4  ;;  %v4121_v42 = vld [vmem:[%s5654_s3 + $0x3] ss:$4 sm:$0x3]  ;;  %s4599_s3 = smov [#allocation8]  }
 0x445   :  { %v2865_v46 = vmul.f32 0.2, %v2706_v60  ;;  %v2991_v61 = vmax.f32 %v2702_v27, %v2863_v22  ;;  %v5501_v22 = vrot.slane %v4121_v42, %v4989_v39  ;;  %s4026_s6 = sshll.u32 %s4599_s3, 4  ;;  %s4027_s6 = int_to_ptr.vmem [resolvable:$true] %s4026_s6 }
 0x446   :  { %v2992_v48 = vmax.f32 %v2704_v9, %v2864_v55  ;;  %v5498_v9 = vrot.slane %v4121_v42, %v4984_v56  ;;  %s4565_s7 = scalar_lea.vmem %s4027_s6, 16384  ;;  %p4570_p11 = scmp.lt.s32.totalorder %s4027_s6, %s4027_s6 }
 0x447   :  { %v2993_v18 = vmax.f32 %v2706_v60, %v2865_v46  ;;  %v2709_v37 = vpop.f32.mrb[236].mxu0  ;;  %p4566_p10 = scmp.ne.s32.totalorder %s4027_s6, %s4565_s7  ;;  %p4571_p12 = scmp.lt.s32.totalorder %s4565_s7, %s4565_s7 }
 0x448   :  { %v2710_v13 = vadd.f32 %v2709_v37, %v5341_v63  ;;  %v2711_v44 = vpop.f32.mrb[237].mxu0  ;;  %v3066_v3 = vpack.c.bf16 %v2992_v48, %v2990_v41 }
 0x449   :  { %v2712_v15 = vadd.f32 %v2711_v44, %v5344_v62  ;;  %v2713_v10 = vpop.f32.mrb[238].mxu0  ;;  %v3067_v53 = vpack.c.bf16 %v2993_v18, %v2991_v61  ;;  %p4572_p13 = por %p4571_p12, %p4570_p11 }
 0x44a   :  { %v2866_v14 = vmul.f32 0.2, %v2710_v13  ;;  %v2714_v12 = vadd.f32 %v2713_v10, %v5341_v63  ;;  %v2715_v51 = vpop.f32.mrb[239].mxu0 }
 0x44b   :  { %v2867_v6 = vmul.f32 0.2, %v2712_v15  ;;  %v2716_v50 = vadd.f32 %v2715_v51, %v5344_v62  ;;  %3576 = vmatprep.mubr.bf16.mxu1 %v3067_v53  ;;  %p4573_p0 = pnand %p4572_p13, %p4566_p10 }
 0x44c   :  { %v2868_v31 = vmul.f32 0.2, %v2714_v12  ;;  %3577 = vmatmul.mubr.bf16.gmra.mrb[224].mxu1 %v3066_v3  ;;  %v2994_v29 = vmax.f32 %v2710_v13, %v2866_v14 }
 0x44d   :  { %v2869_v54 = vmul.f32 0.2, %v2716_v50  ;;  %v2995_v25 = vmax.f32 %v2712_v15, %v2867_v6 }
 0x44e   :  { %v2996_v49 = vmax.f32 %v2714_v12, %v2868_v31 }
 0x44f   :  { %v2997_v7 = vmax.f32 %v2716_v50, %v2869_v54  ;;  %v2719_v17 = vpop.f32.mrb[240].mxu0 }
 0x450   :  { %v2720_v20 = vadd.f32 %v2719_v17, %v5341_v63  ;;  %v2721_v0 = vpop.f32.mrb[241].mxu0  ;;  %v3068_v23 = vpack.c.bf16 %v2996_v49, %v2994_v29 }
 0x451   :  { %v2722_v40 = vadd.f32 %v2721_v0, %v5344_v62  ;;  %v2723_v11 = vpop.f32.mrb[242].mxu0  ;;  %v3069_v2 = vpack.c.bf16 %v2997_v7, %v2995_v25 }
 0x452   :  { %v2870_v24 = vmul.f32 0.2, %v2720_v20  ;;  %v2724_v21 = vadd.f32 %v2723_v11, %v5341_v63  ;;  %v2725_v57 = vpop.f32.mrb[243].mxu0 }
 0x453   :  { %v2871_v52 = vmul.f32 0.2, %v2722_v40  ;;  %v2726_v28 = vadd.f32 %v2725_v57, %v5344_v62  ;;  %3586 = vmatprep.mubr.bf16.mxu1 %v3069_v2 }
 0x454   :  { %v2872_v43 = vmul.f32 0.2, %v2724_v21  ;;  %3587 = vmatmul.mubr.bf16.gmra.mrb[228].mxu1 %v3068_v23  ;;  %v2998_v26 = vmax.f32 %v2720_v20, %v2870_v24 }
 0x455   :  { %v2873_v59 = vmul.f32 0.2, %v2726_v28  ;;  %v2999_v16 = vmax.f32 %v2722_v40, %v2871_v52 }
 0x456   :  { %v3000_v8 = vmax.f32 %v2724_v21, %v2872_v43 }
 0x457   :  { %v3001_v34 = vmax.f32 %v2726_v28, %v2873_v59  ;;  %v2729_v36 = vpop.f32.mrb[244].mxu0 }
 0x458   :  { %v2730_v32 = vadd.f32 %v2729_v36, %v5341_v63  ;;  %v2731_v19 = vpop.f32.mrb[245].mxu0  ;;  %v3070_v58 = vpack.c.bf16 %v3000_v8, %v2998_v26 }
 0x459   :  { %v2732_v33 = vadd.f32 %v2731_v19, %v5344_v62  ;;  %v2733_v30 = vpop.f32.mrb[246].mxu0  ;;  %v3071_v1 = vpack.c.bf16 %v3001_v34, %v2999_v16 }
 0x45a   :  { %v2874_v5 = vmul.f32 0.2, %v2730_v32  ;;  %v2734_v45 = vadd.f32 %v2733_v30, %v5341_v63  ;;  %v2735_v27 = vpop.f32.mrb[247].mxu0 }
 0x45b   :  { %v2875_v38 = vmul.f32 0.2, %v2732_v33  ;;  %v2736_v35 = vadd.f32 %v2735_v27, %v5344_v62  ;;  %3596 = vmatprep.mubr.bf16.mxu1 %v3071_v1 }
 0x45c   :  { %v2876_v4 = vmul.f32 0.2, %v2734_v45  ;;  %3597 = vmatmul.mubr.bf16.gmra.mrb[232].mxu1 %v3070_v58  ;;  %v3002_v60 = vmax.f32 %v2730_v32, %v2874_v5 }
 0x45d   :  { %v2877_v47 = vmul.f32 0.2, %v2736_v35  ;;  %v3003_v46 = vmax.f32 %v2732_v33, %v2875_v38 }
 0x45e   :  { %v3004_v55 = vmax.f32 %v2734_v45, %v2876_v4 }
 0x45f   :  { %v3005_v41 = vmax.f32 %v2736_v35, %v2877_v47  ;;  %v2739_v48 = vpop.f32.mrb[248].mxu0  ;;  %v3338_v61 = vpop.f32.mrb[128].mxu1 }
 0x460   :  { %v2740_v18 = vadd.f32 %v2739_v48, %v5341_v63  ;;  %v3339_v37 = vadd.f32 %v3338_v61, %v5498_v9  ;;  %v2741_v13 = vpop.f32.mrb[249].mxu0  ;;  %v3340_v44 = vpop.f32.mrb[129].mxu1  ;;  %v3072_v3 = vpack.c.bf16 %v3004_v55, %v3002_v60 }
 0x461   :  { %v2742_v56 = vadd.f32 %v2741_v13, %v5344_v62  ;;  %v3341_v15 = vadd.f32 %v3340_v44, %v5501_v22  ;;  %v2743_v10 = vpop.f32.mrb[250].mxu0  ;;  %v3342_v39 = vpop.f32.mrb[130].mxu1  ;;  %v3073_v53 = vpack.c.bf16 %v3005_v41, %v3003_v46 }
 0x462   :  { %v2878_v14 = vmul.f32 0.2, %v2740_v18  ;;  %v3645_v12 = vmul.f32 0.2, %v3339_v37  ;;  %v2744_v51 = vadd.f32 %v2743_v10, %v5341_v63  ;;  %v3343_v6 = vadd.f32 %v3342_v39, %v5498_v9  ;;  %v2745_v50 = vpop.f32.mrb[251].mxu0  ;;  %v3344_v31 = vpop.f32.mrb[131].mxu1 }
 0x463   :  { %v2879_v54 = vmul.f32 0.2, %v2742_v56  ;;  %v3646_v29 = vmul.f32 0.2, %v3341_v15  ;;  %v2746_v49 = vadd.f32 %v2745_v50, %v5344_v62  ;;  %v3345_v25 = vadd.f32 %v3344_v31, %v5501_v22  ;;  %3606 = vmatprep.mubr.bf16.mxu1 %v3073_v53 }
 0x464   :  { %v3773_v7 = vmax.f32 %v3339_v37, %v3645_v12  ;;  %v2880_v17 = vmul.f32 0.2, %v2744_v51  ;;  %v3647_v20 = vmul.f32 0.2, %v3343_v6  ;;  %3607 = vmatmul.mubr.bf16.gmra.mrb[236].mxu1 %v3072_v3  ;;  %v3006_v11 = vmax.f32 %v2740_v18, %v2878_v14 }
 0x465   :  { %v3774_v0 = vmax.f32 %v3341_v15, %v3646_v29  ;;  %v2881_v23 = vmul.f32 0.2, %v2746_v49  ;;  %v3648_v40 = vmul.f32 0.2, %v3345_v25  ;;  %v3007_v21 = vmax.f32 %v2742_v56, %v2879_v54 }
 0x466   :  { %3901 = vst [vmem:[#allocation8 + $0x40] sm:$0xff] %v3773_v7  ;;  %v3008_v2 = vmax.f32 %v2744_v51, %v2880_v17  ;;  %v3775_v24 = vmax.f32 %v3343_v6, %v3647_v20 }
 0x467   :  { %3902 = vst [vmem:[#allocation8 + $0x48] sm:$0xff] %v3774_v0  ;;  %v3009_v57 = vmax.f32 %v2746_v49, %v2881_v23  ;;  %v3776_v52 = vmax.f32 %v3345_v25, %v3648_v40  ;;  %v2749_v28 = vpop.f32.mrb[252].mxu0  ;;  %v3348_v43 = vpop.f32.mrb[132].mxu1 }
 0x468   :  { %3903 = vst [vmem:[#allocation8 + $0x50] sm:$0xff] %v3775_v24  ;;  %v2750_v59 = vadd.f32 %v2749_v28, %v5341_v63  ;;  %v3349_v26 = vadd.f32 %v3348_v43, %v5498_v9  ;;  %v2751_v8 = vpop.f32.mrb[253].mxu0  ;;  %v3350_v16 = vpop.f32.mrb[133].mxu1  ;;  %v3074_v34 = vpack.c.bf16 %v3008_v2, %v3006_v11 }
 0x469   :  { %3904 = vst [vmem:[#allocation8 + $0x58] sm:$0xff] %v3776_v52  ;;  %v2752_v36 = vadd.f32 %v2751_v8, %v5344_v62  ;;  %v3351_v32 = vadd.f32 %v3350_v16, %v5501_v22  ;;  %v2753_v19 = vpop.f32.mrb[254].mxu0  ;;  %v3352_v58 = vpop.f32.mrb[134].mxu1  ;;  %v3075_v33 = vpack.c.bf16 %v3009_v57, %v3007_v21 }
 0x46a   :  { %v2882_v30 = vmul.f32 0.2, %v2750_v59  ;;  %v3649_v1 = vmul.f32 0.2, %v3349_v26  ;;  %v2754_v42 = vadd.f32 %v2753_v19, %v5341_v63  ;;  %v3353_v5 = vadd.f32 %v3352_v58, %v5498_v9  ;;  %v2755_v45 = vpop.f32.mrb[255].mxu0  ;;  %v3354_v27 = vpop.f32.mrb[135].mxu1 }
 0x46b   :  { %v2883_v38 = vmul.f32 0.2, %v2752_v36  ;;  %v3650_v35 = vmul.f32 0.2, %v3351_v32  ;;  %v2756_v4 = vadd.f32 %v2755_v45, %v5344_v62  ;;  %v3355_v47 = vadd.f32 %v3354_v27, %v5501_v22  ;;  %3616 = vmatprep.mubr.bf16.mxu1 %v3075_v33 }
 0x46c   :  { %v3777_v60 = vmax.f32 %v3349_v26, %v3649_v1  ;;  %v2884_v55 = vmul.f32 0.2, %v2754_v42  ;;  %v3651_v46 = vmul.f32 0.2, %v3353_v5  ;;  %3617 = vmatmul.mubr.bf16.gmra.mrb[240].mxu1 %v3074_v34  ;;  %v3010_v18 = vmax.f32 %v2750_v59, %v2882_v30 }
 0x46d   :  { %v3778_v41 = vmax.f32 %v3351_v32, %v3650_v35  ;;  %v2885_v48 = vmul.f32 0.2, %v2756_v4  ;;  %v3652_v61 = vmul.f32 0.2, %v3355_v47  ;;  %v3011_v13 = vmax.f32 %v2752_v36, %v2883_v38 }
 0x46e   :  { %3905 = vst [vmem:[#allocation8 + $0x60] sm:$0xff] %v3777_v60  ;;  %v3012_v63 = vmax.f32 %v2754_v42, %v2884_v55  ;;  %v3779_v37 = vmax.f32 %v3353_v5, %v3651_v46 }
 0x46f   :  { %3906 = vst [vmem:[#allocation8 + $0x68] sm:$0xff] %v3778_v41  ;;  %v3013_v44 = vmax.f32 %v2756_v4, %v2885_v48  ;;  %v3780_v3 = vmax.f32 %v3355_v47, %v3652_v61  ;;  %v3318_v56 = vpop.f32.mrb[0].mxu0  ;;  %v3358_v62 = vpop.f32.mrb[136].mxu1 }
 0x470   :  { %3907 = vst [vmem:[#allocation8 + $0x70] sm:$0xff] %v3779_v37  ;;  %v3319_v15 = vadd.f32 %v3318_v56, %v5498_v9  ;;  %v3359_v10 = vadd.f32 %v3358_v62, %v5498_v9  ;;  %v3320_v39 = vpop.f32.mrb[1].mxu0  ;;  %v3360_v53 = vpop.f32.mrb[137].mxu1  ;;  %v3076_v14 = vpack.c.bf16 %v3012_v63, %v3010_v18 }
 0x471   :  { %3908 = vst [vmem:[#allocation8 + $0x78] sm:$0xff] %v3780_v3  ;;  %v3321_v12 = vadd.f32 %v3320_v39, %v5501_v22  ;;  %v3361_v51 = vadd.f32 %v3360_v53, %v5501_v22  ;;  %v3322_v6 = vpop.f32.mrb[2].mxu0  ;;  %v3362_v50 = vpop.f32.mrb[138].mxu1  ;;  %v3077_v31 = vpack.c.bf16 %v3013_v44, %v3011_v13 }
 0x472   :  { %v3637_v54 = vmul.f32 0.2, %v3319_v15  ;;  %v3653_v29 = vmul.f32 0.2, %v3359_v10  ;;  %v3323_v49 = vadd.f32 %v3322_v6, %v5498_v9  ;;  %v3363_v25 = vadd.f32 %v3362_v50, %v5498_v9  ;;  %v3324_v7 = vpop.f32.mrb[3].mxu0  ;;  %v3364_v17 = vpop.f32.mrb[139].mxu1 }
 0x473   :  { %v3638_v20 = vmul.f32 0.2, %v3321_v12  ;;  %v3654_v0 = vmul.f32 0.2, %v3361_v51  ;;  %v3325_v23 = vadd.f32 %v3324_v7, %v5501_v22  ;;  %v3365_v40 = vadd.f32 %v3364_v17, %v5501_v22  ;;  %3626 = vmatprep.mubr.bf16.mxu1 %v3077_v31 }
 0x474   :  { %v3765_v11 = vmax.f32 %v3319_v15, %v3637_v54  ;;  %v3781_v2 = vmax.f32 %v3359_v10, %v3653_v29  ;;  %v3639_v24 = vmul.f32 0.2, %v3323_v49  ;;  %v3655_v21 = vmul.f32 0.2, %v3363_v25  ;;  %3627 = vmatmul.mubr.bf16.gmra.mrb[244].mxu1 %v3076_v14 }
 0x475   :  { %v3766_v57 = vmax.f32 %v3321_v12, %v3638_v20  ;;  %v3782_v52 = vmax.f32 %v3361_v51, %v3654_v0  ;;  %v3640_v28 = vmul.f32 0.2, %v3325_v23  ;;  %v3656_v43 = vmul.f32 0.2, %v3365_v40 }
 0x476   :  { %3893 = vst [vmem:[#allocation8] sm:$0xff] %v3765_v11  ;;  %3909 = vst [vmem:[#allocation8 + $0x80] sm:$0xff] %v3781_v2  ;;  %v3767_v59 = vmax.f32 %v3323_v49, %v3639_v24  ;;  %v3783_v26 = vmax.f32 %v3363_v25, %v3655_v21 }
 0x477   :  { %3894 = vst [vmem:[#allocation8 + $0x8] sm:$0xff] %v3766_v57  ;;  %3910 = vst [vmem:[#allocation8 + $0x88] sm:$0xff] %v3782_v52  ;;  %v3768_v8 = vmax.f32 %v3325_v23, %v3640_v28  ;;  %v3784_v16 = vmax.f32 %v3365_v40, %v3656_v43  ;;  %v3328_v34 = vpop.f32.mrb[4].mxu0  ;;  %v3368_v36 = vpop.f32.mrb[140].mxu1 }
 0x478   :  { %3895 = vst [vmem:[#allocation8 + $0x10] sm:$0xff] %v3767_v59  ;;  %3911 = vst [vmem:[#allocation8 + $0x90] sm:$0xff] %v3783_v26  ;;  %v3329_v32 = vadd.f32 %v3328_v34, %v5498_v9  ;;  %v3369_v19 = vadd.f32 %v3368_v36, %v5498_v9  ;;  %v3330_v58 = vpop.f32.mrb[5].mxu0  ;;  %v3370_v33 = vpop.f32.mrb[141].mxu1 }
 0x479   :  { %3896 = vst [vmem:[#allocation8 + $0x18] sm:$0xff] %v3768_v8  ;;  %3912 = vst [vmem:[#allocation8 + $0x98] sm:$0xff] %v3784_v16  ;;  %v3331_v30 = vadd.f32 %v3330_v58, %v5501_v22  ;;  %v3371_v1 = vadd.f32 %v3370_v33, %v5501_v22  ;;  %v3332_v42 = vpop.f32.mrb[6].mxu0  ;;  %v3372_v5 = vpop.f32.mrb[142].mxu1 }
 0x47a   :  { %v3641_v45 = vmul.f32 0.2, %v3329_v32  ;;  %v3657_v27 = vmul.f32 0.2, %v3369_v19  ;;  %v3333_v38 = vadd.f32 %v3332_v42, %v5498_v9  ;;  %v3373_v35 = vadd.f32 %v3372_v5, %v5498_v9  ;;  %v3334_v4 = vpop.f32.mrb[7].mxu0  ;;  %v3374_v47 = vpop.f32.mrb[143].mxu1 }
 0x47b   :  { %v3642_v60 = vmul.f32 0.2, %v3331_v30  ;;  %v3658_v55 = vmul.f32 0.2, %v3371_v1  ;;  %v3335_v46 = vadd.f32 %v3334_v4, %v5501_v22  ;;  %v3375_v41 = vadd.f32 %v3374_v47, %v5501_v22 }
 0x47c   :  { %v3769_v48 = vmax.f32 %v3329_v32, %v3641_v45  ;;  %v3785_v61 = vmax.f32 %v3369_v19, %v3657_v27  ;;  %v3643_v18 = vmul.f32 0.2, %v3333_v38  ;;  %v3659_v63 = vmul.f32 0.2, %v3373_v35 }
 0x47d   :  { %v3770_v37 = vmax.f32 %v3331_v30, %v3642_v60  ;;  %v3786_v13 = vmax.f32 %v3371_v1, %v3658_v55  ;;  %v3644_v44 = vmul.f32 0.2, %v3335_v46  ;;  %v3660_v3 = vmul.f32 0.2, %v3375_v41 }
 0x47e   :  { %3897 = vst [vmem:[#allocation8 + $0x20] sm:$0xff] %v3769_v48  ;;  %3913 = vst [vmem:[#allocation8 + $0xa0] sm:$0xff] %v3785_v61  ;;  %v3771_v56 = vmax.f32 %v3333_v38, %v3643_v18  ;;  %v3787_v62 = vmax.f32 %v3373_v35, %v3659_v63 }
 0x47f   :  { %3898 = vst [vmem:[#allocation8 + $0x28] sm:$0xff] %v3770_v37  ;;  %3914 = vst [vmem:[#allocation8 + $0xa8] sm:$0xff] %v3786_v13  ;;  %v3772_v15 = vmax.f32 %v3335_v46, %v3644_v44  ;;  %v3788_v10 = vmax.f32 %v3375_v41, %v3660_v3  ;;  %v3378_v39 = vpop.f32.mrb[144].mxu1 }
 0x480   :  { %3899 = vst [vmem:[#allocation8 + $0x30] sm:$0xff] %v3771_v56  ;;  %3915 = vst [vmem:[#allocation8 + $0xb0] sm:$0xff] %v3787_v62  ;;  %v3379_v53 = vadd.f32 %v3378_v39, %v5498_v9  ;;  %v3380_v14 = vpop.f32.mrb[145].mxu1 }
 0x481   :  { %3900 = vst [vmem:[#allocation8 + $0x38] sm:$0xff] %v3772_v15  ;;  %3916 = vst [vmem:[#allocation8 + $0xb8] sm:$0xff] %v3788_v10  ;;  %v3381_v12 = vadd.f32 %v3380_v14, %v5501_v22  ;;  %v3382_v51 = vpop.f32.mrb[146].mxu1 }
 0x482   :  { %v3661_v6 = vmul.f32 0.2, %v3379_v53  ;;  %v3383_v50 = vadd.f32 %v3382_v51, %v5498_v9  ;;  %v3384_v31 = vpop.f32.mrb[147].mxu1 }
 0x483   :  { %v3662_v54 = vmul.f32 0.2, %v3381_v12  ;;  %v3385_v29 = vadd.f32 %v3384_v31, %v5501_v22 }
 0x484   :  { %v3789_v49 = vmax.f32 %v3379_v53, %v3661_v6  ;;  %v3663_v25 = vmul.f32 0.2, %v3383_v50 }
 0x485   :  { %v3790_v7 = vmax.f32 %v3381_v12, %v3662_v54  ;;  %v3664_v17 = vmul.f32 0.2, %v3385_v29 }
 0x486   :  { %3917 = vst [vmem:[#allocation8 + $0xc0] sm:$0xff] %v3789_v49  ;;  %v3791_v20 = vmax.f32 %v3383_v50, %v3663_v25 }
 0x487   :  { %3918 = vst [vmem:[#allocation8 + $0xc8] sm:$0xff] %v3790_v7  ;;  %v3792_v0 = vmax.f32 %v3385_v29, %v3664_v17  ;;  %v3388_v23 = vpop.f32.mrb[148].mxu1 }
 0x488   :  { %3919 = vst [vmem:[#allocation8 + $0xd0] sm:$0xff] %v3791_v20  ;;  %v3389_v40 = vadd.f32 %v3388_v23, %v5498_v9  ;;  %v3390_v11 = vpop.f32.mrb[149].mxu1 }
 0x489   :  { %3920 = vst [vmem:[#allocation8 + $0xd8] sm:$0xff] %v3792_v0  ;;  %v3391_v2 = vadd.f32 %v3390_v11, %v5501_v22  ;;  %v3392_v24 = vpop.f32.mrb[150].mxu1 }
 0x48a   :  { %v3665_v21 = vmul.f32 0.2, %v3389_v40  ;;  %v3393_v57 = vadd.f32 %v3392_v24, %v5498_v9  ;;  %v3394_v52 = vpop.f32.mrb[151].mxu1 }
 0x48b   :  { %v3666_v28 = vmul.f32 0.2, %v3391_v2  ;;  %v3395_v43 = vadd.f32 %v3394_v52, %v5501_v22 }
 0x48c   :  { %v3793_v59 = vmax.f32 %v3389_v40, %v3665_v21  ;;  %v3667_v26 = vmul.f32 0.2, %v3393_v57 }
 0x48d   :  { %v3794_v8 = vmax.f32 %v3391_v2, %v3666_v28  ;;  %v3668_v16 = vmul.f32 0.2, %v3395_v43 }
 0x48e   :  { %3921 = vst [vmem:[#allocation8 + $0xe0] sm:$0xff] %v3793_v59  ;;  %v3795_v34 = vmax.f32 %v3393_v57, %v3667_v26 }
 0x48f   :  { %3922 = vst [vmem:[#allocation8 + $0xe8] sm:$0xff] %v3794_v8  ;;  %v3796_v36 = vmax.f32 %v3395_v43, %v3668_v16  ;;  %v3398_v32 = vpop.f32.mrb[152].mxu1 }
 0x490   :  { %3923 = vst [vmem:[#allocation8 + $0xf0] sm:$0xff] %v3795_v34  ;;  %v3399_v19 = vadd.f32 %v3398_v32, %v5498_v9  ;;  %v3400_v58 = vpop.f32.mrb[153].mxu1 }
 0x491   :  { %3924 = vst [vmem:[#allocation8 + $0xf8] sm:$0xff] %v3796_v36  ;;  %v3401_v33 = vadd.f32 %v3400_v58, %v5501_v22  ;;  %v3402_v30 = vpop.f32.mrb[154].mxu1 }
 0x492   :  { %v3669_v1 = vmul.f32 0.2, %v3399_v19  ;;  %v3403_v42 = vadd.f32 %v3402_v30, %v5498_v9  ;;  %v3404_v5 = vpop.f32.mrb[155].mxu1 }
 0x493   :  { %v3670_v45 = vmul.f32 0.2, %v3401_v33  ;;  %v3405_v27 = vadd.f32 %v3404_v5, %v5501_v22 }
 0x494   :  { %v3797_v38 = vmax.f32 %v3399_v19, %v3669_v1  ;;  %v3671_v35 = vmul.f32 0.2, %v3403_v42 }
 0x495   :  { %v3798_v4 = vmax.f32 %v3401_v33, %v3670_v45  ;;  %v3672_v47 = vmul.f32 0.2, %v3405_v27 }
 0x496   :  { %3925 = vst [vmem:[#allocation8 + $0x100] sm:$0xff] %v3797_v38  ;;  %v3799_v60 = vmax.f32 %v3403_v42, %v3671_v35 }
 0x497   :  { %3926 = vst [vmem:[#allocation8 + $0x108] sm:$0xff] %v3798_v4  ;;  %v3800_v55 = vmax.f32 %v3405_v27, %v3672_v47  ;;  %v3408_v46 = vpop.f32.mrb[156].mxu1 }
 0x498   :  { %3927 = vst [vmem:[#allocation8 + $0x110] sm:$0xff] %v3799_v60  ;;  %v3409_v41 = vadd.f32 %v3408_v46, %v5498_v9  ;;  %v3410_v48 = vpop.f32.mrb[157].mxu1 }
 0x499   :  { %3928 = vst [vmem:[#allocation8 + $0x118] sm:$0xff] %v3800_v55  ;;  %v3411_v61 = vadd.f32 %v3410_v48, %v5501_v22  ;;  %v3412_v18 = vpop.f32.mrb[158].mxu1 }
 0x49a   :  { %v3673_v63 = vmul.f32 0.2, %v3409_v41  ;;  %v3413_v37 = vadd.f32 %v3412_v18, %v5498_v9  ;;  %v3414_v13 = vpop.f32.mrb[159].mxu1 }
 0x49b   :  { %v3674_v44 = vmul.f32 0.2, %v3411_v61  ;;  %v3415_v3 = vadd.f32 %v3414_v13, %v5501_v22 }
 0x49c   :  { %v3801_v56 = vmax.f32 %v3409_v41, %v3673_v63  ;;  %v3675_v62 = vmul.f32 0.2, %v3413_v37 }
 0x49d   :  { %v3802_v15 = vmax.f32 %v3411_v61, %v3674_v44  ;;  %v3676_v10 = vmul.f32 0.2, %v3415_v3 }
 0x49e   :  { %3929 = vst [vmem:[#allocation8 + $0x120] sm:$0xff] %v3801_v56  ;;  %v3803_v39 = vmax.f32 %v3413_v37, %v3675_v62 }
 0x49f   :  { %3930 = vst [vmem:[#allocation8 + $0x128] sm:$0xff] %v3802_v15  ;;  %v3804_v53 = vmax.f32 %v3415_v3, %v3676_v10  ;;  %v3418_v14 = vpop.f32.mrb[160].mxu1 }
 0x4a0   :  { %3931 = vst [vmem:[#allocation8 + $0x130] sm:$0xff] %v3803_v39  ;;  %v3419_v12 = vadd.f32 %v3418_v14, %v5498_v9  ;;  %v3420_v51 = vpop.f32.mrb[161].mxu1 }
 0x4a1   :  { %3932 = vst [vmem:[#allocation8 + $0x138] sm:$0xff] %v3804_v53  ;;  %v3421_v6 = vadd.f32 %v3420_v51, %v5501_v22  ;;  %v3422_v50 = vpop.f32.mrb[162].mxu1 }
 0x4a2   :  { %v3677_v31 = vmul.f32 0.2, %v3419_v12  ;;  %v3423_v54 = vadd.f32 %v3422_v50, %v5498_v9  ;;  %v3424_v29 = vpop.f32.mrb[163].mxu1 }
 0x4a3   :  { %v3678_v49 = vmul.f32 0.2, %v3421_v6  ;;  %v3425_v25 = vadd.f32 %v3424_v29, %v5501_v22 }
 0x4a4   :  { %v3805_v7 = vmax.f32 %v3419_v12, %v3677_v31  ;;  %v3679_v17 = vmul.f32 0.2, %v3423_v54 }
 0x4a5   :  { %v3806_v20 = vmax.f32 %v3421_v6, %v3678_v49  ;;  %v3680_v0 = vmul.f32 0.2, %v3425_v25 }
 0x4a6   :  { %3933 = vst [vmem:[#allocation8 + $0x140] sm:$0xff] %v3805_v7  ;;  %v3807_v23 = vmax.f32 %v3423_v54, %v3679_v17 }
 0x4a7   :  { %3934 = vst [vmem:[#allocation8 + $0x148] sm:$0xff] %v3806_v20  ;;  %v3808_v40 = vmax.f32 %v3425_v25, %v3680_v0  ;;  %v3428_v11 = vpop.f32.mrb[164].mxu1 }
 0x4a8   :  { %3935 = vst [vmem:[#allocation8 + $0x150] sm:$0xff] %v3807_v23  ;;  %v3429_v2 = vadd.f32 %v3428_v11, %v5498_v9  ;;  %v3430_v24 = vpop.f32.mrb[165].mxu1 }
 0x4a9   :  { %3936 = vst [vmem:[#allocation8 + $0x158] sm:$0xff] %v3808_v40  ;;  %v3431_v21 = vadd.f32 %v3430_v24, %v5501_v22  ;;  %v3432_v57 = vpop.f32.mrb[166].mxu1 }
 0x4aa   :  { %v3681_v52 = vmul.f32 0.2, %v3429_v2  ;;  %v3433_v28 = vadd.f32 %v3432_v57, %v5498_v9  ;;  %v3434_v43 = vpop.f32.mrb[167].mxu1 }
 0x4ab   :  { %v3682_v59 = vmul.f32 0.2, %v3431_v21  ;;  %v3435_v26 = vadd.f32 %v3434_v43, %v5501_v22 }
 0x4ac   :  { %v3809_v8 = vmax.f32 %v3429_v2, %v3681_v52  ;;  %v3683_v16 = vmul.f32 0.2, %v3433_v28 }
 0x4ad   :  { %v3810_v34 = vmax.f32 %v3431_v21, %v3682_v59  ;;  %v3684_v36 = vmul.f32 0.2, %v3435_v26 }
 0x4ae   :  { %3937 = vst [vmem:[#allocation8 + $0x160] sm:$0xff] %v3809_v8  ;;  %v3811_v32 = vmax.f32 %v3433_v28, %v3683_v16 }
 0x4af   :  { %3938 = vst [vmem:[#allocation8 + $0x168] sm:$0xff] %v3810_v34  ;;  %v3812_v19 = vmax.f32 %v3435_v26, %v3684_v36  ;;  %v3438_v58 = vpop.f32.mrb[168].mxu1 }
 0x4b0   :  { %3939 = vst [vmem:[#allocation8 + $0x170] sm:$0xff] %v3811_v32  ;;  %v3439_v33 = vadd.f32 %v3438_v58, %v5498_v9  ;;  %v3440_v30 = vpop.f32.mrb[169].mxu1 }
 0x4b1   :  { %3940 = vst [vmem:[#allocation8 + $0x178] sm:$0xff] %v3812_v19  ;;  %v3441_v1 = vadd.f32 %v3440_v30, %v5501_v22  ;;  %v3442_v42 = vpop.f32.mrb[170].mxu1 }
 0x4b2   :  { %v3685_v5 = vmul.f32 0.2, %v3439_v33  ;;  %v3443_v45 = vadd.f32 %v3442_v42, %v5498_v9  ;;  %v3444_v27 = vpop.f32.mrb[171].mxu1 }
 0x4b3   :  { %v3686_v38 = vmul.f32 0.2, %v3441_v1  ;;  %v3445_v35 = vadd.f32 %v3444_v27, %v5501_v22 }
 0x4b4   :  { %v3813_v4 = vmax.f32 %v3439_v33, %v3685_v5  ;;  %v3687_v47 = vmul.f32 0.2, %v3443_v45 }
 0x4b5   :  { %v3814_v60 = vmax.f32 %v3441_v1, %v3686_v38  ;;  %v3688_v55 = vmul.f32 0.2, %v3445_v35 }
 0x4b6   :  { %3941 = vst [vmem:[#allocation8 + $0x180] sm:$0xff] %v3813_v4  ;;  %v3815_v46 = vmax.f32 %v3443_v45, %v3687_v47 }
 0x4b7   :  { %3942 = vst [vmem:[#allocation8 + $0x188] sm:$0xff] %v3814_v60  ;;  %v3816_v41 = vmax.f32 %v3445_v35, %v3688_v55  ;;  %v3448_v48 = vpop.f32.mrb[172].mxu1 }
 0x4b8   :  { %3943 = vst [vmem:[#allocation8 + $0x190] sm:$0xff] %v3815_v46  ;;  %v3449_v61 = vadd.f32 %v3448_v48, %v5498_v9  ;;  %v3450_v18 = vpop.f32.mrb[173].mxu1 }
 0x4b9   :  { %3944 = vst [vmem:[#allocation8 + $0x198] sm:$0xff] %v3816_v41  ;;  %v3451_v63 = vadd.f32 %v3450_v18, %v5501_v22  ;;  %v3452_v37 = vpop.f32.mrb[174].mxu1 }
 0x4ba   :  { %v3689_v13 = vmul.f32 0.2, %v3449_v61  ;;  %v3453_v44 = vadd.f32 %v3452_v37, %v5498_v9  ;;  %v3454_v3 = vpop.f32.mrb[175].mxu1 }
 0x4bb   :  { %v3690_v56 = vmul.f32 0.2, %v3451_v63  ;;  %v3455_v62 = vadd.f32 %v3454_v3, %v5501_v22 }
 0x4bc   :  { %v3817_v15 = vmax.f32 %v3449_v61, %v3689_v13  ;;  %v3691_v10 = vmul.f32 0.2, %v3453_v44 }
 0x4bd   :  { %v3818_v39 = vmax.f32 %v3451_v63, %v3690_v56  ;;  %v3692_v53 = vmul.f32 0.2, %v3455_v62 }
 0x4be   :  { %3945 = vst [vmem:[#allocation8 + $0x1a0] sm:$0xff] %v3817_v15  ;;  %v3819_v14 = vmax.f32 %v3453_v44, %v3691_v10 }
 0x4bf   :  { %3946 = vst [vmem:[#allocation8 + $0x1a8] sm:$0xff] %v3818_v39  ;;  %v3820_v12 = vmax.f32 %v3455_v62, %v3692_v53  ;;  %v3458_v51 = vpop.f32.mrb[176].mxu1 }
 0x4c0   :  { %3947 = vst [vmem:[#allocation8 + $0x1b0] sm:$0xff] %v3819_v14  ;;  %v3459_v6 = vadd.f32 %v3458_v51, %v5498_v9  ;;  %v3460_v50 = vpop.f32.mrb[177].mxu1 }
 0x4c1   :  { %3948 = vst [vmem:[#allocation8 + $0x1b8] sm:$0xff] %v3820_v12  ;;  %v3461_v31 = vadd.f32 %v3460_v50, %v5501_v22  ;;  %v3462_v54 = vpop.f32.mrb[178].mxu1 }
 0x4c2   :  { %v3693_v29 = vmul.f32 0.2, %v3459_v6  ;;  %v3463_v49 = vadd.f32 %v3462_v54, %v5498_v9  ;;  %v3464_v25 = vpop.f32.mrb[179].mxu1 }
 0x4c3   :  { %v3694_v7 = vmul.f32 0.2, %v3461_v31  ;;  %v3465_v17 = vadd.f32 %v3464_v25, %v5501_v22 }
 0x4c4   :  { %v3821_v20 = vmax.f32 %v3459_v6, %v3693_v29  ;;  %v3695_v0 = vmul.f32 0.2, %v3463_v49 }
 0x4c5   :  { %v3822_v23 = vmax.f32 %v3461_v31, %v3694_v7  ;;  %v3696_v40 = vmul.f32 0.2, %v3465_v17 }
 0x4c6   :  { %3949 = vst [vmem:[#allocation8 + $0x1c0] sm:$0xff] %v3821_v20  ;;  %v3823_v11 = vmax.f32 %v3463_v49, %v3695_v0 }
 0x4c7   :  { %3950 = vst [vmem:[#allocation8 + $0x1c8] sm:$0xff] %v3822_v23  ;;  %v3824_v2 = vmax.f32 %v3465_v17, %v3696_v40  ;;  %v3468_v24 = vpop.f32.mrb[180].mxu1 }
 0x4c8   :  { %3951 = vst [vmem:[#allocation8 + $0x1d0] sm:$0xff] %v3823_v11  ;;  %v3469_v21 = vadd.f32 %v3468_v24, %v5498_v9  ;;  %v3470_v57 = vpop.f32.mrb[181].mxu1 }
 0x4c9   :  { %3952 = vst [vmem:[#allocation8 + $0x1d8] sm:$0xff] %v3824_v2  ;;  %v3471_v52 = vadd.f32 %v3470_v57, %v5501_v22  ;;  %v3472_v28 = vpop.f32.mrb[182].mxu1 }
 0x4ca   :  { %v3697_v43 = vmul.f32 0.2, %v3469_v21  ;;  %v3473_v59 = vadd.f32 %v3472_v28, %v5498_v9  ;;  %v3474_v26 = vpop.f32.mrb[183].mxu1 }
 0x4cb   :  { %v3698_v8 = vmul.f32 0.2, %v3471_v52  ;;  %v3475_v16 = vadd.f32 %v3474_v26, %v5501_v22 }
 0x4cc   :  { %v3825_v34 = vmax.f32 %v3469_v21, %v3697_v43  ;;  %v3699_v36 = vmul.f32 0.2, %v3473_v59 }
 0x4cd   :  { %v3826_v32 = vmax.f32 %v3471_v52, %v3698_v8  ;;  %v3700_v19 = vmul.f32 0.2, %v3475_v16 }
 0x4ce   :  { %3953 = vst [vmem:[#allocation8 + $0x1e0] sm:$0xff] %v3825_v34  ;;  %v3827_v58 = vmax.f32 %v3473_v59, %v3699_v36 }
 0x4cf   :  { %3954 = vst [vmem:[#allocation8 + $0x1e8] sm:$0xff] %v3826_v32  ;;  %v3828_v33 = vmax.f32 %v3475_v16, %v3700_v19  ;;  %v3478_v30 = vpop.f32.mrb[184].mxu1 }
 0x4d0   :  { %3955 = vst [vmem:[#allocation8 + $0x1f0] sm:$0xff] %v3827_v58  ;;  %v3479_v1 = vadd.f32 %v3478_v30, %v5498_v9  ;;  %v3480_v42 = vpop.f32.mrb[185].mxu1 }
 0x4d1   :  { %3956 = vst [vmem:[#allocation8 + $0x1f8] sm:$0xff] %v3828_v33  ;;  %v3481_v5 = vadd.f32 %v3480_v42, %v5501_v22  ;;  %v3482_v45 = vpop.f32.mrb[186].mxu1 }
 0x4d2   :  { %v3701_v27 = vmul.f32 0.2, %v3479_v1  ;;  %v3483_v38 = vadd.f32 %v3482_v45, %v5498_v9  ;;  %v3484_v35 = vpop.f32.mrb[187].mxu1 }
 0x4d3   :  { %v3702_v4 = vmul.f32 0.2, %v3481_v5  ;;  %v3485_v47 = vadd.f32 %v3484_v35, %v5501_v22 }
 0x4d4   :  { %v3829_v60 = vmax.f32 %v3479_v1, %v3701_v27  ;;  %v3703_v55 = vmul.f32 0.2, %v3483_v38 }
 0x4d5   :  { %v3830_v46 = vmax.f32 %v3481_v5, %v3702_v4  ;;  %v3704_v41 = vmul.f32 0.2, %v3485_v47 }
 0x4d6   :  { %3957 = vst [vmem:[#allocation8 + $0x200] sm:$0xff] %v3829_v60  ;;  %v3831_v48 = vmax.f32 %v3483_v38, %v3703_v55 }
 0x4d7   :  { %3958 = vst [vmem:[#allocation8 + $0x208] sm:$0xff] %v3830_v46  ;;  %v3832_v61 = vmax.f32 %v3485_v47, %v3704_v41  ;;  %v3488_v18 = vpop.f32.mrb[188].mxu1 }
 0x4d8   :  { %3959 = vst [vmem:[#allocation8 + $0x210] sm:$0xff] %v3831_v48  ;;  %v3489_v63 = vadd.f32 %v3488_v18, %v5498_v9  ;;  %v3490_v37 = vpop.f32.mrb[189].mxu1 }
 0x4d9   :  { %3960 = vst [vmem:[#allocation8 + $0x218] sm:$0xff] %v3832_v61  ;;  %v3491_v13 = vadd.f32 %v3490_v37, %v5501_v22  ;;  %v3492_v44 = vpop.f32.mrb[190].mxu1 }
 0x4da   :  { %v3705_v3 = vmul.f32 0.2, %v3489_v63  ;;  %v3493_v56 = vadd.f32 %v3492_v44, %v5498_v9  ;;  %v3494_v62 = vpop.f32.mrb[191].mxu1 }
 0x4db   :  { %v3706_v15 = vmul.f32 0.2, %v3491_v13  ;;  %v3495_v10 = vadd.f32 %v3494_v62, %v5501_v22 }
 0x4dc   :  { %v3833_v39 = vmax.f32 %v3489_v63, %v3705_v3  ;;  %v3707_v53 = vmul.f32 0.2, %v3493_v56 }
 0x4dd   :  { %v3834_v14 = vmax.f32 %v3491_v13, %v3706_v15  ;;  %v3708_v12 = vmul.f32 0.2, %v3495_v10 }
 0x4de   :  { %3961 = vst [vmem:[#allocation8 + $0x220] sm:$0xff] %v3833_v39  ;;  %v3835_v51 = vmax.f32 %v3493_v56, %v3707_v53 }
 0x4df   :  { %3962 = vst [vmem:[#allocation8 + $0x228] sm:$0xff] %v3834_v14  ;;  %v3836_v6 = vmax.f32 %v3495_v10, %v3708_v12  ;;  %v3498_v50 = vpop.f32.mrb[192].mxu1 }
 0x4e0   :  { %3963 = vst [vmem:[#allocation8 + $0x230] sm:$0xff] %v3835_v51  ;;  %v3499_v31 = vadd.f32 %v3498_v50, %v5498_v9  ;;  %v3500_v54 = vpop.f32.mrb[193].mxu1 }
 0x4e1   :  { %3964 = vst [vmem:[#allocation8 + $0x238] sm:$0xff] %v3836_v6  ;;  %v3501_v29 = vadd.f32 %v3500_v54, %v5501_v22  ;;  %v3502_v49 = vpop.f32.mrb[194].mxu1 }
 0x4e2   :  { %v3709_v25 = vmul.f32 0.2, %v3499_v31  ;;  %v3503_v7 = vadd.f32 %v3502_v49, %v5498_v9  ;;  %v3504_v17 = vpop.f32.mrb[195].mxu1 }
 0x4e3   :  { %v3710_v20 = vmul.f32 0.2, %v3501_v29  ;;  %v3505_v0 = vadd.f32 %v3504_v17, %v5501_v22 }
 0x4e4   :  { %v3837_v23 = vmax.f32 %v3499_v31, %v3709_v25  ;;  %v3711_v40 = vmul.f32 0.2, %v3503_v7 }
 0x4e5   :  { %v3838_v11 = vmax.f32 %v3501_v29, %v3710_v20  ;;  %v3712_v2 = vmul.f32 0.2, %v3505_v0 }
 0x4e6   :  { %3965 = vst [vmem:[#allocation8 + $0x240] sm:$0xff] %v3837_v23  ;;  %v3839_v24 = vmax.f32 %v3503_v7, %v3711_v40 }
 0x4e7   :  { %3966 = vst [vmem:[#allocation8 + $0x248] sm:$0xff] %v3838_v11  ;;  %v3840_v21 = vmax.f32 %v3505_v0, %v3712_v2  ;;  %v3508_v57 = vpop.f32.mrb[196].mxu1 }
 0x4e8   :  { %3967 = vst [vmem:[#allocation8 + $0x250] sm:$0xff] %v3839_v24  ;;  %v3509_v52 = vadd.f32 %v3508_v57, %v5498_v9  ;;  %v3510_v28 = vpop.f32.mrb[197].mxu1 }
 0x4e9   :  { %3968 = vst [vmem:[#allocation8 + $0x258] sm:$0xff] %v3840_v21  ;;  %v3511_v43 = vadd.f32 %v3510_v28, %v5501_v22  ;;  %v3512_v59 = vpop.f32.mrb[198].mxu1 }
 0x4ea   :  { %v3713_v26 = vmul.f32 0.2, %v3509_v52  ;;  %v3513_v8 = vadd.f32 %v3512_v59, %v5498_v9  ;;  %v3514_v16 = vpop.f32.mrb[199].mxu1 }
 0x4eb   :  { %v3714_v34 = vmul.f32 0.2, %v3511_v43  ;;  %v3515_v36 = vadd.f32 %v3514_v16, %v5501_v22 }
 0x4ec   :  { %v3841_v32 = vmax.f32 %v3509_v52, %v3713_v26  ;;  %v3715_v19 = vmul.f32 0.2, %v3513_v8 }
 0x4ed   :  { %v3842_v58 = vmax.f32 %v3511_v43, %v3714_v34  ;;  %v3716_v33 = vmul.f32 0.2, %v3515_v36 }
 0x4ee   :  { %3969 = vst [vmem:[#allocation8 + $0x260] sm:$0xff] %v3841_v32  ;;  %v3843_v30 = vmax.f32 %v3513_v8, %v3715_v19 }
 0x4ef   :  { %3970 = vst [vmem:[#allocation8 + $0x268] sm:$0xff] %v3842_v58  ;;  %v3844_v1 = vmax.f32 %v3515_v36, %v3716_v33  ;;  %v3518_v42 = vpop.f32.mrb[200].mxu1 }
 0x4f0   :  { %3971 = vst [vmem:[#allocation8 + $0x270] sm:$0xff] %v3843_v30  ;;  %v3519_v5 = vadd.f32 %v3518_v42, %v5498_v9  ;;  %v3520_v45 = vpop.f32.mrb[201].mxu1 }
 0x4f1   :  { %3972 = vst [vmem:[#allocation8 + $0x278] sm:$0xff] %v3844_v1  ;;  %v3521_v27 = vadd.f32 %v3520_v45, %v5501_v22  ;;  %v3522_v38 = vpop.f32.mrb[202].mxu1 }
 0x4f2   :  { %v3717_v35 = vmul.f32 0.2, %v3519_v5  ;;  %v3523_v4 = vadd.f32 %v3522_v38, %v5498_v9  ;;  %v3524_v47 = vpop.f32.mrb[203].mxu1 }
 0x4f3   :  { %v3718_v60 = vmul.f32 0.2, %v3521_v27  ;;  %v3525_v55 = vadd.f32 %v3524_v47, %v5501_v22 }
 0x4f4   :  { %v3845_v46 = vmax.f32 %v3519_v5, %v3717_v35  ;;  %v3719_v41 = vmul.f32 0.2, %v3523_v4 }
 0x4f5   :  { %v3846_v48 = vmax.f32 %v3521_v27, %v3718_v60  ;;  %v3720_v61 = vmul.f32 0.2, %v3525_v55 }
 0x4f6   :  { %3973 = vst [vmem:[#allocation8 + $0x280] sm:$0xff] %v3845_v46  ;;  %v3847_v18 = vmax.f32 %v3523_v4, %v3719_v41 }
 0x4f7   :  { %3974 = vst [vmem:[#allocation8 + $0x288] sm:$0xff] %v3846_v48  ;;  %v3848_v63 = vmax.f32 %v3525_v55, %v3720_v61  ;;  %v3528_v37 = vpop.f32.mrb[204].mxu1 }
 0x4f8   :  { %3975 = vst [vmem:[#allocation8 + $0x290] sm:$0xff] %v3847_v18  ;;  %v3529_v13 = vadd.f32 %v3528_v37, %v5498_v9  ;;  %v3530_v44 = vpop.f32.mrb[205].mxu1 }
 0x4f9   :  { %3976 = vst [vmem:[#allocation8 + $0x298] sm:$0xff] %v3848_v63  ;;  %v3531_v3 = vadd.f32 %v3530_v44, %v5501_v22  ;;  %v3532_v56 = vpop.f32.mrb[206].mxu1 }
 0x4fa   :  { %v3721_v62 = vmul.f32 0.2, %v3529_v13  ;;  %v3533_v15 = vadd.f32 %v3532_v56, %v5498_v9  ;;  %v3534_v10 = vpop.f32.mrb[207].mxu1 }
 0x4fb   :  { %v3722_v39 = vmul.f32 0.2, %v3531_v3  ;;  %v3535_v53 = vadd.f32 %v3534_v10, %v5501_v22 }
 0x4fc   :  { %v3849_v14 = vmax.f32 %v3529_v13, %v3721_v62  ;;  %v3723_v12 = vmul.f32 0.2, %v3533_v15 }
 0x4fd   :  { %v3850_v51 = vmax.f32 %v3531_v3, %v3722_v39  ;;  %v3724_v6 = vmul.f32 0.2, %v3535_v53 }
 0x4fe   :  { %3977 = vst [vmem:[#allocation8 + $0x2a0] sm:$0xff] %v3849_v14  ;;  %v3851_v50 = vmax.f32 %v3533_v15, %v3723_v12 }
 0x4ff   :  { %3978 = vst [vmem:[#allocation8 + $0x2a8] sm:$0xff] %v3850_v51  ;;  %v3852_v31 = vmax.f32 %v3535_v53, %v3724_v6  ;;  %v3538_v54 = vpop.f32.mrb[208].mxu1 }
 0x500   :  { %3979 = vst [vmem:[#allocation8 + $0x2b0] sm:$0xff] %v3851_v50  ;;  %v3539_v29 = vadd.f32 %v3538_v54, %v5498_v9  ;;  %v3540_v49 = vpop.f32.mrb[209].mxu1 }
 0x501   :  { %3980 = vst [vmem:[#allocation8 + $0x2b8] sm:$0xff] %v3852_v31  ;;  %v3541_v25 = vadd.f32 %v3540_v49, %v5501_v22  ;;  %v3542_v7 = vpop.f32.mrb[210].mxu1 }
 0x502   :  { %v3725_v17 = vmul.f32 0.2, %v3539_v29  ;;  %v3543_v20 = vadd.f32 %v3542_v7, %v5498_v9  ;;  %v3544_v0 = vpop.f32.mrb[211].mxu1 }
 0x503   :  { %v3726_v23 = vmul.f32 0.2, %v3541_v25  ;;  %v3545_v40 = vadd.f32 %v3544_v0, %v5501_v22 }
 0x504   :  { %v3853_v11 = vmax.f32 %v3539_v29, %v3725_v17  ;;  %v3727_v2 = vmul.f32 0.2, %v3543_v20 }
 0x505   :  { %v3854_v24 = vmax.f32 %v3541_v25, %v3726_v23  ;;  %v3728_v21 = vmul.f32 0.2, %v3545_v40 }
 0x506   :  { %3981 = vst [vmem:[#allocation8 + $0x2c0] sm:$0xff] %v3853_v11  ;;  %v3855_v57 = vmax.f32 %v3543_v20, %v3727_v2 }
 0x507   :  { %3982 = vst [vmem:[#allocation8 + $0x2c8] sm:$0xff] %v3854_v24  ;;  %v3856_v52 = vmax.f32 %v3545_v40, %v3728_v21  ;;  %v3548_v28 = vpop.f32.mrb[212].mxu1 }
 0x508   :  { %3983 = vst [vmem:[#allocation8 + $0x2d0] sm:$0xff] %v3855_v57  ;;  %v3549_v43 = vadd.f32 %v3548_v28, %v5498_v9  ;;  %v3550_v59 = vpop.f32.mrb[213].mxu1 }
 0x509   :  { %3984 = vst [vmem:[#allocation8 + $0x2d8] sm:$0xff] %v3856_v52  ;;  %v3551_v26 = vadd.f32 %v3550_v59, %v5501_v22  ;;  %v3552_v8 = vpop.f32.mrb[214].mxu1 }
 0x50a   :  { %v3729_v16 = vmul.f32 0.2, %v3549_v43  ;;  %v3553_v34 = vadd.f32 %v3552_v8, %v5498_v9  ;;  %v3554_v36 = vpop.f32.mrb[215].mxu1 }
 0x50b   :  { %v3730_v32 = vmul.f32 0.2, %v3551_v26  ;;  %v3555_v19 = vadd.f32 %v3554_v36, %v5501_v22 }
 0x50c   :  { %v3857_v58 = vmax.f32 %v3549_v43, %v3729_v16  ;;  %v3731_v33 = vmul.f32 0.2, %v3553_v34 }
 0x50d   :  { %v3858_v30 = vmax.f32 %v3551_v26, %v3730_v32  ;;  %v3732_v1 = vmul.f32 0.2, %v3555_v19 }
 0x50e   :  { %3985 = vst [vmem:[#allocation8 + $0x2e0] sm:$0xff] %v3857_v58  ;;  %v3859_v42 = vmax.f32 %v3553_v34, %v3731_v33 }
 0x50f   :  { %3986 = vst [vmem:[#allocation8 + $0x2e8] sm:$0xff] %v3858_v30  ;;  %v3860_v5 = vmax.f32 %v3555_v19, %v3732_v1  ;;  %v3558_v45 = vpop.f32.mrb[216].mxu1 }
 0x510   :  { %3987 = vst [vmem:[#allocation8 + $0x2f0] sm:$0xff] %v3859_v42  ;;  %v3559_v27 = vadd.f32 %v3558_v45, %v5498_v9  ;;  %v3560_v38 = vpop.f32.mrb[217].mxu1 }
 0x511   :  { %3988 = vst [vmem:[#allocation8 + $0x2f8] sm:$0xff] %v3860_v5  ;;  %v3561_v35 = vadd.f32 %v3560_v38, %v5501_v22  ;;  %v3562_v4 = vpop.f32.mrb[218].mxu1 }
 0x512   :  { %v3733_v47 = vmul.f32 0.2, %v3559_v27  ;;  %v3563_v60 = vadd.f32 %v3562_v4, %v5498_v9  ;;  %v3564_v55 = vpop.f32.mrb[219].mxu1 }
 0x513   :  { %v3734_v46 = vmul.f32 0.2, %v3561_v35  ;;  %v3565_v41 = vadd.f32 %v3564_v55, %v5501_v22 }
 0x514   :  { %v3861_v48 = vmax.f32 %v3559_v27, %v3733_v47  ;;  %v3735_v61 = vmul.f32 0.2, %v3563_v60 }
 0x515   :  { %v3862_v18 = vmax.f32 %v3561_v35, %v3734_v46  ;;  %v3736_v63 = vmul.f32 0.2, %v3565_v41 }
 0x516   :  { %3989 = vst [vmem:[#allocation8 + $0x300] sm:$0xff] %v3861_v48  ;;  %v3863_v37 = vmax.f32 %v3563_v60, %v3735_v61 }
 0x517   :  { %3990 = vst [vmem:[#allocation8 + $0x308] sm:$0xff] %v3862_v18  ;;  %v3864_v13 = vmax.f32 %v3565_v41, %v3736_v63  ;;  %v3568_v44 = vpop.f32.mrb[220].mxu1 }
 0x518   :  { %3991 = vst [vmem:[#allocation8 + $0x310] sm:$0xff] %v3863_v37  ;;  %v3569_v3 = vadd.f32 %v3568_v44, %v5498_v9  ;;  %v3570_v56 = vpop.f32.mrb[221].mxu1 }
 0x519   :  { %3992 = vst [vmem:[#allocation8 + $0x318] sm:$0xff] %v3864_v13  ;;  %v3571_v62 = vadd.f32 %v3570_v56, %v5501_v22  ;;  %v3572_v15 = vpop.f32.mrb[222].mxu1 }
 0x51a   :  { %v3737_v10 = vmul.f32 0.2, %v3569_v3  ;;  %v3573_v39 = vadd.f32 %v3572_v15, %v5498_v9  ;;  %v3574_v53 = vpop.f32.mrb[223].mxu1 }
 0x51b   :  { %v3738_v14 = vmul.f32 0.2, %v3571_v62  ;;  %v3575_v12 = vadd.f32 %v3574_v53, %v5501_v22 }
 0x51c   :  { %v3865_v51 = vmax.f32 %v3569_v3, %v3737_v10  ;;  %v3739_v6 = vmul.f32 0.2, %v3573_v39 }
 0x51d   :  { %v3866_v50 = vmax.f32 %v3571_v62, %v3738_v14  ;;  %v3740_v31 = vmul.f32 0.2, %v3575_v12 }
 0x51e   :  { %3993 = vst [vmem:[#allocation8 + $0x320] sm:$0xff] %v3865_v51  ;;  %v3867_v54 = vmax.f32 %v3573_v39, %v3739_v6 }
 0x51f   :  { %3994 = vst [vmem:[#allocation8 + $0x328] sm:$0xff] %v3866_v50  ;;  %v3868_v29 = vmax.f32 %v3575_v12, %v3740_v31  ;;  %v3578_v49 = vpop.f32.mrb[224].mxu1 }
 0x520   :  { %3995 = vst [vmem:[#allocation8 + $0x330] sm:$0xff] %v3867_v54  ;;  %v3579_v25 = vadd.f32 %v3578_v49, %v5498_v9  ;;  %v3580_v7 = vpop.f32.mrb[225].mxu1 }
 0x521   :  { %3996 = vst [vmem:[#allocation8 + $0x338] sm:$0xff] %v3868_v29  ;;  %v3581_v17 = vadd.f32 %v3580_v7, %v5501_v22  ;;  %v3582_v20 = vpop.f32.mrb[226].mxu1 }
 0x522   :  { %v3741_v0 = vmul.f32 0.2, %v3579_v25  ;;  %v3583_v23 = vadd.f32 %v3582_v20, %v5498_v9  ;;  %v3584_v40 = vpop.f32.mrb[227].mxu1 }
 0x523   :  { %v3742_v11 = vmul.f32 0.2, %v3581_v17  ;;  %v3585_v2 = vadd.f32 %v3584_v40, %v5501_v22 }
 0x524   :  { %v3869_v24 = vmax.f32 %v3579_v25, %v3741_v0  ;;  %v3743_v21 = vmul.f32 0.2, %v3583_v23 }
 0x525   :  { %v3870_v57 = vmax.f32 %v3581_v17, %v3742_v11  ;;  %v3744_v52 = vmul.f32 0.2, %v3585_v2 }
 0x526   :  { %3997 = vst [vmem:[#allocation8 + $0x340] sm:$0xff] %v3869_v24  ;;  %v3871_v28 = vmax.f32 %v3583_v23, %v3743_v21 }
 0x527   :  { %3998 = vst [vmem:[#allocation8 + $0x348] sm:$0xff] %v3870_v57  ;;  %v3872_v43 = vmax.f32 %v3585_v2, %v3744_v52  ;;  %v3588_v59 = vpop.f32.mrb[228].mxu1 }
 0x528   :  { %3999 = vst [vmem:[#allocation8 + $0x350] sm:$0xff] %v3871_v28  ;;  %v3589_v26 = vadd.f32 %v3588_v59, %v5498_v9  ;;  %v3590_v8 = vpop.f32.mrb[229].mxu1 }
 0x529   :  { %4000 = vst [vmem:[#allocation8 + $0x358] sm:$0xff] %v3872_v43  ;;  %v3591_v16 = vadd.f32 %v3590_v8, %v5501_v22  ;;  %v3592_v34 = vpop.f32.mrb[230].mxu1 }
 0x52a   :  { %v3745_v36 = vmul.f32 0.2, %v3589_v26  ;;  %v3593_v32 = vadd.f32 %v3592_v34, %v5498_v9  ;;  %v3594_v19 = vpop.f32.mrb[231].mxu1 }
 0x52b   :  { %v3746_v58 = vmul.f32 0.2, %v3591_v16  ;;  %v3595_v33 = vadd.f32 %v3594_v19, %v5501_v22 }
 0x52c   :  { %v3873_v30 = vmax.f32 %v3589_v26, %v3745_v36  ;;  %v3747_v1 = vmul.f32 0.2, %v3593_v32 }
 0x52d   :  { %v3874_v42 = vmax.f32 %v3591_v16, %v3746_v58  ;;  %v3748_v5 = vmul.f32 0.2, %v3595_v33 }
 0x52e   :  { %4001 = vst [vmem:[#allocation8 + $0x360] sm:$0xff] %v3873_v30  ;;  %v3875_v45 = vmax.f32 %v3593_v32, %v3747_v1 }
 0x52f   :  { %4002 = vst [vmem:[#allocation8 + $0x368] sm:$0xff] %v3874_v42  ;;  %v3876_v27 = vmax.f32 %v3595_v33, %v3748_v5  ;;  %v3598_v38 = vpop.f32.mrb[232].mxu1 }
 0x530   :  { %4003 = vst [vmem:[#allocation8 + $0x370] sm:$0xff] %v3875_v45  ;;  %v3599_v35 = vadd.f32 %v3598_v38, %v5498_v9  ;;  %v3600_v4 = vpop.f32.mrb[233].mxu1 }
 0x531   :  { %4004 = vst [vmem:[#allocation8 + $0x378] sm:$0xff] %v3876_v27  ;;  %v3601_v47 = vadd.f32 %v3600_v4, %v5501_v22  ;;  %v3602_v60 = vpop.f32.mrb[234].mxu1 }
 0x532   :  { %v3749_v55 = vmul.f32 0.2, %v3599_v35  ;;  %v3603_v46 = vadd.f32 %v3602_v60, %v5498_v9  ;;  %v3604_v41 = vpop.f32.mrb[235].mxu1 }
 0x533   :  { %v3750_v48 = vmul.f32 0.2, %v3601_v47  ;;  %v3605_v61 = vadd.f32 %v3604_v41, %v5501_v22 }
 0x534   :  { %v3877_v18 = vmax.f32 %v3599_v35, %v3749_v55  ;;  %v3751_v63 = vmul.f32 0.2, %v3603_v46 }
 0x535   :  { %v3878_v37 = vmax.f32 %v3601_v47, %v3750_v48  ;;  %v3752_v13 = vmul.f32 0.2, %v3605_v61 }
 0x536   :  { %4005 = vst [vmem:[#allocation8 + $0x380] sm:$0xff] %v3877_v18  ;;  %v3879_v44 = vmax.f32 %v3603_v46, %v3751_v63 }
 0x537   :  { %4006 = vst [vmem:[#allocation8 + $0x388] sm:$0xff] %v3878_v37  ;;  %v3880_v3 = vmax.f32 %v3605_v61, %v3752_v13  ;;  %v3608_v56 = vpop.f32.mrb[236].mxu1 }
 0x538   :  { %4007 = vst [vmem:[#allocation8 + $0x390] sm:$0xff] %v3879_v44  ;;  %v3609_v62 = vadd.f32 %v3608_v56, %v5498_v9  ;;  %v3610_v15 = vpop.f32.mrb[237].mxu1 }
 0x539   :  { %4008 = vst [vmem:[#allocation8 + $0x398] sm:$0xff] %v3880_v3  ;;  %v3611_v10 = vadd.f32 %v3610_v15, %v5501_v22  ;;  %v3612_v39 = vpop.f32.mrb[238].mxu1 }
 0x53a   :  { %v3753_v53 = vmul.f32 0.2, %v3609_v62  ;;  %v3613_v14 = vadd.f32 %v3612_v39, %v5498_v9  ;;  %v3614_v12 = vpop.f32.mrb[239].mxu1 }
 0x53b   :  { %v3754_v51 = vmul.f32 0.2, %v3611_v10  ;;  %v3615_v6 = vadd.f32 %v3614_v12, %v5501_v22 }
 0x53c   :  { %v3881_v50 = vmax.f32 %v3609_v62, %v3753_v53  ;;  %v3755_v31 = vmul.f32 0.2, %v3613_v14 }
 0x53d   :  { %v3882_v54 = vmax.f32 %v3611_v10, %v3754_v51  ;;  %v3756_v29 = vmul.f32 0.2, %v3615_v6 }
 0x53e   :  { %4009 = vst [vmem:[#allocation8 + $0x3a0] sm:$0xff] %v3881_v50  ;;  %v3883_v49 = vmax.f32 %v3613_v14, %v3755_v31 }
 0x53f   :  { %4010 = vst [vmem:[#allocation8 + $0x3a8] sm:$0xff] %v3882_v54  ;;  %v3884_v25 = vmax.f32 %v3615_v6, %v3756_v29  ;;  %v3618_v7 = vpop.f32.mrb[240].mxu1 }
 0x540   :  { %4011 = vst [vmem:[#allocation8 + $0x3b0] sm:$0xff] %v3883_v49  ;;  %v3619_v17 = vadd.f32 %v3618_v7, %v5498_v9  ;;  %v3620_v20 = vpop.f32.mrb[241].mxu1 }
 0x541   :  { %4012 = vst [vmem:[#allocation8 + $0x3b8] sm:$0xff] %v3884_v25  ;;  %v3621_v0 = vadd.f32 %v3620_v20, %v5501_v22  ;;  %v3622_v23 = vpop.f32.mrb[242].mxu1 }
 0x542   :  { %v3757_v40 = vmul.f32 0.2, %v3619_v17  ;;  %v3623_v11 = vadd.f32 %v3622_v23, %v5498_v9  ;;  %v3624_v2 = vpop.f32.mrb[243].mxu1 }
 0x543   :  { %v3758_v24 = vmul.f32 0.2, %v3621_v0  ;;  %v3625_v21 = vadd.f32 %v3624_v2, %v5501_v22 }
 0x544   :  { %v3885_v57 = vmax.f32 %v3619_v17, %v3757_v40  ;;  %v3759_v52 = vmul.f32 0.2, %v3623_v11 }
 0x545   :  { %v3886_v28 = vmax.f32 %v3621_v0, %v3758_v24  ;;  %v3760_v43 = vmul.f32 0.2, %v3625_v21 }
 0x546   :  { %4013 = vst [vmem:[#allocation8 + $0x3c0] sm:$0xff] %v3885_v57  ;;  %v3887_v59 = vmax.f32 %v3623_v11, %v3759_v52 }
 0x547   :  { %4014 = vst [vmem:[#allocation8 + $0x3c8] sm:$0xff] %v3886_v28  ;;  %v3888_v26 = vmax.f32 %v3625_v21, %v3760_v43  ;;  %v3628_v8 = vpop.f32.mrb[244].mxu1 }
 0x548   :  { %4015 = vst [vmem:[#allocation8 + $0x3d0] sm:$0xff] %v3887_v59  ;;  %v3629_v16 = vadd.f32 %v3628_v8, %v5498_v9  ;;  %v3630_v34 = vpop.f32.mrb[245].mxu1 }
 0x549   :  { %4016 = vst [vmem:[#allocation8 + $0x3d8] sm:$0xff] %v3888_v26  ;;  %v3631_v36 = vadd.f32 %v3630_v34, %v5501_v22  ;;  %v3632_v32 = vpop.f32.mrb[246].mxu1 }
 0x54a   :  { %v3761_v19 = vmul.f32 0.2, %v3629_v16  ;;  %v3633_v58 = vadd.f32 %v3632_v32, %v5498_v9  ;;  %v3634_v33 = vpop.f32.mrb[247].mxu1 }
 0x54b   :  { %v3762_v30 = vmul.f32 0.2, %v3631_v36  ;;  %v3635_v1 = vadd.f32 %v3634_v33, %v5501_v22 }
 0x54c   :  { %v3889_v42 = vmax.f32 %v3629_v16, %v3761_v19  ;;  %v3763_v5 = vmul.f32 0.2, %v3633_v58 }
 0x54d   :  { %v3890_v45 = vmax.f32 %v3631_v36, %v3762_v30  ;;  %v3764_v27 = vmul.f32 0.2, %v3635_v1 }
 0x54e   :  { %4017 = vst [vmem:[#allocation8 + $0x3e0] sm:$0xff] %v3889_v42  ;;  %v3891_v38 = vmax.f32 %v3633_v58, %v3763_v5 }
 0x54f   :  { %4018 = vst [vmem:[#allocation8 + $0x3e8] sm:$0xff] %v3890_v45  ;;  %v3892_v35 = vmax.f32 %v3635_v1, %v3764_v27 }
 0x550   :  { %4019 = vst [vmem:[#allocation8 + $0x3f0] sm:$0xff] %v3891_v38 }
 0x551   :  { %4020 = vst [vmem:[#allocation8 + $0x3f8] sm:$0xff] %v3892_v35 }
 0x552   :  { %4576 = shalt.err (!%p4573_p0)
}
 0x553   :  { %s4577_s10 = scalar_lea.hbm %s5655_s4, 16384 }
 0x554   :  { %p4578_p1 = scmp.ne.s32.totalorder %s5655_s4, %s4577_s10  ;;  %p4581_p2 = scmp.lt.u32.totalorder %s4577_s10, %s5655_s4 }
 0x556   :  { %p4583_p3 = pnand %p4581_p2, %p4578_p1 }
 0x558   :  { %4586 = shalt.err (!%p4583_p3)
}
 0x559   :  { %s4600_s14 = smov 256   ;;  %s4601_s15 = smov 16  }
 0x55a   :  { %4032 = dma.vmem_to_hbm [thread:$0]  %s4027_s6, 16384, %s5655_s4, [#allocation4], %s4600_s14, %s4600_s14, %s4601_s15  }
 0x55b   :  { %4591 = dma.done.wait [#allocation4], 16384  }
 0x55c   :  { %4592 = vsyncadd [#allocation4], 4294950912 }
 0x55d   :  { %4036 = vsyncpa [#allocation3], 1 }
 0x55e   :  { %4037 = vsyncpa [#allocation6], 1 }
 0x55f   :  { %4038 = vsyncpa [#allocation4], 1 }

</bundles_post_ra>
